<compile_context>
chip_gen: v6e
topology: v6e:2x2x1
jax: 0.10.0
libtpu: 0.0.40
codegen_flags: <defaults>
</compile_context>

<pallas_src>
import functools

import jax
import jax.numpy as jnp
from jax.experimental import pallas as pl
from jax.experimental.pallas import tpu as pltpu


def _gelu_tanh(x):
    # tanh-approx GELU (EUP tanh).  Deviates from exact erf GELU by <~1e-3.
    c = 0.7978845608028654  # sqrt(2/pi)
    return 0.5 * x * (1.0 + jnp.tanh(c * (x + 0.044715 * x * x * x)))


def _layer_norm(x, w, b, eps=1e-5):
    mu = jnp.mean(x, axis=-1, keepdims=True)
    var = jnp.mean(jnp.square(x - mu), axis=-1, keepdims=True)
    return (x - mu) * jax.lax.rsqrt(var + eps) * w + b


def _block_kernel(x_ref, n1w_ref, n1b_ref, qkvw_ref, projw_ref, projb_ref,
                  n2w_ref, n2b_ref, fc1w_ref, fc1b_ref, lnw_ref, lnb_ref,
                  fc2w_ref, fc2b_ref, out_ref, attn_ref, *,
                  num_heads, head_dim, compute_dtype):
    bt, n_tok, C = x_ref.shape
    H, D = num_heads, head_dim
    rows = bt * n_tok

    x = x_ref[...].reshape(rows, C).astype(jnp.float32)

    # ---------------- attention branch: x + proj(MHSA(norm1(x))) -----------
    xn = _layer_norm(x, n1w_ref[...], n1b_ref[...])
    # qkv_bias=False.  Softmax scale was folded into the Q weight columns.
    qkv = jnp.dot(xn.astype(compute_dtype), qkvw_ref[...],
                  preferred_element_type=jnp.float32)          # (rows, 3C)
    qkv = qkv.astype(compute_dtype)

    def heads(base):
        # (rows, C) channel range -> (H*bt, n_tok, D) head-batched stack.
        parts = [qkv[:, base + h * D: base + (h + 1) * D].reshape(bt, n_tok, D)
                 for h in range(H)]
        return jnp.concatenate(parts, axis=0)

    qh = heads(0)
    kh = heads(C)
    vh = heads(2 * C)

    # Batched-head attention (single dot_general per matmul, f32 accumulate).
    s = jnp.einsum('bqd,bkd->bqk', qh, kh,
                   preferred_element_type=jnp.float32)         # (H*bt, n, n)
    s = s - jnp.max(s, axis=-1, keepdims=True)
    p = jnp.exp(s)
    p = p * pl.reciprocal(jnp.sum(p, axis=-1, keepdims=True), approx=True)
    o = jnp.einsum('bqk,bkd->bqd', p.astype(compute_dtype), vh,
                   preferred_element_type=jnp.float32)         # (H*bt, n, D)

    # Merge heads back into a (rows, C) VMEM slab (no lane concatenate).
    o = o.astype(compute_dtype).reshape(H, rows, D)
    for h in range(H):
        attn_ref[:, h * D:(h + 1) * D] = o[h]

    attn = jnp.dot(attn_ref[...], projw_ref[...],
                   preferred_element_type=jnp.float32) + projb_ref[...]
    x1 = x + attn

    # ---------------- MLP branch: x1 + fc2(LN(GELU(fc1(norm2(x1))))) -------
    x2 = _layer_norm(x1, n2w_ref[...], n2b_ref[...])
    h1 = jnp.dot(x2.astype(compute_dtype), fc1w_ref[...],
                 preferred_element_type=jnp.float32) + fc1b_ref[...]
    h1 = _gelu_tanh(h1)
    h1 = _layer_norm(h1, lnw_ref[...], lnb_ref[...])            # Mlp(use_ln=True)
    h2 = jnp.dot(h1.astype(compute_dtype), fc2w_ref[...],
                 preferred_element_type=jnp.float32) + fc2b_ref[...]

    out_ref[...] = (x1 + h2).reshape(bt, n_tok, C).astype(out_ref.dtype)


def block_forward(x, params, *, num_heads, compute_dtype=jnp.bfloat16,
                  batch_block=None):
    B, N, C = x.shape
    D = C // num_heads
    scale = D ** (-0.5)
    f32 = jnp.float32
    cd = compute_dtype

    # --- batch folding: several batch elements per block (amortize per-step
    # overhead / small-DMA cost).  Needs N % 8 == 0 for clean row regrouping.
    if batch_block is None:
        bt = 1
        if N % 8 == 0:
            for cand in (4, 2, 1):
                if B % cand == 0:
                    bt = cand
                    break
    else:
        bt = batch_block
    assert B % bt == 0, "batch_block must divide B"

    def row(v):   # 1-D params -> (1, dim) rows for in-kernel broadcast
        return v.astype(f32).reshape(1, -1)

    # Weights -> (in, out) layout, bf16 for the MXU; attn scale folded into Q.
    qkv_w = params["qkv_w"].astype(f32).T                     # (C, 3C)
    qkv_w = qkv_w.at[:, :C].multiply(scale)
    args = [
        row(params["n1_w"]), row(params["n1_b"]),
        qkv_w.astype(cd),
        params["proj_w"].astype(f32).T.astype(cd),            # (C, C)
        row(params["proj_b"]),
        row(params["n2_w"]), row(params["n2_b"]),
        params["fc1_w"].astype(f32).T.astype(cd),              # (C, hidden)
        row(params["fc1_b"]),
        row(params["ln_w"]), row(params["ln_b"]),
        params["fc2_w"].astype(f32).T.astype(cd),              # (hidden, C)
        row(params["fc2_b"]),
    ]

    def full_spec(a):
        return pl.BlockSpec(a.shape, lambda b, _n=a.ndim: (0,) * _n)

    in_specs = [pl.BlockSpec((bt, N, C), lambda b: (b, 0, 0))]
    in_specs += [full_spec(a) for a in args]

    # Explicit scoped-VMEM budget: weights (double-buffered) + x/out blocks
    # + headroom for activations, capped to stay inside v7x's 64 MiB/TC.
    arg_bytes = sum(int(a.size) * a.dtype.itemsize for a in args)
    blk_bytes = bt * N * C * x.dtype.itemsize
    vmem_limit = int(min(64 * 1024 * 1024,
                         max(32 * 1024 * 1024,
                             2 * arg_bytes + 4 * blk_bytes + (8 << 20))))

    kernel = functools.partial(_block_kernel, num_heads=num_heads,
                               head_dim=D, compute_dtype=cd)

    return pl.pallas_call(
        kernel,
        out_shape=jax.ShapeDtypeStruct((B, N, C), x.dtype),
        grid=(B // bt,),
        in_specs=in_specs,
        out_specs=pl.BlockSpec((bt, N, C), lambda b: (b, 0, 0)),
        scratch_shapes=[pltpu.VMEM((bt * N, C), cd)],          # head-merge slab
        compiler_params=pltpu.CompilerParams(
            dimension_semantics=("parallel",),
            vmem_limit_bytes=vmem_limit),
    )(x, *args)


def init_params(key, dim, num_heads, mlp_ratio=4.0):
    hidden = int(dim * mlp_ratio)
    ks = jax.random.split(key, 4)

    def tn(k, shape):  # trunc_normal_(std=0.02)
        return 0.02 * jax.random.truncated_normal(k, -2.0, 2.0, shape,
                                                  jnp.float32)

    return {
        "n1_w": jnp.ones((dim,), jnp.float32),
        "n1_b": jnp.zeros((dim,), jnp.float32),
        "qkv_w": tn(ks[0], (3 * dim, dim)),          # PyTorch (out, in), qkv_bias=False
        "proj_w": tn(ks[1], (dim, dim)),
        "proj_b": jnp.zeros((dim,), jnp.float32),
        "n2_w": jnp.ones((dim,), jnp.float32),
        "n2_b": jnp.zeros((dim,), jnp.float32),
        "fc1_w": tn(ks[2], (hidden, dim)),
        "fc1_b": jnp.zeros((hidden,), jnp.float32),
        "ln_w": jnp.ones((hidden,), jnp.float32),
        "ln_b": jnp.zeros((hidden,), jnp.float32),
        "fc2_w": tn(ks[3], (dim, hidden)),
        "fc2_b": jnp.zeros((dim,), jnp.float32),
    }


def block_reference(x, params, *, num_heads):
    # Pure-JAX f32 mirror of the PyTorch forward (eval mode) for validation.
    B, N, C = x.shape
    D = C // num_heads
    scale = D ** (-0.5)

    def ln(y, w, b, eps=1e-5):
        mu = y.mean(-1, keepdims=True)
        var = ((y - mu) ** 2).mean(-1, keepdims=True)
        return (y - mu) / jnp.sqrt(var + eps) * w + b

    xn = ln(x, params["n1_w"], params["n1_b"])
    qkv = xn @ params["qkv_w"].T                       # (B, N, 3C)
    qkv = qkv.reshape(B, N, 3, num_heads, D).transpose(2, 0, 3, 1, 4)
    q, k, v = qkv[0], qkv[1], qkv[2]                   # (B, H, N, D)
    attn = jnp.einsum("bhid,bhjd->bhij", q, k) * scale
    attn = jax.nn.softmax(attn, axis=-1)
    o = jnp.einsum("bhij,bhjd->bhid", attn, v)
    o = o.transpose(0, 2, 1, 3).reshape(B, N, C)
    o = o @ params["proj_w"].T + params["proj_b"]
    x1 = x + o

    x2 = ln(x1, params["n2_w"], params["n2_b"])
    h = x2 @ params["fc1_w"].T + params["fc1_b"]
    h = jax.nn.gelu(h, approximate=False)
    h = ln(h, params["ln_w"], params["ln_b"])
    h = h @ params["fc2_w"].T + params["fc2_b"]
    return x1 + h


if __name__ == "__main__":
    key = jax.random.PRNGKey(0)
    kx, kp = jax.random.split(key)

    # Small but lane-dense shapes (C multiple of 128 per perf feedback).
    B, N, C, H = 4, 16, 128, 8          # head_dim=16, mlp hidden=512
    x = jax.random.normal(kx, (B, N, C), jnp.float32)
    params = init_params(kp, C, H)

    out = jax.block_until_ready(block_forward(x, params, num_heads=H))
    ref = block_reference(x, params, num_heads=H)

    err = float(jnp.max(jnp.abs(out - ref)))
    assert out.shape == (B, N, C)
    # bf16 matmuls + tanh-GELU + approx reciprocal vs exact f32 reference.
    assert err < 5e-2, f"kernel/reference mismatch, max abs err = {err}"
    print("KERNEL_OK")
</pallas_src>

<mosaic_0001>
module attributes {stable_mosaic.version = 11 : i64} {
  func.func @_block_kernel(%arg0: i32, %arg1: memref<4x16x128xf32, #tpu.memory_space<vmem>>, %arg2: memref<1x128xf32, #tpu.memory_space<vmem>>, %arg3: memref<1x128xf32, #tpu.memory_space<vmem>>, %arg4: memref<128x384xbf16, #tpu.memory_space<vmem>>, %arg5: memref<128x128xbf16, #tpu.memory_space<vmem>>, %arg6: memref<1x128xf32, #tpu.memory_space<vmem>>, %arg7: memref<1x128xf32, #tpu.memory_space<vmem>>, %arg8: memref<1x128xf32, #tpu.memory_space<vmem>>, %arg9: memref<128x512xbf16, #tpu.memory_space<vmem>>, %arg10: memref<1x512xf32, #tpu.memory_space<vmem>>, %arg11: memref<1x512xf32, #tpu.memory_space<vmem>>, %arg12: memref<1x512xf32, #tpu.memory_space<vmem>>, %arg13: memref<512x128xbf16, #tpu.memory_space<vmem>>, %arg14: memref<1x128xf32, #tpu.memory_space<vmem>>, %arg15: memref<4x16x128xf32, #tpu.memory_space<vmem>>, %arg16: memref<64x128xbf16, #tpu.memory_space<vmem>>) attributes {dimension_semantics = [#tpu.dimension_semantics<parallel>], iteration_bounds = array<i64: 1>, scalar_prefetch = 0 : i64, scratch_operands = 1 : i64, tpu.core_type = #tpu.core_type<tc>, window_params = [{transform_indices = @transform_0, window_bounds = array<i64: 4, 16, 128>}, {pipeline_mode = #tpu.pipeline_mode<synchronous>, transform_indices = @transform_1, window_bounds = array<i64: 1, 128>}, {pipeline_mode = #tpu.pipeline_mode<synchronous>, transform_indices = @transform_2, window_bounds = array<i64: 1, 128>}, {pipeline_mode = #tpu.pipeline_mode<synchronous>, transform_indices = @transform_3, window_bounds = array<i64: 128, 384>}, {pipeline_mode = #tpu.pipeline_mode<synchronous>, transform_indices = @transform_4, window_bounds = array<i64: 128, 128>}, {pipeline_mode = #tpu.pipeline_mode<synchronous>, transform_indices = @transform_5, window_bounds = array<i64: 1, 128>}, {pipeline_mode = #tpu.pipeline_mode<synchronous>, transform_indices = @transform_6, window_bounds = array<i64: 1, 128>}, {pipeline_mode = #tpu.pipeline_mode<synchronous>, transform_indices = @transform_7, window_bounds = array<i64: 1, 128>}, {pipeline_mode = #tpu.pipeline_mode<synchronous>, transform_indices = @transform_8, window_bounds = array<i64: 128, 512>}, {pipeline_mode = #tpu.pipeline_mode<synchronous>, transform_indices = @transform_9, window_bounds = array<i64: 1, 512>}, {pipeline_mode = #tpu.pipeline_mode<synchronous>, transform_indices = @transform_10, window_bounds = array<i64: 1, 512>}, {pipeline_mode = #tpu.pipeline_mode<synchronous>, transform_indices = @transform_11, window_bounds = array<i64: 1, 512>}, {pipeline_mode = #tpu.pipeline_mode<synchronous>, transform_indices = @transform_12, window_bounds = array<i64: 512, 128>}, {pipeline_mode = #tpu.pipeline_mode<synchronous>, transform_indices = @transform_13, window_bounds = array<i64: 1, 128>}, {transform_indices = @transform_14, window_bounds = array<i64: 4, 16, 128>}]} {
    %c0 = arith.constant 0 : index
    %c0_0 = arith.constant 0 : index
    %c0_1 = arith.constant 0 : index
    %0 = vector.load %arg1[%c0, %c0_0, %c0_1] : memref<4x16x128xf32, #tpu.memory_space<vmem>>, vector<4x16x128xf32>
    %1 = vector.shape_cast %0 : vector<4x16x128xf32> to vector<64x128xf32>
    %c0_2 = arith.constant 0 : index
    %c0_3 = arith.constant 0 : index
    %2 = vector.load %arg2[%c0_2, %c0_3] : memref<1x128xf32, #tpu.memory_space<vmem>>, vector<1x128xf32>
    %c0_4 = arith.constant 0 : index
    %c0_5 = arith.constant 0 : index
    %3 = vector.load %arg3[%c0_4, %c0_5] : memref<1x128xf32, #tpu.memory_space<vmem>>, vector<1x128xf32>
    %cst = arith.constant dense<0.000000e+00> : vector<64xf32>
    %4 = vector.multi_reduction <add>, %1, %cst [1] : vector<64x128xf32> to vector<64xf32>
    %5 = vector.shape_cast %4 : vector<64xf32> to vector<64x1xf32>
    %cst_6 = arith.constant 1.280000e+02 : f32
    %6 = vector.broadcast %cst_6 : f32 to vector<64x1xf32>
    %7 = arith.divf %5, %6 : vector<64x1xf32>
    %8 = vector.broadcast %7 : vector<64x1xf32> to vector<64x128xf32>
    %9 = arith.subf %1, %8 : vector<64x128xf32>
    %10 = arith.mulf %9, %9 : vector<64x128xf32>
    %cst_7 = arith.constant dense<0.000000e+00> : vector<64xf32>
    %11 = vector.multi_reduction <add>, %10, %cst_7 [1] : vector<64x128xf32> to vector<64xf32>
    %12 = vector.shape_cast %11 : vector<64xf32> to vector<64x1xf32>
    %cst_8 = arith.constant 1.280000e+02 : f32
    %13 = vector.broadcast %cst_8 : f32 to vector<64x1xf32>
    %14 = arith.divf %12, %13 : vector<64x1xf32>
    %15 = vector.broadcast %7 : vector<64x1xf32> to vector<64x128xf32>
    %16 = arith.subf %1, %15 : vector<64x128xf32>
    %cst_9 = arith.constant 9.99999974E-6 : f32
    %17 = vector.broadcast %cst_9 : f32 to vector<64x1xf32>
    %18 = arith.addf %14, %17 : vector<64x1xf32>
    %19 = math.rsqrt %18 : vector<64x1xf32>
    %20 = vector.broadcast %19 : vector<64x1xf32> to vector<64x128xf32>
    %21 = arith.mulf %16, %20 : vector<64x128xf32>
    %22 = vector.broadcast %2 : vector<1x128xf32> to vector<64x128xf32>
    %23 = arith.mulf %21, %22 : vector<64x128xf32>
    %24 = vector.broadcast %3 : vector<1x128xf32> to vector<64x128xf32>
    %25 = arith.addf %23, %24 : vector<64x128xf32>
    %26 = arith.truncf %25 : vector<64x128xf32> to vector<64x128xbf16>
    %c0_10 = arith.constant 0 : index
    %c0_11 = arith.constant 0 : index
    %27 = vector.load %arg4[%c0_10, %c0_11] : memref<128x384xbf16, #tpu.memory_space<vmem>>, vector<128x384xbf16>
    %cst_12 = arith.constant dense<0.000000e+00> : vector<64x384xf32>
    %28 = tpu.matmul %26, %27, %cst_12 {dimension_numbers = #tpu.dot_dimension_numbers<[1], [0], [0], [1], [0, 0, 1, 1], [], []>} : vector<64x128xbf16>, vector<128x384xbf16>, vector<64x384xf32> -> vector<64x384xf32>
    %29 = arith.truncf %28 : vector<64x384xf32> to vector<64x384xbf16>
    %30 = vector.extract_strided_slice %29 {offsets = [0, 0], sizes = [64, 16], strides = [1, 1]} : vector<64x384xbf16> to vector<64x16xbf16>
    %31 = vector.shape_cast %30 : vector<64x16xbf16> to vector<4x16x16xbf16>
    %32 = vector.extract_strided_slice %29 {offsets = [0, 16], sizes = [64, 16], strides = [1, 1]} : vector<64x384xbf16> to vector<64x16xbf16>
    %33 = vector.shape_cast %32 : vector<64x16xbf16> to vector<4x16x16xbf16>
    %34 = vector.extract_strided_slice %29 {offsets = [0, 32], sizes = [64, 16], strides = [1, 1]} : vector<64x384xbf16> to vector<64x16xbf16>
    %35 = vector.shape_cast %34 : vector<64x16xbf16> to vector<4x16x16xbf16>
    %36 = vector.extract_strided_slice %29 {offsets = [0, 48], sizes = [64, 16], strides = [1, 1]} : vector<64x384xbf16> to vector<64x16xbf16>
    %37 = vector.shape_cast %36 : vector<64x16xbf16> to vector<4x16x16xbf16>
    %38 = vector.extract_strided_slice %29 {offsets = [0, 64], sizes = [64, 16], strides = [1, 1]} : vector<64x384xbf16> to vector<64x16xbf16>
    %39 = vector.shape_cast %38 : vector<64x16xbf16> to vector<4x16x16xbf16>
    %40 = vector.extract_strided_slice %29 {offsets = [0, 80], sizes = [64, 16], strides = [1, 1]} : vector<64x384xbf16> to vector<64x16xbf16>
    %41 = vector.shape_cast %40 : vector<64x16xbf16> to vector<4x16x16xbf16>
    %42 = vector.extract_strided_slice %29 {offsets = [0, 96], sizes = [64, 16], strides = [1, 1]} : vector<64x384xbf16> to vector<64x16xbf16>
    %43 = vector.shape_cast %42 : vector<64x16xbf16> to vector<4x16x16xbf16>
    %44 = vector.extract_strided_slice %29 {offsets = [0, 112], sizes = [64, 16], strides = [1, 1]} : vector<64x384xbf16> to vector<64x16xbf16>
    %45 = vector.shape_cast %44 : vector<64x16xbf16> to vector<4x16x16xbf16>
    %46 = tpu.concatenate %31, %33, %35, %37, %39, %41, %43, %45 in 0 : vector<4x16x16xbf16>, vector<4x16x16xbf16>, vector<4x16x16xbf16>, vector<4x16x16xbf16>, vector<4x16x16xbf16>, vector<4x16x16xbf16>, vector<4x16x16xbf16>, vector<4x16x16xbf16> -> vector<32x16x16xbf16>
    %47 = vector.extract_strided_slice %29 {offsets = [0, 128], sizes = [64, 16], strides = [1, 1]} : vector<64x384xbf16> to vector<64x16xbf16>
    %48 = vector.shape_cast %47 : vector<64x16xbf16> to vector<4x16x16xbf16>
    %49 = vector.extract_strided_slice %29 {offsets = [0, 144], sizes = [64, 16], strides = [1, 1]} : vector<64x384xbf16> to vector<64x16xbf16>
    %50 = vector.shape_cast %49 : vector<64x16xbf16> to vector<4x16x16xbf16>
    %51 = vector.extract_strided_slice %29 {offsets = [0, 160], sizes = [64, 16], strides = [1, 1]} : vector<64x384xbf16> to vector<64x16xbf16>
    %52 = vector.shape_cast %51 : vector<64x16xbf16> to vector<4x16x16xbf16>
    %53 = vector.extract_strided_slice %29 {offsets = [0, 176], sizes = [64, 16], strides = [1, 1]} : vector<64x384xbf16> to vector<64x16xbf16>
    %54 = vector.shape_cast %53 : vector<64x16xbf16> to vector<4x16x16xbf16>
    %55 = vector.extract_strided_slice %29 {offsets = [0, 192], sizes = [64, 16], strides = [1, 1]} : vector<64x384xbf16> to vector<64x16xbf16>
    %56 = vector.shape_cast %55 : vector<64x16xbf16> to vector<4x16x16xbf16>
    %57 = vector.extract_strided_slice %29 {offsets = [0, 208], sizes = [64, 16], strides = [1, 1]} : vector<64x384xbf16> to vector<64x16xbf16>
    %58 = vector.shape_cast %57 : vector<64x16xbf16> to vector<4x16x16xbf16>
    %59 = vector.extract_strided_slice %29 {offsets = [0, 224], sizes = [64, 16], strides = [1, 1]} : vector<64x384xbf16> to vector<64x16xbf16>
    %60 = vector.shape_cast %59 : vector<64x16xbf16> to vector<4x16x16xbf16>
    %61 = vector.extract_strided_slice %29 {offsets = [0, 240], sizes = [64, 16], strides = [1, 1]} : vector<64x384xbf16> to vector<64x16xbf16>
    %62 = vector.shape_cast %61 : vector<64x16xbf16> to vector<4x16x16xbf16>
    %63 = tpu.concatenate %48, %50, %52, %54, %56, %58, %60, %62 in 0 : vector<4x16x16xbf16>, vector<4x16x16xbf16>, vector<4x16x16xbf16>, vector<4x16x16xbf16>, vector<4x16x16xbf16>, vector<4x16x16xbf16>, vector<4x16x16xbf16>, vector<4x16x16xbf16> -> vector<32x16x16xbf16>
    %64 = vector.extract_strided_slice %29 {offsets = [0, 256], sizes = [64, 16], strides = [1, 1]} : vector<64x384xbf16> to vector<64x16xbf16>
    %65 = vector.shape_cast %64 : vector<64x16xbf16> to vector<4x16x16xbf16>
    %66 = vector.extract_strided_slice %29 {offsets = [0, 272], sizes = [64, 16], strides = [1, 1]} : vector<64x384xbf16> to vector<64x16xbf16>
    %67 = vector.shape_cast %66 : vector<64x16xbf16> to vector<4x16x16xbf16>
    %68 = vector.extract_strided_slice %29 {offsets = [0, 288], sizes = [64, 16], strides = [1, 1]} : vector<64x384xbf16> to vector<64x16xbf16>
    %69 = vector.shape_cast %68 : vector<64x16xbf16> to vector<4x16x16xbf16>
    %70 = vector.extract_strided_slice %29 {offsets = [0, 304], sizes = [64, 16], strides = [1, 1]} : vector<64x384xbf16> to vector<64x16xbf16>
    %71 = vector.shape_cast %70 : vector<64x16xbf16> to vector<4x16x16xbf16>
    %72 = vector.extract_strided_slice %29 {offsets = [0, 320], sizes = [64, 16], strides = [1, 1]} : vector<64x384xbf16> to vector<64x16xbf16>
    %73 = vector.shape_cast %72 : vector<64x16xbf16> to vector<4x16x16xbf16>
    %74 = vector.extract_strided_slice %29 {offsets = [0, 336], sizes = [64, 16], strides = [1, 1]} : vector<64x384xbf16> to vector<64x16xbf16>
    %75 = vector.shape_cast %74 : vector<64x16xbf16> to vector<4x16x16xbf16>
    %76 = vector.extract_strided_slice %29 {offsets = [0, 352], sizes = [64, 16], strides = [1, 1]} : vector<64x384xbf16> to vector<64x16xbf16>
    %77 = vector.shape_cast %76 : vector<64x16xbf16> to vector<4x16x16xbf16>
    %78 = vector.extract_strided_slice %29 {offsets = [0, 368], sizes = [64, 16], strides = [1, 1]} : vector<64x384xbf16> to vector<64x16xbf16>
    %79 = vector.shape_cast %78 : vector<64x16xbf16> to vector<4x16x16xbf16>
    %80 = tpu.concatenate %65, %67, %69, %71, %73, %75, %77, %79 in 0 : vector<4x16x16xbf16>, vector<4x16x16xbf16>, vector<4x16x16xbf16>, vector<4x16x16xbf16>, vector<4x16x16xbf16>, vector<4x16x16xbf16>, vector<4x16x16xbf16>, vector<4x16x16xbf16> -> vector<32x16x16xbf16>
    "tpu.trace_start"() <{level = 10 : i32, message = "bqd,bkd->bqk"}> : () -> ()
    %cst_13 = arith.constant dense<0.000000e+00> : vector<32x16x16xf32>
    %81 = tpu.matmul %46, %63, %cst_13 {dimension_numbers = #tpu.dot_dimension_numbers<[2], [2], [1], [1], [0, 0, 0, 1, 1, 1], [0], [0]>} : vector<32x16x16xbf16>, vector<32x16x16xbf16>, vector<32x16x16xf32> -> vector<32x16x16xf32>
    "tpu.trace_stop"() : () -> ()
    %cst_14 = arith.constant dense<0xFF800000> : vector<32x16xf32>
    %82 = vector.multi_reduction <maximumf>, %81, %cst_14 [2] : vector<32x16x16xf32> to vector<32x16xf32>
    %83 = vector.shape_cast %82 : vector<32x16xf32> to vector<32x16x1xf32>
    %84 = vector.broadcast %83 : vector<32x16x1xf32> to vector<32x16x16xf32>
    %85 = arith.subf %81, %84 : vector<32x16x16xf32>
    %86 = math.exp %85 : vector<32x16x16xf32>
    %cst_15 = arith.constant dense<0.000000e+00> : vector<32x16xf32>
    %87 = vector.multi_reduction <add>, %86, %cst_15 [2] : vector<32x16x16xf32> to vector<32x16xf32>
    %88 = vector.shape_cast %87 : vector<32x16xf32> to vector<32x16x1xf32>
    %89 = tpu.reciprocal %88 {approx = true} : vector<32x16x1xf32> -> vector<32x16x1xf32>
    %90 = vector.broadcast %89 : vector<32x16x1xf32> to vector<32x16x16xf32>
    %91 = arith.mulf %86, %90 : vector<32x16x16xf32>
    %92 = arith.truncf %91 : vector<32x16x16xf32> to vector<32x16x16xbf16>
    "tpu.trace_start"() <{level = 10 : i32, message = "bqk,bkd->bqd"}> : () -> ()
    %cst_16 = arith.constant dense<0.000000e+00> : vector<32x16x16xf32>
    %93 = tpu.matmul %92, %80, %cst_16 {dimension_numbers = #tpu.dot_dimension_numbers<[2], [1], [1], [2], [0, 0, 0, 1, 1, 2], [0], [0]>} : vector<32x16x16xbf16>, vector<32x16x16xbf16>, vector<32x16x16xf32> -> vector<32x16x16xf32>
    "tpu.trace_stop"() : () -> ()
    %94 = arith.truncf %93 : vector<32x16x16xf32> to vector<32x16x16xbf16>
    %95 = vector.shape_cast %94 : vector<32x16x16xbf16> to vector<8x64x16xbf16>
    %96 = vector.extract_strided_slice %95 {offsets = [0, 0, 0], sizes = [1, 64, 16], strides = [1, 1, 1]} : vector<8x64x16xbf16> to vector<1x64x16xbf16>
    %97 = vector.shape_cast %96 : vector<1x64x16xbf16> to vector<64x16xbf16>
    %c0_17 = arith.constant 0 : index
    %c0_18 = arith.constant 0 : index
    %98 = vector.load %arg16[%c0_17, %c0_18] : memref<64x128xbf16, #tpu.memory_space<vmem>>, vector<64x16xbf16>
    tpu.vector_store %arg16[%c0_17, %c0_18], %97 {strides = array<i32>} : memref<64x128xbf16, #tpu.memory_space<vmem>>, vector<64x16xbf16>,
    %99 = vector.extract_strided_slice %95 {offsets = [1, 0, 0], sizes = [1, 64, 16], strides = [1, 1, 1]} : vector<8x64x16xbf16> to vector<1x64x16xbf16>
    %100 = vector.shape_cast %99 : vector<1x64x16xbf16> to vector<64x16xbf16>
    %c0_19 = arith.constant 0 : index
    %c16 = arith.constant 16 : index
    %101 = vector.load %arg16[%c0_19, %c16] : memref<64x128xbf16, #tpu.memory_space<vmem>>, vector<64x16xbf16>
    tpu.vector_store %arg16[%c0_19, %c16], %100 {strides = array<i32>} : memref<64x128xbf16, #tpu.memory_space<vmem>>, vector<64x16xbf16>,
    %102 = vector.extract_strided_slice %95 {offsets = [2, 0, 0], sizes = [1, 64, 16], strides = [1, 1, 1]} : vector<8x64x16xbf16> to vector<1x64x16xbf16>
    %103 = vector.shape_cast %102 : vector<1x64x16xbf16> to vector<64x16xbf16>
    %c0_20 = arith.constant 0 : index
    %c32 = arith.constant 32 : index
    %104 = vector.load %arg16[%c0_20, %c32] : memref<64x128xbf16, #tpu.memory_space<vmem>>, vector<64x16xbf16>
    tpu.vector_store %arg16[%c0_20, %c32], %103 {strides = array<i32>} : memref<64x128xbf16, #tpu.memory_space<vmem>>, vector<64x16xbf16>,
    %105 = vector.extract_strided_slice %95 {offsets = [3, 0, 0], sizes = [1, 64, 16], strides = [1, 1, 1]} : vector<8x64x16xbf16> to vector<1x64x16xbf16>
    %106 = vector.shape_cast %105 : vector<1x64x16xbf16> to vector<64x16xbf16>
    %c0_21 = arith.constant 0 : index
    %c48 = arith.constant 48 : index
    %107 = vector.load %arg16[%c0_21, %c48] : memref<64x128xbf16, #tpu.memory_space<vmem>>, vector<64x16xbf16>
    tpu.vector_store %arg16[%c0_21, %c48], %106 {strides = array<i32>} : memref<64x128xbf16, #tpu.memory_space<vmem>>, vector<64x16xbf16>,
    %108 = vector.extract_strided_slice %95 {offsets = [4, 0, 0], sizes = [1, 64, 16], strides = [1, 1, 1]} : vector<8x64x16xbf16> to vector<1x64x16xbf16>
    %109 = vector.shape_cast %108 : vector<1x64x16xbf16> to vector<64x16xbf16>
    %c0_22 = arith.constant 0 : index
    %c64 = arith.constant 64 : index
    %110 = vector.load %arg16[%c0_22, %c64] : memref<64x128xbf16, #tpu.memory_space<vmem>>, vector<64x16xbf16>
    tpu.vector_store %arg16[%c0_22, %c64], %109 {strides = array<i32>} : memref<64x128xbf16, #tpu.memory_space<vmem>>, vector<64x16xbf16>,
    %111 = vector.extract_strided_slice %95 {offsets = [5, 0, 0], sizes = [1, 64, 16], strides = [1, 1, 1]} : vector<8x64x16xbf16> to vector<1x64x16xbf16>
    %112 = vector.shape_cast %111 : vector<1x64x16xbf16> to vector<64x16xbf16>
    %c0_23 = arith.constant 0 : index
    %c80 = arith.constant 80 : index
    %113 = vector.load %arg16[%c0_23, %c80] : memref<64x128xbf16, #tpu.memory_space<vmem>>, vector<64x16xbf16>
    tpu.vector_store %arg16[%c0_23, %c80], %112 {strides = array<i32>} : memref<64x128xbf16, #tpu.memory_space<vmem>>, vector<64x16xbf16>,
    %114 = vector.extract_strided_slice %95 {offsets = [6, 0, 0], sizes = [1, 64, 16], strides = [1, 1, 1]} : vector<8x64x16xbf16> to vector<1x64x16xbf16>
    %115 = vector.shape_cast %114 : vector<1x64x16xbf16> to vector<64x16xbf16>
    %c0_24 = arith.constant 0 : index
    %c96 = arith.constant 96 : index
    %116 = vector.load %arg16[%c0_24, %c96] : memref<64x128xbf16, #tpu.memory_space<vmem>>, vector<64x16xbf16>
    tpu.vector_store %arg16[%c0_24, %c96], %115 {strides = array<i32>} : memref<64x128xbf16, #tpu.memory_space<vmem>>, vector<64x16xbf16>,
    %117 = vector.extract_strided_slice %95 {offsets = [7, 0, 0], sizes = [1, 64, 16], strides = [1, 1, 1]} : vector<8x64x16xbf16> to vector<1x64x16xbf16>
    %118 = vector.shape_cast %117 : vector<1x64x16xbf16> to vector<64x16xbf16>
    %c0_25 = arith.constant 0 : index
    %c112 = arith.constant 112 : index
    %119 = vector.load %arg16[%c0_25, %c112] : memref<64x128xbf16, #tpu.memory_space<vmem>>, vector<64x16xbf16>
    tpu.vector_store %arg16[%c0_25, %c112], %118 {strides = array<i32>} : memref<64x128xbf16, #tpu.memory_space<vmem>>, vector<64x16xbf16>,
    %c0_26 = arith.constant 0 : index
    %c0_27 = arith.constant 0 : index
    %120 = vector.load %arg16[%c0_26, %c0_27] : memref<64x128xbf16, #tpu.memory_space<vmem>>, vector<64x128xbf16>
    %c0_28 = arith.constant 0 : index
    %c0_29 = arith.constant 0 : index
    %121 = vector.load %arg5[%c0_28, %c0_29] : memref<128x128xbf16, #tpu.memory_space<vmem>>, vector<128x128xbf16>
    %cst_30 = arith.constant dense<0.000000e+00> : vector<64x128xf32>
    %122 = tpu.matmul %120, %121, %cst_30 {dimension_numbers = #tpu.dot_dimension_numbers<[1], [0], [0], [1], [0, 0, 1, 1], [], []>} : vector<64x128xbf16>, vector<128x128xbf16>, vector<64x128xf32> -> vector<64x128xf32>
    %c0_31 = arith.constant 0 : index
    %c0_32 = arith.constant 0 : index
    %123 = vector.load %arg6[%c0_31, %c0_32] : memref<1x128xf32, #tpu.memory_space<vmem>>, vector<1x128xf32>
    %124 = vector.broadcast %123 : vector<1x128xf32> to vector<64x128xf32>
    %125 = arith.addf %122, %124 : vector<64x128xf32>
    %126 = arith.addf %1, %125 : vector<64x128xf32>
    %c0_33 = arith.constant 0 : index
    %c0_34 = arith.constant 0 : index
    %127 = vector.load %arg7[%c0_33, %c0_34] : memref<1x128xf32, #tpu.memory_space<vmem>>, vector<1x128xf32>
    %c0_35 = arith.constant 0 : index
    %c0_36 = arith.constant 0 : index
    %128 = vector.load %arg8[%c0_35, %c0_36] : memref<1x128xf32, #tpu.memory_space<vmem>>, vector<1x128xf32>
    %cst_37 = arith.constant dense<0.000000e+00> : vector<64xf32>
    %129 = vector.multi_reduction <add>, %126, %cst_37 [1] : vector<64x128xf32> to vector<64xf32>
    %130 = vector.shape_cast %129 : vector<64xf32> to vector<64x1xf32>
    %cst_38 = arith.constant 1.280000e+02 : f32
    %131 = vector.broadcast %cst_38 : f32 to vector<64x1xf32>
    %132 = arith.divf %130, %131 : vector<64x1xf32>
    %133 = vector.broadcast %132 : vector<64x1xf32> to vector<64x128xf32>
    %134 = arith.subf %126, %133 : vector<64x128xf32>
    %135 = arith.mulf %134, %134 : vector<64x128xf32>
    %cst_39 = arith.constant dense<0.000000e+00> : vector<64xf32>
    %136 = vector.multi_reduction <add>, %135, %cst_39 [1] : vector<64x128xf32> to vector<64xf32>
    %137 = vector.shape_cast %136 : vector<64xf32> to vector<64x1xf32>
    %cst_40 = arith.constant 1.280000e+02 : f32
    %138 = vector.broadcast %cst_40 : f32 to vector<64x1xf32>
    %139 = arith.divf %137, %138 : vector<64x1xf32>
    %140 = vector.broadcast %132 : vector<64x1xf32> to vector<64x128xf32>
    %141 = arith.subf %126, %140 : vector<64x128xf32>
    %cst_41 = arith.constant 9.99999974E-6 : f32
    %142 = vector.broadcast %cst_41 : f32 to vector<64x1xf32>
    %143 = arith.addf %139, %142 : vector<64x1xf32>
    %144 = math.rsqrt %143 : vector<64x1xf32>
    %145 = vector.broadcast %144 : vector<64x1xf32> to vector<64x128xf32>
    %146 = arith.mulf %141, %145 : vector<64x128xf32>
    %147 = vector.broadcast %127 : vector<1x128xf32> to vector<64x128xf32>
    %148 = arith.mulf %146, %147 : vector<64x128xf32>
    %149 = vector.broadcast %128 : vector<1x128xf32> to vector<64x128xf32>
    %150 = arith.addf %148, %149 : vector<64x128xf32>
    %151 = arith.truncf %150 : vector<64x128xf32> to vector<64x128xbf16>
    %c0_42 = arith.constant 0 : index
    %c0_43 = arith.constant 0 : index
    %152 = vector.load %arg9[%c0_42, %c0_43] : memref<128x512xbf16, #tpu.memory_space<vmem>>, vector<128x512xbf16>
    %cst_44 = arith.constant dense<0.000000e+00> : vector<64x512xf32>
    %153 = tpu.matmul %151, %152, %cst_44 {dimension_numbers = #tpu.dot_dimension_numbers<[1], [0], [0], [1], [0, 0, 1, 1], [], []>} : vector<64x128xbf16>, vector<128x512xbf16>, vector<64x512xf32> -> vector<64x512xf32>
    %c0_45 = arith.constant 0 : index
    %c0_46 = arith.constant 0 : index
    %154 = vector.load %arg10[%c0_45, %c0_46] : memref<1x512xf32, #tpu.memory_space<vmem>>, vector<1x512xf32>
    %155 = vector.broadcast %154 : vector<1x512xf32> to vector<64x512xf32>
    %156 = arith.addf %153, %155 : vector<64x512xf32>
    %cst_47 = arith.constant 5.000000e-01 : f32
    %157 = vector.broadcast %cst_47 : f32 to vector<64x512xf32>
    %158 = arith.mulf %157, %156 : vector<64x512xf32>
    %cst_48 = arith.constant 4.471500e-02 : f32
    %159 = vector.broadcast %cst_48 : f32 to vector<64x512xf32>
    %160 = arith.mulf %159, %156 : vector<64x512xf32>
    %161 = arith.mulf %160, %156 : vector<64x512xf32>
    %162 = arith.mulf %161, %156 : vector<64x512xf32>
    %163 = arith.addf %156, %162 : vector<64x512xf32>
    %cst_49 = arith.constant 0.797884583 : f32
    %164 = vector.broadcast %cst_49 : f32 to vector<64x512xf32>
    %165 = arith.mulf %164, %163 : vector<64x512xf32>
    %166 = math.tanh %165 : vector<64x512xf32>
    %cst_50 = arith.constant 1.000000e+00 : f32
    %167 = vector.broadcast %cst_50 : f32 to vector<64x512xf32>
    %168 = arith.addf %167, %166 : vector<64x512xf32>
    %169 = arith.mulf %158, %168 : vector<64x512xf32>
    %c0_51 = arith.constant 0 : index
    %c0_52 = arith.constant 0 : index
    %170 = vector.load %arg11[%c0_51, %c0_52] : memref<1x512xf32, #tpu.memory_space<vmem>>, vector<1x512xf32>
    %c0_53 = arith.constant 0 : index
    %c0_54 = arith.constant 0 : index
    %171 = vector.load %arg12[%c0_53, %c0_54] : memref<1x512xf32, #tpu.memory_space<vmem>>, vector<1x512xf32>
    %cst_55 = arith.constant dense<0.000000e+00> : vector<64xf32>
    %172 = vector.multi_reduction <add>, %169, %cst_55 [1] : vector<64x512xf32> to vector<64xf32>
    %173 = vector.shape_cast %172 : vector<64xf32> to vector<64x1xf32>
    %cst_56 = arith.constant 5.120000e+02 : f32
    %174 = vector.broadcast %cst_56 : f32 to vector<64x1xf32>
    %175 = arith.divf %173, %174 : vector<64x1xf32>
    %176 = vector.broadcast %175 : vector<64x1xf32> to vector<64x512xf32>
    %177 = arith.subf %169, %176 : vector<64x512xf32>
    %178 = arith.mulf %177, %177 : vector<64x512xf32>
    %cst_57 = arith.constant dense<0.000000e+00> : vector<64xf32>
    %179 = vector.multi_reduction <add>, %178, %cst_57 [1] : vector<64x512xf32> to vector<64xf32>
    %180 = vector.shape_cast %179 : vector<64xf32> to vector<64x1xf32>
    %cst_58 = arith.constant 5.120000e+02 : f32
    %181 = vector.broadcast %cst_58 : f32 to vector<64x1xf32>
    %182 = arith.divf %180, %181 : vector<64x1xf32>
    %183 = vector.broadcast %175 : vector<64x1xf32> to vector<64x512xf32>
    %184 = arith.subf %169, %183 : vector<64x512xf32>
    %cst_59 = arith.constant 9.99999974E-6 : f32
    %185 = vector.broadcast %cst_59 : f32 to vector<64x1xf32>
    %186 = arith.addf %182, %185 : vector<64x1xf32>
    %187 = math.rsqrt %186 : vector<64x1xf32>
    %188 = vector.broadcast %187 : vector<64x1xf32> to vector<64x512xf32>
    %189 = arith.mulf %184, %188 : vector<64x512xf32>
    %190 = vector.broadcast %170 : vector<1x512xf32> to vector<64x512xf32>
    %191 = arith.mulf %189, %190 : vector<64x512xf32>
    %192 = vector.broadcast %171 : vector<1x512xf32> to vector<64x512xf32>
    %193 = arith.addf %191, %192 : vector<64x512xf32>
    %194 = arith.truncf %193 : vector<64x512xf32> to vector<64x512xbf16>
    %c0_60 = arith.constant 0 : index
    %c0_61 = arith.constant 0 : index
    %195 = vector.load %arg13[%c0_60, %c0_61] : memref<512x128xbf16, #tpu.memory_space<vmem>>, vector<512x128xbf16>
    %cst_62 = arith.constant dense<0.000000e+00> : vector<64x128xf32>
    %196 = tpu.matmul %194, %195, %cst_62 {dimension_numbers = #tpu.dot_dimension_numbers<[1], [0], [0], [1], [0, 0, 1, 1], [], []>} : vector<64x512xbf16>, vector<512x128xbf16>, vector<64x128xf32> -> vector<64x128xf32>
    %c0_63 = arith.constant 0 : index
    %c0_64 = arith.constant 0 : index
    %197 = vector.load %arg14[%c0_63, %c0_64] : memref<1x128xf32, #tpu.memory_space<vmem>>, vector<1x128xf32>
    %198 = vector.broadcast %197 : vector<1x128xf32> to vector<64x128xf32>
    %199 = arith.addf %196, %198 : vector<64x128xf32>
    %200 = arith.addf %126, %199 : vector<64x128xf32>
    %201 = vector.shape_cast %200 : vector<64x128xf32> to vector<4x16x128xf32>
    %c0_65 = arith.constant 0 : index
    %c0_66 = arith.constant 0 : index
    %c0_67 = arith.constant 0 : index
    %202 = vector.load %arg15[%c0_65, %c0_66, %c0_67] : memref<4x16x128xf32, #tpu.memory_space<vmem>>, vector<4x16x128xf32>
    tpu.vector_store %arg15[%c0_65, %c0_66, %c0_67], %201 {strides = array<i32>} : memref<4x16x128xf32, #tpu.memory_space<vmem>>, vector<4x16x128xf32>,
    return
  }
  func.func @transform_0(%arg0: i32) -> (i32, i32, i32) {
    %c0_i32 = arith.constant 0 : i32
    %c0_i32_0 = arith.constant 0 : i32
    %c0_i32_1 = arith.constant 0 : i32
    return %arg0, %c0_i32, %c0_i32_0 : i32, i32, i32
  }
  func.func @transform_1(%arg0: i32) -> (i32, i32) {
    %c0_i32 = arith.constant 0 : i32
    %c0_i32_0 = arith.constant 0 : i32
    %c0_i32_1 = arith.constant 0 : i32
    return %c0_i32, %c0_i32_0 : i32, i32
  }
  func.func @transform_2(%arg0: i32) -> (i32, i32) {
    %c0_i32 = arith.constant 0 : i32
    %c0_i32_0 = arith.constant 0 : i32
    %c0_i32_1 = arith.constant 0 : i32
    return %c0_i32, %c0_i32_0 : i32, i32
  }
  func.func @transform_3(%arg0: i32) -> (i32, i32) {
    %c0_i32 = arith.constant 0 : i32
    %c0_i32_0 = arith.constant 0 : i32
    %c0_i32_1 = arith.constant 0 : i32
    return %c0_i32, %c0_i32_0 : i32, i32
  }
  func.func @transform_4(%arg0: i32) -> (i32, i32) {
    %c0_i32 = arith.constant 0 : i32
    %c0_i32_0 = arith.constant 0 : i32
    %c0_i32_1 = arith.constant 0 : i32
    return %c0_i32, %c0_i32_0 : i32, i32
  }
  func.func @transform_5(%arg0: i32) -> (i32, i32) {
    %c0_i32 = arith.constant 0 : i32
    %c0_i32_0 = arith.constant 0 : i32
    %c0_i32_1 = arith.constant 0 : i32
    return %c0_i32, %c0_i32_0 : i32, i32
  }
  func.func @transform_6(%arg0: i32) -> (i32, i32) {
    %c0_i32 = arith.constant 0 : i32
    %c0_i32_0 = arith.constant 0 : i32
    %c0_i32_1 = arith.constant 0 : i32
    return %c0_i32, %c0_i32_0 : i32, i32
  }
  func.func @transform_7(%arg0: i32) -> (i32, i32) {
    %c0_i32 = arith.constant 0 : i32
    %c0_i32_0 = arith.constant 0 : i32
    %c0_i32_1 = arith.constant 0 : i32
    return %c0_i32, %c0_i32_0 : i32, i32
  }
  func.func @transform_8(%arg0: i32) -> (i32, i32) {
    %c0_i32 = arith.constant 0 : i32
    %c0_i32_0 = arith.constant 0 : i32
    %c0_i32_1 = arith.constant 0 : i32
    return %c0_i32, %c0_i32_0 : i32, i32
  }
  func.func @transform_9(%arg0: i32) -> (i32, i32) {
    %c0_i32 = arith.constant 0 : i32
    %c0_i32_0 = arith.constant 0 : i32
    %c0_i32_1 = arith.constant 0 : i32
    return %c0_i32, %c0_i32_0 : i32, i32
  }
  func.func @transform_10(%arg0: i32) -> (i32, i32) {
    %c0_i32 = arith.constant 0 : i32
    %c0_i32_0 = arith.constant 0 : i32
    %c0_i32_1 = arith.constant 0 : i32
    return %c0_i32, %c0_i32_0 : i32, i32
  }
  func.func @transform_11(%arg0: i32) -> (i32, i32) {
    %c0_i32 = arith.constant 0 : i32
    %c0_i32_0 = arith.constant 0 : i32
    %c0_i32_1 = arith.constant 0 : i32
    return %c0_i32, %c0_i32_0 : i32, i32
  }
  func.func @transform_12(%arg0: i32) -> (i32, i32) {
    %c0_i32 = arith.constant 0 : i32
    %c0_i32_0 = arith.constant 0 : i32
    %c0_i32_1 = arith.constant 0 : i32
    return %c0_i32, %c0_i32_0 : i32, i32
  }
  func.func @transform_13(%arg0: i32) -> (i32, i32) {
    %c0_i32 = arith.constant 0 : i32
    %c0_i32_0 = arith.constant 0 : i32
    %c0_i32_1 = arith.constant 0 : i32
    return %c0_i32, %c0_i32_0 : i32, i32
  }
  func.func @transform_14(%arg0: i32) -> (i32, i32, i32) {
    %c0_i32 = arith.constant 0 : i32
    %c0_i32_0 = arith.constant 0 : i32
    %c0_i32_1 = arith.constant 0 : i32
    return %arg0, %c0_i32, %c0_i32_0 : i32, i32, i32
  }
}

</mosaic_0001>

<bundles_post_ra>
// kernel: tpu_custom_call.1
= control target key start
LH: loop header
LB: loop body
LE: loop exit
PB: predicated region body
PF: predicated region fallthrough
CT: control target
= control target key end

     0   :  { %19 = vsyncpa [#allocation4], 0  ;;  %s10700_s0 = inlined_call_operand.hbm [shape: f32[4,16,128], index: 0, kind: input, shape index: {}]   ;;  %s10701_s1 = inlined_call_operand.hbm [shape: f32[1,128], index: 1, kind: input, shape index: {}]   ;;  %s10702_s2 = inlined_call_operand.hbm [shape: f32[1,128], index: 2, kind: input, shape index: {}]   ;;  %s10703_s3 = inlined_call_operand.hbm [shape: bf16[128,384], index: 3, kind: input, shape index: {}]   ;;  %s10704_s4 = inlined_call_operand.hbm [shape: bf16[128,128], index: 4, kind: input, shape index: {}]   ;;  %s10705_s5 = inlined_call_operand.hbm [shape: f32[1,128], index: 5, kind: input, shape index: {}]   ;;  %s10706_s6 = inlined_call_operand.hbm [shape: f32[1,128], index: 6, kind: input, shape index: {}]   ;;  %s10707_s7 = inlined_call_operand.hbm [shape: f32[1,128], index: 7, kind: input, shape index: {}]   ;;  %s10708_s8 = inlined_call_operand.hbm [shape: bf16[128,512], index: 8, kind: input, shape index: {}]   ;;  %s10709_s9 = inlined_call_operand.vmem [shape: f32[1,512], index: 9, kind: input, shape index: {}]   ;;  %s10710_s10 = inlined_call_operand.vmem [shape: f32[1,512], index: 10, kind: input, shape index: {}]   ;;  %s10711_s11 = inlined_call_operand.vmem [shape: f32[1,512], index: 11, kind: input, shape index: {}]   ;;  %s10712_s12 = inlined_call_operand.hbm [shape: bf16[512,128], index: 12, kind: input, shape index: {}]   ;;  %s10713_s13 = inlined_call_operand.vmem [shape: f32[1,128], index: 13, kind: input, shape index: {}]   ;;  %s10714_s14 = inlined_call_operand.hbm [shape: f32[4,16,128], index: 14, kind: output, shape index: {}]  }
   0x1   :  { %20 = vsyncpa [#allocation7], 0 }
   0x2   :  { %21 = vsyncpa [#allocation10], 0 }
   0x3   :  { %22 = vsyncpa [#allocation13], 0 }
   0x4   :  { %23 = vsyncpa [#allocation16], 0 }
   0x5   :  { %24 = vsyncpa [#allocation19], 0 }
   0x6   :  { %25 = vsyncpa [#allocation5], 0  ;;  %s8362_s29 = smov [#allocation6]   ;;  %s8363_s15 = smov [#allocation9]  }
   0x7   :  { %s44_s30 = sshll.u32 %s8362_s29, 4  ;;  %s63_s16 = sshll.u32 %s8363_s15, 4  ;;  %s45_s30 = int_to_ptr.vmem [resolvable:$true] %s44_s30  ;;  %s64_s16 = int_to_ptr.vmem [resolvable:$true] %s63_s16 }
   0x8   :  { %s8136_s17 = scalar_lea.vmem %s45_s30, 16  ;;  %s8140_s18 = scalar_lea.vmem %s45_s30, 32 }
   0x9   :  { %p8137_p0 = scmp.ne.s32.totalorder %s45_s30, %s8136_s17  ;;  %p8141_p1 = scmp.lt.s32.totalorder %s45_s30, %s45_s30 }
   0xa   :  { %p8142_p2 = scmp.lt.s32.totalorder %s8140_s18, %s8136_s17 }
   0xc   :  { %p8143_p3 = por %p8142_p2, %p8141_p1 }
   0xe   :  { %p8144_p4 = pnand %p8143_p3, %p8137_p0 }
  0x10   :  { %8147 = shalt.err (!%p8144_p4)
}
  0x11   :  { %47 = dma.hbm_to_vmem [thread:$0]  %s10701_s1, 16, %s45_s30, [#allocation7]  }
  0x12   :  { %s8156_s21 = scalar_lea.vmem %s64_s16, 3072  ;;  %p8161_p6 = scmp.lt.s32.totalorder %s64_s16, %s64_s16 }
  0x13   :  { %p8157_p5 = scmp.ne.s32.totalorder %s64_s16, %s8156_s21  ;;  %p8162_p7 = scmp.lt.s32.totalorder %s8156_s21, %s8156_s21 }
  0x15   :  { %p8163_p8 = por %p8162_p7, %p8161_p6 }
  0x17   :  { %p8164_p9 = pnand %p8163_p8, %p8157_p5 }
  0x19   :  { %8167 = shalt.err (!%p8164_p9)
}
  0x1a   :  { %s8364_s22 = smov 192   ;;  %s8365_s23 = smov 12  }
  0x1b   :  { %69 = dma.hbm_to_vmem [thread:$0]  %s10703_s3, 3072, %s64_s16, [#allocation10], %s8364_s22, %s8364_s22, %s8365_s23  }
  0x1c   :  { %s8366_s26 = smov [#allocation12]   ;;  %s8367_s28 = smov [#allocation15]  }
  0x1d   :  { %s88_s27 = sshll.u32 %s8366_s26, 4  ;;  %s108_s29 = sshll.u32 %s8367_s28, 4  ;;  %s89_s27 = int_to_ptr.vmem [resolvable:$true] %s88_s27  ;;  %s109_s29 = int_to_ptr.vmem [resolvable:$true] %s108_s29 }
  0x1e   :  { %s8176_s1 = scalar_lea.vmem %s89_s27, 16  ;;  %s8180_s30 = scalar_lea.vmem %s89_s27, 32 }
  0x1f   :  { %p8177_p10 = scmp.ne.s32.totalorder %s89_s27, %s8176_s1  ;;  %p8181_p11 = scmp.lt.s32.totalorder %s89_s27, %s89_s27 }
  0x20   :  { %p8182_p12 = scmp.lt.s32.totalorder %s8180_s30, %s8176_s1 }
  0x22   :  { %p8183_p13 = por %p8182_p12, %p8181_p11 }
  0x24   :  { %p8184_p0 = pnand %p8183_p13, %p8177_p10 }
  0x26   :  { %8187 = shalt.err (!%p8184_p0)
}
  0x27   :  { %91 = dma.hbm_to_vmem [thread:$0]  %s10705_s5, 16, %s89_s27, [#allocation13]  }
  0x28   :  { %s8196_s18 = scalar_lea.vmem %s109_s29, 16  ;;  %s8200_s3 = scalar_lea.vmem %s109_s29, 32 }
  0x29   :  { %p8197_p1 = scmp.ne.s32.totalorder %s109_s29, %s8196_s18  ;;  %p8201_p2 = scmp.lt.s32.totalorder %s109_s29, %s109_s29 }
  0x2a   :  { %p8202_p3 = scmp.lt.s32.totalorder %s8200_s3, %s8196_s18 }
  0x2c   :  { %p8203_p4 = por %p8202_p3, %p8201_p2 }
  0x2e   :  { %p8204_p5 = pnand %p8203_p4, %p8197_p1 }
  0x30   :  { %8207 = shalt.err (!%p8204_p5)
}
  0x31   :  { %111 = dma.hbm_to_vmem [thread:$0]  %s10707_s7, 16, %s109_s29, [#allocation16]  }
  0x32   :  { %s8368_s20 = smov [#allocation3]  }
  0x33   :  { %s31_s21 = sshll.u32 %s8368_s20, 4  ;;  %s32_s21 = int_to_ptr.vmem [resolvable:$true] %s31_s21 }
  0x34   :  { %s8216_s22 = scalar_lea.vmem %s32_s21, 1024  ;;  %p8221_p7 = scmp.lt.s32.totalorder %s32_s21, %s32_s21 }
  0x35   :  { %p8217_p6 = scmp.ne.s32.totalorder %s32_s21, %s8216_s22  ;;  %p8222_p8 = scmp.lt.s32.totalorder %s8216_s22, %s8216_s22 }
  0x37   :  { %p8223_p9 = por %p8222_p8, %p8221_p7 }
  0x39   :  { %p8224_p10 = pnand %p8223_p9, %p8217_p6 }
  0x3b   :  { %8227 = shalt.err (!%p8224_p10)
}
  0x3c   :  { %s8369_s5 = smov 128   ;;  %s8370_s23 = smov 8  }
  0x3d   :  { %37 = dma.hbm_to_vmem [thread:$0]  %s10700_s0, 1024, %s32_s21, [#allocation4], %s8369_s5, %s8369_s5, %s8370_s23  }
  0x3e   :  { %s8371_s7 = smov [#allocation8]   ;;  %s8372_s27 = smov [#allocation11]  }
  0x3f   :  { %s54_s26 = sshll.u32 %s8371_s7, 4  ;;  %s75_s28 = sshll.u32 %s8372_s27, 4  ;;  %s55_s26 = int_to_ptr.vmem [resolvable:$true] %s54_s26  ;;  %s76_s28 = int_to_ptr.vmem [resolvable:$true] %s75_s28 }
  0x40   :  { %s8236_s29 = scalar_lea.vmem %s55_s26, 16  ;;  %s8240_s1 = scalar_lea.vmem %s55_s26, 32 }
  0x41   :  { %p8237_p11 = scmp.ne.s32.totalorder %s55_s26, %s8236_s29  ;;  %p8241_p12 = scmp.lt.s32.totalorder %s55_s26, %s55_s26 }
  0x42   :  { %p8242_p13 = scmp.lt.s32.totalorder %s8240_s1, %s8236_s29 }
  0x44   :  { %p8243_p0 = por %p8242_p13, %p8241_p12 }
  0x46   :  { %p8244_p1 = pnand %p8243_p0, %p8237_p11 }
  0x48   :  { %8247 = shalt.err (!%p8244_p1)
}
  0x49   :  { %57 = dma.hbm_to_vmem [thread:$0]  %s10702_s2, 16, %s55_s26, [#allocation7]  }
  0x4a   :  { %s8256_s17 = scalar_lea.vmem %s76_s28, 1024  ;;  %p8261_p3 = scmp.lt.s32.totalorder %s76_s28, %s76_s28 }
  0x4b   :  { %p8257_p2 = scmp.ne.s32.totalorder %s76_s28, %s8256_s17  ;;  %p8262_p4 = scmp.lt.s32.totalorder %s8256_s17, %s8256_s17 }
  0x4d   :  { %p8263_p5 = por %p8262_p4, %p8261_p3 }
  0x4f   :  { %p8264_p6 = pnand %p8263_p5, %p8257_p2 }
  0x51   :  { %8267 = shalt.err (!%p8264_p6)
}
  0x52   :  { %s8373_s0 = smov 64   ;;  %s8374_s18 = smov 4  }
  0x53   :  { %81 = dma.hbm_to_vmem [thread:$0]  %s10704_s4, 1024, %s76_s28, [#allocation10], %s8373_s0, %s8373_s0, %s8374_s18  }
  0x54   :  { %s8375_s19 = smov [#allocation14]   ;;  %s8376_s2 = smov [#allocation17]  }
  0x55   :  { %s98_s20 = sshll.u32 %s8375_s19, 4  ;;  %s117_s21 = sshll.u32 %s8376_s2, 4  ;;  %s99_s20 = int_to_ptr.vmem [resolvable:$true] %s98_s20  ;;  %s118_s21 = int_to_ptr.vmem [resolvable:$true] %s117_s21 }
  0x56   :  { %s8276_s22 = scalar_lea.vmem %s99_s20, 16  ;;  %s8280_s24 = scalar_lea.vmem %s99_s20, 32 }
  0x57   :  { %p8277_p7 = scmp.ne.s32.totalorder %s99_s20, %s8276_s22  ;;  %p8281_p8 = scmp.lt.s32.totalorder %s99_s20, %s99_s20 }
  0x58   :  { %p8282_p9 = scmp.lt.s32.totalorder %s8280_s24, %s8276_s22 }
  0x5a   :  { %p8283_p10 = por %p8282_p9, %p8281_p8 }
  0x5c   :  { %p8284_p11 = pnand %p8283_p10, %p8277_p7 }
  0x5e   :  { %8287 = shalt.err (!%p8284_p11)
}
  0x5f   :  { %101 = dma.hbm_to_vmem [thread:$0]  %s10706_s6, 16, %s99_s20, [#allocation13]  }
  0x60   :  { %s8296_s26 = scalar_lea.vmem %s118_s21, 4096  ;;  %p8301_p13 = scmp.lt.s32.totalorder %s118_s21, %s118_s21 }
  0x61   :  { %p8297_p12 = scmp.ne.s32.totalorder %s118_s21, %s8296_s26  ;;  %p8302_p0 = scmp.lt.s32.totalorder %s8296_s26, %s8296_s26 }
  0x63   :  { %p8303_p1 = por %p8302_p0, %p8301_p13 }
  0x65   :  { %p8304_p2 = pnand %p8303_p1, %p8297_p12 }
  0x67   :  { %8307 = shalt.err (!%p8304_p2)
}
  0x68   :  { %s8377_s4 = smov 256   ;;  %s8378_s27 = smov 16  }
  0x69   :  { %123 = dma.hbm_to_vmem [thread:$0]  %s10708_s8, 4096, %s118_s21, [#allocation16], %s8377_s4, %s8377_s4, %s8378_s27  }
  0x6a   :  { %s8379_s1 = smov [#allocation18]  }
  0x6b   :  { %s135_s30 = sshll.u32 %s8379_s1, 4  ;;  %s136_s30 = int_to_ptr.vmem [resolvable:$true] %s135_s30 }
  0x6c   :  { %s8316_s15 = scalar_lea.vmem %s136_s30, 4096  ;;  %p8321_p4 = scmp.lt.s32.totalorder %s136_s30, %s136_s30 }
  0x6d   :  { %p8317_p3 = scmp.ne.s32.totalorder %s136_s30, %s8316_s15  ;;  %p8322_p5 = scmp.lt.s32.totalorder %s8316_s15, %s8316_s15 }
  0x6f   :  { %p8323_p6 = por %p8322_p5, %p8321_p4 }
  0x71   :  { %p8324_p7 = pnand %p8323_p6, %p8317_p3 }
  0x73   :  { %8327 = shalt.err (!%p8324_p7)
}
  0x74   :  { %141 = dma.hbm_to_vmem [thread:$0]  %s10712_s12, 4096, %s136_s30, [#allocation19], %s8373_s0, %s8373_s0, %s8374_s18  }
  0x75   :  { %8348 = dma.done.wait [#allocation4], 1024  }
  0x76   :  { %8349 = vsyncadd [#allocation4], 4294966272 }
  0x77   :  { %8350 = dma.done.wait [#allocation7], 32  }
  0x78   :  { %8351 = vsyncadd [#allocation7], 4294967264 }
  0x79   :  { %8352 = dma.done.wait [#allocation10], 4096  }
  0x7a   :  { %8353 = vsyncadd [#allocation10], 4294963200 }
  0x7b   :  { %8354 = dma.done.wait [#allocation13], 32  }
  0x7c   :  { %8355 = vsyncadd [#allocation13], 4294967264 }
  0x7d   :  { %8356 = dma.done.wait [#allocation16], 4112  }
  0x7e   :  { %8357 = vsyncadd [#allocation16], 4294963184 }
  0x7f   :  { %8358 = dma.done.wait [#allocation19], 4096  }
  0x80   :  { %8359 = vsyncadd [#allocation19], 4294963200  ;;  %v175_v0 = vld [vmem:[#allocation3] sm:$0xff]  ;;  %v177_v1 = vld [vmem:[#allocation3 + $0x10] sm:$0xff]  ;;  %v10715_v62 = vmov 0   ;;  %vm8382_vm0 = vmmov 0  }
  0x81   :  { %185 = vadd.xlane.f32.xlu0 %v175_v0  ;;  %189 = vadd.xlane.f32.xlu1 %v177_v1  ;;  %v176_v2 = vld [vmem:[#allocation3 + $0x8] sm:$0xff]  ;;  %v178_v3 = vld [vmem:[#allocation3 + $0x18] sm:$0xff]  ;;  %v179_v4 = vld [vmem:[#allocation3 + $0x20] sm:$0xff]  ;;  %vm824_vm1 = vcmask 130048   ;;  %s8383_s8 = smov 112   ;;  %s8384_s12 = smov 96  }
  0x82   :  { %v180_v5 = vld [vmem:[#allocation3 + $0x28] sm:$0xff]  ;;  %v181_v6 = vld [vmem:[#allocation3 + $0x30] sm:$0xff]  ;;  %v182_v7 = vld [vmem:[#allocation3 + $0x38] sm:$0xff]  ;;  %498 = vmatprep.mubr.bf16.mxu0 %v10715_v62  ;;  %s8385_s18 = smov 80   ;;  %s8386_s3 = smov 48   ;;  %vm4533_vm2 = vcmask 125952  }
  0x83   :  { %v7628_v8 = vld [vmem:[#allocation9 + $0xac] ss:$12 sps:$4 sm:$0xff]   ;;  %v7630_v9 = vld [vmem:[#allocation9 + $0xa8] ss:$12 sps:$4 sm:$0xff]   ;;  %v7633_v42 = vld [vmem:[#allocation9 + $0xb0] ss:$12 sps:$4 sm:$0xff]  }
  0x84   :  { %466 = vmatprep.subr.bf16.mxu0 %v7628_v8  ;;  %v7631_v41 = vld [vmem:[#allocation9 + $0x94] ss:$12 sps:$4 sm:$0xff]   ;;  %v7634_v43 = vld [vmem:[#allocation9 + $0x90] ss:$12 sps:$4 sm:$0xff]   ;;  %7153 = vmatprep.subr.bf16.mxu1 %v7633_v42  ;;  %v7637_v46 = vld [vmem:[#allocation9 + $0x98] ss:$12 sps:$4 sm:$0xff]  }
  0x85   :  { %187 = vadd.xlane.f32.xlu0 %v176_v2  ;;  %191 = vadd.xlane.f32.xlu1 %v178_v3  ;;  %v7635_v45 = vld [vmem:[#allocation9 + $0x7c] ss:$12 sps:$4 sm:$0xff]   ;;  %v7638_v47 = vld [vmem:[#allocation9 + $0x78] ss:$12 sps:$4 sm:$0xff]   ;;  %v7641_v49 = vld [vmem:[#allocation9 + $0x80] ss:$12 sps:$4 sm:$0xff]  }
  0x86   :  { %467 = vmatpush1.bf16.msra.mxu0 %v7630_v9  ;;  %7154 = vmatpush3.bf16.msra.mxu1 %v7633_v42  ;;  %v7639_v48 = vld [vmem:[#allocation9 + $0x64] ss:$12 sps:$4 sm:$0xff]   ;;  %v7642_v50 = vld [vmem:[#allocation9 + $0x60] ss:$12 sps:$4 sm:$0xff]   ;;  %v7645_v52 = vld [vmem:[#allocation9 + $0x68] ss:$12 sps:$4 sm:$0xff]  }
  0x87   :  { %468 = vmatprep.subr.bf16.mxu0 %v7631_v41  ;;  %7155 = vmatprep.subr.bf16.mxu1 %v7637_v46  ;;  %v7643_v51 = vld [vmem:[#allocation9 + $0x4c] ss:$12 sps:$4 sm:$0xff]   ;;  %v7646_v53 = vld [vmem:[#allocation9 + $0x48] ss:$12 sps:$4 sm:$0xff]   ;;  %v7649_v55 = vld [vmem:[#allocation9 + $0x50] ss:$12 sps:$4 sm:$0xff]  }
  0x88   :  { %v7647_v54 = vld [vmem:[#allocation9 + $0x34] ss:$12 sps:$4 sm:$0xff]   ;;  %v7650_v56 = vld [vmem:[#allocation9 + $0x30] ss:$12 sps:$4 sm:$0xff]   ;;  %v7653_v58 = vld [vmem:[#allocation9 + $0x38] ss:$12 sps:$4 sm:$0xff]  }
  0x89   :  { %193 = vadd.xlane.f32.xlu0 %v179_v4  ;;  %195 = vadd.xlane.f32.xlu1 %v180_v5  ;;  %v7651_v57 = vld [vmem:[#allocation9 + $0x1c] ss:$12 sps:$4 sm:$0xff]   ;;  %v7654_v59 = vld [vmem:[#allocation9 + $0x18] ss:$12 sps:$4 sm:$0xff]   ;;  %v7657_v61 = vld [vmem:[#allocation9 + $0x20] ss:$12 sps:$4 sm:$0xff]  }
  0x8a   :  { %469 = vmatpush1.bf16.msra.mxu0 %v7634_v43  ;;  %7156 = vmatpush3.bf16.msra.mxu1 %v7637_v46  ;;  %v7655_v60 = vld [vmem:[#allocation9 + $0x4] ss:$12 sps:$4 sm:$0xff]   ;;  %v7658_v63 = vld [vmem:[#allocation9] ss:$12 sps:$4 sm:$0xff]   ;;  %s8387_s16 = smov 32   ;;  %vm4586_vm3 = vcmask 257152  }
  0x8b   :  { %470 = vmatprep.subr.bf16.mxu0 %v7635_v45  ;;  %7157 = vmatprep.subr.bf16.mxu1 %v7641_v49  ;;  %vm4639_vm4 = vcmask 388352   ;;  %vm4692_vm5 = vcmask 519552   ;;  %vm4745_vm6 = vcmask 650752   ;;  %vm4798_vm7 = vcmask 781952  }
  0x8c   :  { %vm4851_vm8 = vcmask 913152   ;;  %vm4904_vm9 = vcmask 1044352  }
  0x8d   :  { %197 = vadd.xlane.f32.xlu0 %v181_v6  ;;  %199 = vadd.xlane.f32.xlu1 %v182_v7 }
  0x8e   :  { %471 = vmatpush1.bf16.msra.mxu0 %v7638_v47  ;;  %7158 = vmatpush3.bf16.msra.mxu1 %v7641_v49 }
  0x8f   :  { %472 = vmatprep.subr.bf16.mxu0 %v7639_v48  ;;  %7159 = vmatprep.subr.bf16.mxu1 %v7645_v52 }
  0x92   :  { %473 = vmatpush1.bf16.msra.mxu0 %v7642_v50  ;;  %7160 = vmatpush3.bf16.msra.mxu1 %v7645_v52 }
  0x93   :  { %474 = vmatprep.subr.bf16.mxu0 %v7643_v51  ;;  %7161 = vmatprep.subr.bf16.mxu1 %v7649_v55 }
  0x96   :  { %475 = vmatpush1.bf16.msra.mxu0 %v7646_v53  ;;  %7162 = vmatpush3.bf16.msra.mxu1 %v7649_v55 }
  0x97   :  { %476 = vmatprep.subr.bf16.mxu0 %v7647_v54  ;;  %7163 = vmatprep.subr.bf16.mxu1 %v7653_v58 }
  0x9a   :  { %477 = vmatpush1.bf16.msra.mxu0 %v7650_v56  ;;  %7164 = vmatpush3.bf16.msra.mxu1 %v7653_v58 }
  0x9b   :  { %478 = vmatprep.subr.bf16.mxu0 %v7651_v57  ;;  %7165 = vmatprep.subr.bf16.mxu1 %v7657_v61 }
  0x9e   :  { %479 = vmatpush1.bf16.msra.mxu0 %v7654_v59  ;;  %7166 = vmatpush3.bf16.msra.mxu1 %v7657_v61 }
  0x9f   :  { %480 = vmatprep.subr.bf16.mxu0 %v7655_v60 }
  0xa2   :  { %481 = vmatpush1.bf16.msra.mxu0 %v7658_v63 }
 0x10a   :  { %v186_v10 = vpop.xlane.xlu0 %185  ;;  %v190_v11 = vpop.xlane.xlu1 %189 }
 0x10b   :  { %v202_v12 = vmul.f32 0.0078125, %v186_v10  ;;  %v204_v13 = vmul.f32 0.0078125, %v190_v11 }
 0x10d   :  { %v8504_v14 = vsub.f32 %v175_v0, %v202_v12  ;;  %v8506_v15 = vsub.f32 %v177_v1, %v204_v13  ;;  %v7659_v0 = vld [vmem:[#allocation9 + $0x8] ss:$12 sps:$4 sm:$0xff]  }
 0x10e   :  { %v188_v16 = vpop.xlane.xlu0 %187  ;;  %v192_v17 = vpop.xlane.xlu1 %191  ;;  %7167 = vmatprep.subr.bf16.mxu1 %v7659_v0 }
 0x10f   :  { %v203_v18 = vmul.f32 0.0078125, %v188_v16  ;;  %v218_v19 = vmul.f32 %v8504_v14, %v8504_v14  ;;  %v205_v20 = vmul.f32 0.0078125, %v192_v17  ;;  %v220_v21 = vmul.f32 %v8506_v15, %v8506_v15  ;;  %7168 = vmatpush3.bf16.msra.mxu1 %v7659_v0 }
 0x111   :  { %226 = vadd.xlane.f32.xlu0 %v218_v19  ;;  %v8512_v22 = vsub.f32 %v176_v2, %v203_v18  ;;  %v8514_v23 = vsub.f32 %v178_v3, %v205_v20 }
 0x112   :  { %v194_v24 = vpop.xlane.xlu0 %193  ;;  %v196_v25 = vpop.xlane.xlu1 %195 }
 0x113   :  { %v206_v26 = vmul.f32 0.0078125, %v194_v24  ;;  %v219_v27 = vmul.f32 %v8512_v22, %v8512_v22  ;;  %v207_v28 = vmul.f32 0.0078125, %v196_v25  ;;  %v221_v29 = vmul.f32 %v8514_v23, %v8514_v23 }
 0x115   :  { %230 = vadd.xlane.f32.xlu0 %v220_v21  ;;  %228 = vadd.xlane.f32.xlu1 %v219_v27  ;;  %v8520_v30 = vsub.f32 %v179_v4, %v206_v26  ;;  %v8522_v31 = vsub.f32 %v180_v5, %v207_v28 }
 0x116   :  { %v198_v32 = vpop.xlane.xlu0 %197  ;;  %v200_v33 = vpop.xlane.xlu1 %199 }
 0x117   :  { %v208_v34 = vmul.f32 0.0078125, %v198_v32  ;;  %v222_v35 = vmul.f32 %v8520_v30, %v8520_v30  ;;  %v209_v36 = vmul.f32 0.0078125, %v200_v33  ;;  %v223_v37 = vmul.f32 %v8522_v31, %v8522_v31  ;;  %v6623_v33 = vld [vmem:[#allocation6] ss:$0 sm:$0xff] }
 0x119   :  { %232 = vadd.xlane.f32.xlu1 %v221_v29  ;;  %234 = vadd.xlane.f32.xlu0 %v222_v35  ;;  %v8528_v38 = vsub.f32 %v181_v6, %v208_v34  ;;  %v8530_v39 = vsub.f32 %v182_v7, %v209_v36 }
 0x11b   :  { %v224_v40 = vmul.f32 %v8528_v38, %v8528_v38  ;;  %v225_v44 = vmul.f32 %v8530_v39, %v8530_v39 }
 0x11d   :  { %236 = vadd.xlane.f32.xlu1 %v223_v37  ;;  %238 = vadd.xlane.f32.xlu0 %v224_v40  ;;  %v6624_v40 = vld [vmem:[#allocation8] ss:$0 sm:$0xff] }
 0x121   :  { %240 = vadd.xlane.f32.xlu1 %v225_v44 }
 0x19a   :  { %v227_v1 = vpop.xlane.xlu0 %226 }
 0x19b   :  { %v242_v2 = vmul.f32 0.0078125, %v227_v1 }
 0x19d   :  { %v250_v3 = vadd.f32 1e-05, %v242_v2 }
 0x19e   :  { %v229_v4 = vpop.xlane.xlu1 %228  ;;  %v231_v5 = vpop.xlane.xlu0 %230 }
 0x19f   :  { %7752 = vrsqrt.f32 %v250_v3  ;;  %v243_v6 = vmul.f32 0.0078125, %v229_v4  ;;  %v244_v7 = vmul.f32 0.0078125, %v231_v5 }
 0x1a1   :  { %v251_v8 = vadd.f32 1e-05, %v243_v6  ;;  %v252_v9 = vadd.f32 1e-05, %v244_v7 }
 0x1a2   :  { %v233_v10 = vpop.xlane.xlu1 %232  ;;  %v235_v11 = vpop.xlane.xlu0 %234 }
 0x1a3   :  { %7754 = vrsqrt.f32 %v251_v8  ;;  %v245_v12 = vmul.f32 0.0078125, %v233_v10  ;;  %v246_v13 = vmul.f32 0.0078125, %v235_v11 }
 0x1a4   :  { %7756 = vrsqrt.f32 %v252_v9 }
 0x1a5   :  { %v253_v16 = vadd.f32 1e-05, %v245_v12  ;;  %v254_v17 = vadd.f32 1e-05, %v246_v13 }
 0x1a6   :  { %v237_v18 = vpop.xlane.xlu1 %236  ;;  %v239_v19 = vpop.xlane.xlu0 %238 }
 0x1a7   :  { %7758 = vrsqrt.f32 %v253_v16  ;;  %v247_v20 = vmul.f32 0.0078125, %v237_v18  ;;  %v248_v21 = vmul.f32 0.0078125, %v239_v19 }
 0x1a8   :  { %7760 = vrsqrt.f32 %v254_v17 }
 0x1a9   :  { %v255_v24 = vadd.f32 1e-05, %v247_v20  ;;  %v256_v25 = vadd.f32 1e-05, %v248_v21 }
 0x1aa   :  { %v241_v26 = vpop.xlane.xlu1 %240 }
 0x1ab   :  { %7762 = vrsqrt.f32 %v255_v24  ;;  %v249_v27 = vmul.f32 0.0078125, %v241_v26 }
 0x1ac   :  { %v7753_v28 = vpop.eup %7752  ;;  %7764 = vrsqrt.f32 %v256_v25 }
 0x1ad   :  { %v257_v29 = vadd.f32 1e-05, %v249_v27  ;;  %v266_v32 = vmul.f32 %v7753_v28, %v8504_v14 }
 0x1af   :  { %7766 = vrsqrt.f32 %v257_v29  ;;  %v280_v37 = vmul.f32 %v6623_v33, %v266_v32 }
 0x1b0   :  { %v7755_v34 = vpop.eup %7754 }
 0x1b1   :  { %v7757_v35 = vpop.eup %7756  ;;  %v267_v36 = vmul.f32 %v7755_v34, %v8512_v22  ;;  %v294_v46 = vadd.f32 %v6624_v40, %v280_v37 }
 0x1b2   :  { %v268_v41 = vmul.f32 %v7757_v35, %v8506_v15 }
 0x1b3   :  { %v281_v42 = vmul.f32 %v6623_v33, %v267_v36 }
 0x1b4   :  { %v7759_v43 = vpop.eup %7758  ;;  %v282_v44 = vmul.f32 %v6623_v33, %v268_v41 }
 0x1b5   :  { %v7761_v45 = vpop.eup %7760  ;;  %v295_v47 = vadd.f32 %v6624_v40, %v281_v42  ;;  %v269_v48 = vmul.f32 %v7759_v43, %v8514_v23 }
 0x1b6   :  { %v270_v14 = vmul.f32 %v7761_v45, %v8520_v30  ;;  %v296_v52 = vadd.f32 %v6624_v40, %v282_v44 }
 0x1b7   :  { %v302_v49 = vpack.c.bf16 %v295_v47, %v294_v46  ;;  %v283_v50 = vmul.f32 %v6623_v33, %v269_v48 }
 0x1b8   :  { %v7763_v51 = vpop.eup %7762  ;;  %v284_v54 = vmul.f32 %v6623_v33, %v270_v14 }
 0x1b9   :  { %v7765_v53 = vpop.eup %7764  ;;  %499 = vmatmul.mubr.bf16.vlgmr.msra.gmra.mxu0 %v302_v49  ;;  %7169 = vmatprep.mubr.bf16.mxu1 %v302_v49  ;;  %v297_v22 = vadd.f32 %v6624_v40, %v283_v50  ;;  %v271_v15 = vmul.f32 %v7763_v51, %v8522_v31 }
 0x1ba   :  { %508 = vmatprep.mubr.bf16.mxu0 %v10715_v62  ;;  %v272_v55 = vmul.f32 %v7765_v53, %v8528_v38  ;;  %v298_v30 = vadd.f32 %v6624_v40, %v284_v54  ;;  %v10717_v38 = vmov 0.0  }
 0x1bb   :  { %v303_v56 = vpack.c.bf16 %v297_v22, %v296_v52  ;;  %v285_v57 = vmul.f32 %v6623_v33, %v271_v15  ;;  %7177 = vmatprep.subr.bf16.mxu1 %v10717_v38  ;;  %7189 = vmatprep.subr.bf16.mxu0 %v10717_v38 }
 0x1bc   :  { %v7767_v23 = vpop.eup %7766  ;;  %v286_v60 = vmul.f32 %v6623_v33, %v272_v55 }
 0x1bd   :  { %7170 = vmatmul.mubr.bf16.vlgmr.msra.gmra.mxu1 %v303_v56  ;;  %v299_v58 = vadd.f32 %v6624_v40, %v285_v57  ;;  %v273_v59 = vmul.f32 %v7767_v23, %v8530_v39 }
 0x1be   :  { %v300_v0 = vadd.f32 %v6624_v40, %v286_v60 }
 0x1bf   :  { %v304_v61 = vpack.c.bf16 %v299_v58, %v298_v30  ;;  %v287_v63 = vmul.f32 %v6623_v33, %v273_v59 }
 0x1c1   :  { %509 = vmatmul.mubr.bf16.gmra.mxu0 %v303_v56  ;;  %7173 = vmatprep.mubr.bf16.mxu1 %v304_v61  ;;  %v301_v31 = vadd.f32 %v6624_v40, %v287_v63 }
 0x1c2   :  { %518 = vmatprep.mubr.bf16.mxu0 %v10715_v62 }
 0x1c3   :  { %v305_v1 = vpack.c.bf16 %v301_v31, %v300_v0 }
 0x1c5   :  { %7174 = vmatmul.mubr.bf16.gmra.mxu1 %v305_v1 }
 0x1c6   :  { %7179 = vmatprep.mubr.msk.bf16.mxu1 %vm8382_vm0, %v10717_v38 }
 0x1c9   :  { %519 = vmatmul.mubr.bf16.gmra.mxu0 %v304_v61 }
 0x1ca   :  { %528 = vmatprep.mubr.bf16.mxu0 %v10715_v62 }
 0x1d1   :  { %529 = vmatmul.mubr.bf16.gmra.mxu0 %v305_v1 }
 0x1d2   :  { %7191 = vmatprep.mubr.msk.bf16.mxu0 %vm8382_vm0, %v10717_v38 }
 0x279   :  { %v500_v39 = vpop.f32.mrf.mxu0 }
 0x27b   :  { %v502_v2 = vpop.f32.mrf.mxu0 }
 0x27d   :  { %v504_v3 = vpop.f32.mrf.mxu0  ;;  %v7171_v35 = vpop.f32.mrf.mxu1 }
 0x27e   :  { %v8554_v4 = vpack.c.bf16 %v504_v3, %v500_v39 }
 0x27f   :  { %v506_v5 = vpop.f32.mrf.mxu0  ;;  %v573_v36 = vpop.f32.mrf.mxu1 }
 0x280   :  { %v8556_v6 = vpack.c.bf16 %v506_v5, %v502_v2  ;;  %620 = vrot.lane.b32.xlu1 %v8554_v4, %s8383_s8 }
 0x281   :  { %v510_v7 = vpop.f32.mrf.mxu0  ;;  %v7172_v37 = vpop.f32.mrf.mxu1 }
 0x282   :  { %680 = vrot.lane.b32.xlu0 %v8556_v6, %s8383_s8  ;;  %v829_v8 = vsel %vm824_vm1, %v8556_v6, 0  ;;  %v8694_v43 = vpack.c.bf16 %v7172_v37, %v7171_v35 }
 0x283   :  { %v512_v9 = vpop.f32.mrf.mxu0  ;;  %7178 = vmatpush3.bf16.xpose.msra.mxu1 %v829_v8  ;;  %v576_v40 = vpop.f32.mrf.mxu1 }
 0x284   :  { %688 = vrot.lane.b32.xlu1 %v8556_v6, %s8384_s12  ;;  %7183 = vmatprep.subr.bf16.mxu1 %v10717_v38  ;;  %10755 = vst [vmem:[#allocation28_spill] sm:$0xff] %v8694_v43  ;;  %v8705_v14 = vpack.c.bf16 %v576_v40, %v573_v36 }
 0x285   :  { %v514_v10 = vpop.f32.mrf.mxu0  ;;  %v7175_v41 = vpop.f32.mrf.mxu1 }
 0x286   :  { %v8567_v11 = vpack.c.bf16 %v514_v10, %v510_v7 }
 0x287   :  { %v516_v12 = vpop.f32.mrf.mxu0  ;;  %v589_v42 = vpop.f32.mrf.mxu1 }
 0x288   :  { %v8569_v13 = vpack.c.bf16 %v516_v12, %v512_v9  ;;  %622 = vrot.lane.b32.xlu0 %v8567_v11, %s8383_s8 }
 0x289   :  { %v520_v16 = vpop.f32.mrf.mxu0  ;;  %v7176_v44 = vpop.f32.mrf.mxu1 }
 0x28a   :  { %682 = vrot.lane.b32.xlu1 %v8569_v13, %s8383_s8  ;;  %7180 = vmatmul.mubr.msk.bf16.vlgmr.msra.gmra.mxu1 %vm824_vm1, %v8554_v4  ;;  %v876_v17 = vsel %vm824_vm1, %v8569_v13, 0  ;;  %v8700_v46 = vpack.c.bf16 %v7176_v44, %v7175_v41 }
 0x28b   :  { %v522_v18 = vpop.f32.mrf.mxu0  ;;  %7184 = vmatpush3.bf16.xpose.msra.mxu1 %v876_v17  ;;  %7185 = vmatprep.mubr.msk.bf16.mxu1 %vm8382_vm0, %v10717_v38  ;;  %v592_v49 = vpop.f32.mrf.mxu1 }
 0x28c   :  { %7195 = vmatprep.subr.bf16.mxu1 %v10717_v38  ;;  %v8712_v51 = vpack.c.bf16 %v592_v49, %v589_v42 }
 0x28d   :  { %v524_v19 = vpop.f32.mrf.mxu0 }
 0x28e   :  { %v8582_v20 = vpack.c.bf16 %v524_v19, %v520_v16  ;;  %690 = vrot.lane.b32.xlu1 %v8569_v13, %s8384_s12 }
 0x28f   :  { %v526_v21 = vpop.f32.mrf.mxu0 }
 0x290   :  { %v8586_v24 = vpack.c.bf16 %v526_v21, %v522_v18  ;;  %624 = vrot.lane.b32.xlu0 %v8582_v20, %s8383_s8 }
 0x291   :  { %v530_v25 = vpop.f32.mrf.mxu0 }
 0x292   :  { %684 = vrot.lane.b32.xlu1 %v8586_v24, %s8383_s8  ;;  %7186 = vmatmul.mubr.msk.bf16.vlgmr.msra.gmra.mxu1 %vm824_vm1, %v8567_v11  ;;  %v923_v26 = vsel %vm824_vm1, %v8586_v24, 0 }
 0x293   :  { %v532_v27 = vpop.f32.mrf.mxu0  ;;  %7190 = vmatpush3.bf16.xpose.msra.mxu0 %v923_v26  ;;  %7197 = vmatprep.mubr.msk.bf16.mxu1 %vm8382_vm0, %v10717_v38 }
 0x294   :  { %7201 = vmatprep.subr.bf16.mxu0 %v10717_v38 }
 0x295   :  { %v534_v28 = vpop.f32.mrf.mxu0 }
 0x296   :  { %v613_v29 = vpack.c.bf16 %v534_v28, %v530_v25  ;;  %692 = vrot.lane.b32.xlu1 %v8586_v24, %s8384_s12 }
 0x297   :  { %v536_v32 = vpop.f32.mrf.mxu0 }
 0x298   :  { %v8601_v33 = vpack.c.bf16 %v536_v32, %v532_v27  ;;  %626 = vrot.lane.b32.xlu0 %v613_v29, %s8383_s8 }
 0x29a   :  { %696 = vrot.lane.b32.xlu1 %v8556_v6, %s8385_s18  ;;  %7192 = vmatmul.mubr.msk.bf16.vlgmr.msra.gmra.mxu0 %vm824_vm1, %v8582_v20  ;;  %v970_v34 = vsel %vm824_vm1, %v8601_v33, 0 }
 0x29b   :  { %7196 = vmatpush3.bf16.xpose.msra.mxu1 %v970_v34  ;;  %7203 = vmatprep.mubr.msk.bf16.mxu0 %vm8382_vm0, %v10717_v38 }
 0x29c   :  { %628 = vrot.lane.b32.xlu0 %v8554_v4, %s8384_s12  ;;  %7207 = vmatprep.subr.bf16.mxu1 %v10717_v38 }
 0x29e   :  { %686 = vrot.lane.b32.xlu1 %v8601_v33, %s8383_s8 }
 0x2a0   :  { %630 = vrot.lane.b32.xlu0 %v8567_v11, %s8384_s12 }
 0x2a2   :  { %698 = vrot.lane.b32.xlu1 %v8569_v13, %s8385_s18  ;;  %7198 = vmatmul.mubr.msk.bf16.vlgmr.msra.gmra.mxu1 %vm824_vm1, %v613_v29 }
 0x2a3   :  { %7209 = vmatprep.mubr.msk.bf16.mxu1 %vm8382_vm0, %v10717_v38 }
 0x2a4   :  { %632 = vrot.lane.b32.xlu0 %v8582_v20, %s8384_s12 }
 0x2a6   :  { %700 = vrot.lane.b32.xlu1 %v8586_v24, %s8385_s18 }
 0x2a8   :  { %634 = vrot.lane.b32.xlu0 %v613_v29, %s8384_s12 }
 0x2aa   :  { %704 = vrot.lane.b32.xlu1 %v8556_v6, %s8373_s0 }
 0x2ac   :  { %636 = vrot.lane.b32.xlu0 %v8554_v4, %s8385_s18 }
 0x2ae   :  { %694 = vrot.lane.b32.xlu1 %v8601_v33, %s8384_s12 }
 0x2b0   :  { %638 = vrot.lane.b32.xlu0 %v8567_v11, %s8385_s18 }
 0x2b2   :  { %706 = vrot.lane.b32.xlu1 %v8569_v13, %s8373_s0 }
 0x2b4   :  { %640 = vrot.lane.b32.xlu0 %v8582_v20, %s8385_s18 }
 0x2b6   :  { %708 = vrot.lane.b32.xlu1 %v8586_v24, %s8373_s0 }
 0x2b8   :  { %642 = vrot.lane.b32.xlu0 %v613_v29, %s8385_s18 }
 0x2ba   :  { %712 = vrot.lane.b32.xlu1 %v8556_v6, %s8386_s3 }
 0x2bc   :  { %644 = vrot.lane.b32.xlu0 %v8554_v4, %s8373_s0 }
 0x2be   :  { %702 = vrot.lane.b32.xlu1 %v8601_v33, %s8385_s18 }
 0x2c0   :  { %646 = vrot.lane.b32.xlu0 %v8567_v11, %s8373_s0 }
 0x2c2   :  { %714 = vrot.lane.b32.xlu1 %v8569_v13, %s8386_s3 }
 0x2c4   :  { %648 = vrot.lane.b32.xlu0 %v8582_v20, %s8373_s0 }
 0x2c6   :  { %716 = vrot.lane.b32.xlu1 %v8586_v24, %s8386_s3 }
 0x2c8   :  { %650 = vrot.lane.b32.xlu0 %v613_v29, %s8373_s0 }
 0x2ca   :  { %720 = vrot.lane.b32.xlu1 %v8556_v6, %s8387_s16 }
 0x2cc   :  { %652 = vrot.lane.b32.xlu0 %v8554_v4, %s8386_s3 }
 0x2ce   :  { %710 = vrot.lane.b32.xlu1 %v8601_v33, %s8373_s0 }
 0x2d0   :  { %654 = vrot.lane.b32.xlu0 %v8567_v11, %s8386_s3 }
 0x2d2   :  { %722 = vrot.lane.b32.xlu1 %v8569_v13, %s8387_s16 }
 0x2d4   :  { %656 = vrot.lane.b32.xlu0 %v8582_v20, %s8386_s3 }
 0x2d6   :  { %724 = vrot.lane.b32.xlu1 %v8586_v24, %s8387_s16 }
 0x2d8   :  { %658 = vrot.lane.b32.xlu0 %v613_v29, %s8386_s3 }
 0x2da   :  { %728 = vrot.lane.b32.xlu1 %v8556_v6, %s8378_s27 }
 0x2dc   :  { %660 = vrot.lane.b32.xlu0 %v8554_v4, %s8387_s16 }
 0x2de   :  { %718 = vrot.lane.b32.xlu1 %v8601_v33, %s8386_s3 }
 0x2e0   :  { %662 = vrot.lane.b32.xlu0 %v8567_v11, %s8387_s16 }
 0x2e2   :  { %730 = vrot.lane.b32.xlu1 %v8569_v13, %s8378_s27 }
 0x2e4   :  { %664 = vrot.lane.b32.xlu0 %v8582_v20, %s8387_s16 }
 0x2e6   :  { %670 = vrot.lane.b32.xlu1 %v8567_v11, %s8378_s27 }
 0x2e8   :  { %666 = vrot.lane.b32.xlu0 %v613_v29, %s8387_s16 }
 0x2ea   :  { %674 = vrot.lane.b32.xlu1 %v613_v29, %s8378_s27 }
 0x2ec   :  { %668 = vrot.lane.b32.xlu0 %v8554_v4, %s8378_s27 }
 0x2ee   :  { %726 = vrot.lane.b32.xlu1 %v8601_v33, %s8387_s16 }
 0x2f0   :  { %732 = vrot.lane.b32.xlu0 %v8586_v24, %s8378_s27 }
 0x2f2   :  { %v621_v45 = vpop.permute.xlu1 %620  ;;  %742 = vrot.lane.b32.xlu1 %v8694_v43, %s8383_s8 }
 0x2f4   :  { %672 = vrot.lane.b32.xlu0 %v8582_v20, %s8378_s27  ;;  %v681_v47 = vpop.permute.xlu0 %680 }
 0x2f5   :  { %v1017_v48 = vsel %vm824_vm1, %v681_v47, 0 }
 0x2f6   :  { %746 = vrot.lane.b32.xlu1 %v8700_v46, %s8383_s8  ;;  %7202 = vmatpush3.bf16.xpose.msra.mxu0 %v1017_v48  ;;  %v689_v50 = vpop.permute.xlu1 %688 }
 0x2f7   :  { %7213 = vmatprep.subr.bf16.mxu0 %v10717_v38  ;;  %v1205_v58 = vsel %vm824_vm1, %v689_v50, 0 }
 0x2f8   :  { %740 = vrot.lane.b32.xlu0 %v8705_v14, %s8383_s8 }
 0x2fa   :  { %754 = vrot.lane.b32.xlu1 %v8694_v43, %s8384_s12  ;;  %v623_v15 = vpop.permute.xlu0 %622 }
 0x2fc   :  { %v683_v52 = vpop.permute.xlu1 %682  ;;  %744 = vrot.lane.b32.xlu0 %v8712_v51, %s8383_s8 }
 0x2fd   :  { %v1064_v53 = vsel %vm824_vm1, %v683_v52, 0  ;;  %7204 = vmatmul.mubr.msk.bf16.vlgmr.msra.gmra.mxu0 %vm824_vm1, %v621_v45 }
 0x2fe   :  { %758 = vrot.lane.b32.xlu1 %v8700_v46, %s8384_s12  ;;  %7208 = vmatpush3.bf16.xpose.msra.mxu1 %v1064_v53 }
 0x2ff   :  { %7215 = vmatprep.mubr.msk.bf16.mxu0 %vm8382_vm0, %v10717_v38  ;;  %7219 = vmatprep.subr.bf16.mxu1 %v10717_v38 }
 0x300   :  { %v691_v22 = vpop.permute.xlu1 %690  ;;  %752 = vrot.lane.b32.xlu0 %v8705_v14, %s8384_s12 }
 0x301   :  { %v1252_v2 = vsel %vm824_vm1, %v691_v22, 0 }
 0x302   :  { %766 = vrot.lane.b32.xlu1 %v8694_v43, %s8385_s18  ;;  %v625_v56 = vpop.permute.xlu0 %624 }
 0x304   :  { %v685_v54 = vpop.permute.xlu1 %684  ;;  %756 = vrot.lane.b32.xlu0 %v8712_v51, %s8384_s12 }
 0x305   :  { %v1111_v55 = vsel %vm824_vm1, %v685_v54, 0  ;;  %7210 = vmatmul.mubr.msk.bf16.vlgmr.msra.gmra.mxu1 %vm824_vm1, %v623_v15 }
 0x306   :  { %734 = vrot.lane.b32.xlu1 %v8601_v33, %s8378_s27  ;;  %7214 = vmatpush3.bf16.xpose.msra.mxu0 %v1111_v55 }
 0x307   :  { %7225 = vmatprep.subr.bf16.mxu0 %v10717_v38  ;;  %7221 = vmatprep.mubr.msk.bf16.mxu1 %vm8382_vm0, %v10717_v38 }
 0x308   :  { %v693_v57 = vpop.permute.xlu1 %692  ;;  %764 = vrot.lane.b32.xlu0 %v8705_v14, %s8385_s18 }
 0x309   :  { %v1299_v31 = vsel %vm824_vm1, %v693_v57, 0 }
 0x30a   :  { %770 = vrot.lane.b32.xlu1 %v8700_v46, %s8385_s18  ;;  %v627_v23 = vpop.permute.xlu0 %626 }
 0x30c   :  { %v697_v30 = vpop.permute.xlu1 %696  ;;  %768 = vrot.lane.b32.xlu0 %v8712_v51, %s8385_s18 }
 0x30d   :  { %7216 = vmatmul.mubr.msk.bf16.vlgmr.msra.gmra.mxu0 %vm824_vm1, %v625_v56  ;;  %v1393_v5 = vsel %vm824_vm1, %v697_v30, 0 }
 0x30e   :  { %778 = vrot.lane.b32.xlu1 %v8694_v43, %s8373_s0  ;;  %7226 = vmatpush3.bf16.xpose.msra.mxu0 %v1205_v58  ;;  %v629_v59 = vpop.permute.xlu0 %628 }
 0x30f   :  { %7227 = vmatprep.mubr.msk.bf16.mxu0 %vm8382_vm0, %v10717_v38  ;;  %7237 = vmatprep.subr.bf16.mxu0 %v10717_v38 }
 0x310   :  { %776 = vrot.lane.b32.xlu0 %v8705_v14, %s8373_s0  ;;  %v687_v60 = vpop.permute.xlu1 %686 }
 0x311   :  { %v1158_v61 = vsel %vm824_vm1, %v687_v60, 0 }
 0x312   :  { %782 = vrot.lane.b32.xlu1 %v8700_v46, %s8373_s0  ;;  %7220 = vmatpush3.bf16.xpose.msra.mxu1 %v1158_v61  ;;  %v631_v63 = vpop.permute.xlu0 %630 }
 0x313   :  { %7231 = vmatprep.subr.bf16.mxu1 %v10717_v38 }
 0x314   :  { %780 = vrot.lane.b32.xlu0 %v8712_v51, %s8373_s0  ;;  %v699_v0 = vpop.permute.xlu1 %698 }
 0x315   :  { %7228 = vmatmul.mubr.msk.bf16.vlgmr.msra.gmra.mxu0 %vm824_vm1, %v629_v59  ;;  %v1440_v16 = vsel %vm824_vm1, %v699_v0, 0 }
 0x316   :  { %790 = vrot.lane.b32.xlu1 %v8694_v43, %s8386_s3  ;;  %7238 = vmatpush3.bf16.xpose.msra.mxu0 %v1299_v31  ;;  %v633_v1 = vpop.permute.xlu0 %632 }
 0x317   :  { %7239 = vmatprep.mubr.msk.bf16.mxu0 %vm8382_vm0, %v10717_v38  ;;  %7249 = vmatprep.subr.bf16.mxu0 %v10717_v38 }
 0x318   :  { %788 = vrot.lane.b32.xlu0 %v8705_v14, %s8386_s3  ;;  %v701_v39 = vpop.permute.xlu1 %700 }
 0x319   :  { %7222 = vmatmul.mubr.msk.bf16.vlgmr.msra.gmra.mxu1 %vm824_vm1, %v627_v23  ;;  %v1487_v11 = vsel %vm824_vm1, %v701_v39, 0 }
 0x31a   :  { %794 = vrot.lane.b32.xlu1 %v8700_v46, %s8386_s3  ;;  %7232 = vmatpush3.bf16.xpose.msra.mxu1 %v1252_v2  ;;  %v635_v3 = vpop.permute.xlu0 %634 }
 0x31b   :  { %7233 = vmatprep.mubr.msk.bf16.mxu1 %vm8382_vm0, %v10717_v38  ;;  %7243 = vmatprep.subr.bf16.mxu1 %v10717_v38 }
 0x31c   :  { %792 = vrot.lane.b32.xlu0 %v8712_v51, %s8386_s3  ;;  %v705_v4 = vpop.permute.xlu1 %704 }
 0x31d   :  { %7240 = vmatmul.mubr.msk.bf16.vlgmr.msra.gmra.mxu0 %vm824_vm1, %v633_v1  ;;  %v1581_v19 = vsel %vm824_vm1, %v705_v4, 0 }
 0x31e   :  { %800 = vrot.lane.b32.xlu1 %v8705_v14, %s8387_s16  ;;  %7250 = vmatpush3.bf16.xpose.msra.mxu0 %v1393_v5  ;;  %v637_v6 = vpop.permute.xlu0 %636 }
 0x31f   :  { %7251 = vmatprep.mubr.msk.bf16.mxu0 %vm8382_vm0, %v10717_v38  ;;  %7261 = vmatprep.subr.bf16.mxu0 %v10717_v38 }
 0x320   :  { %804 = vrot.lane.b32.xlu0 %v8712_v51, %s8387_s16  ;;  %v695_v7 = vpop.permute.xlu1 %694 }
 0x321   :  { %v1346_v8 = vsel %vm824_vm1, %v695_v7, 0  ;;  %7234 = vmatmul.mubr.msk.bf16.vlgmr.msra.gmra.mxu1 %vm824_vm1, %v631_v63 }
 0x322   :  { %802 = vrot.lane.b32.xlu1 %v8694_v43, %s8387_s16  ;;  %7244 = vmatpush3.bf16.xpose.msra.mxu1 %v1346_v8  ;;  %v639_v9 = vpop.permute.xlu0 %638 }
 0x323   :  { %7245 = vmatprep.mubr.msk.bf16.mxu1 %vm8382_vm0, %v10717_v38  ;;  %7255 = vmatprep.subr.bf16.mxu1 %v10717_v38 }
 0x324   :  { %v707_v10 = vpop.permute.xlu1 %706 }
 0x325   :  { %7252 = vmatmul.mubr.msk.bf16.vlgmr.msra.gmra.mxu0 %vm824_vm1, %v637_v6  ;;  %v1628_v32 = vsel %vm824_vm1, %v707_v10, 0 }
 0x326   :  { %806 = vrot.lane.b32.xlu1 %v8700_v46, %s8387_s16  ;;  %7262 = vmatpush3.bf16.xpose.msra.mxu0 %v1487_v11  ;;  %v641_v12 = vpop.permute.xlu0 %640 }
 0x327   :  { %7263 = vmatprep.mubr.msk.bf16.mxu0 %vm8382_vm0, %v10717_v38  ;;  %7273 = vmatprep.subr.bf16.mxu0 %v10717_v38 }
 0x328   :  { %v709_v13 = vpop.permute.xlu1 %708 }
 0x329   :  { %7246 = vmatmul.mubr.msk.bf16.vlgmr.msra.gmra.mxu1 %vm824_vm1, %v635_v3  ;;  %v1675_v27 = vsel %vm824_vm1, %v709_v13, 0 }
 0x32a   :  { %812 = vrot.lane.b32.xlu1 %v8705_v14, %s8378_s27  ;;  %7256 = vmatpush3.bf16.xpose.msra.mxu1 %v1440_v16  ;;  %v643_v17 = vpop.permute.xlu0 %642 }
 0x32b   :  { %7257 = vmatprep.mubr.msk.bf16.mxu1 %vm8382_vm0, %v10717_v38  ;;  %7267 = vmatprep.subr.bf16.mxu1 %v10717_v38 }
 0x32c   :  { %v713_v18 = vpop.permute.xlu1 %712 }
 0x32d   :  { %7264 = vmatmul.mubr.msk.bf16.vlgmr.msra.gmra.mxu0 %vm824_vm1, %v641_v12  ;;  %v1769_v35 = vsel %vm824_vm1, %v713_v18, 0 }
 0x32e   :  { %7274 = vmatpush3.bf16.xpose.msra.mxu0 %v1581_v19  ;;  %v645_v20 = vpop.permute.xlu0 %644  ;;  %7275 = vmatprep.mubr.msk.bf16.mxu0 %vm8382_vm0, %v10717_v38 }
 0x32f   :  { %7285 = vmatprep.subr.bf16.mxu0 %v10717_v38 }
 0x330   :  { %v703_v21 = vpop.permute.xlu1 %702 }
 0x331   :  { %v1534_v24 = vsel %vm824_vm1, %v703_v21, 0  ;;  %7258 = vmatmul.mubr.msk.bf16.vlgmr.msra.gmra.mxu1 %vm824_vm1, %v639_v9 }
 0x332   :  { %7268 = vmatpush3.bf16.xpose.msra.mxu1 %v1534_v24  ;;  %v647_v25 = vpop.permute.xlu0 %646  ;;  %7269 = vmatprep.mubr.msk.bf16.mxu1 %vm8382_vm0, %v10717_v38 }
 0x333   :  { %7279 = vmatprep.subr.bf16.mxu1 %v10717_v38 }
 0x334   :  { %v715_v26 = vpop.permute.xlu1 %714 }
 0x335   :  { %7276 = vmatmul.mubr.msk.bf16.vlgmr.msra.gmra.mxu0 %vm824_vm1, %v645_v20  ;;  %v1816_v48 = vsel %vm824_vm1, %v715_v26, 0 }
 0x336   :  { %7286 = vmatpush3.bf16.xpose.msra.mxu0 %v1675_v27  ;;  %v649_v28 = vpop.permute.xlu0 %648  ;;  %7287 = vmatprep.mubr.msk.bf16.mxu0 %vm8382_vm0, %v10717_v38 }
 0x337   :  { %7297 = vmatprep.subr.bf16.mxu0 %v10717_v38 }
 0x338   :  { %v717_v29 = vpop.permute.xlu1 %716 }
 0x339   :  { %7270 = vmatmul.mubr.msk.bf16.vlgmr.msra.gmra.mxu1 %vm824_vm1, %v643_v17  ;;  %v1863_v44 = vsel %vm824_vm1, %v717_v29, 0 }
 0x33a   :  { %7280 = vmatpush3.bf16.xpose.msra.mxu1 %v1628_v32  ;;  %v651_v33 = vpop.permute.xlu0 %650  ;;  %7281 = vmatprep.mubr.msk.bf16.mxu1 %vm8382_vm0, %v10717_v38 }
 0x33b   :  { %7291 = vmatprep.subr.bf16.mxu1 %v10717_v38 }
 0x33c   :  { %v721_v34 = vpop.permute.xlu1 %720 }
 0x33d   :  { %7288 = vmatmul.mubr.msk.bf16.vlgmr.msra.gmra.mxu0 %vm824_vm1, %v649_v28  ;;  %v1957_v15 = vsel %vm824_vm1, %v721_v34, 0 }
 0x33e   :  { %7298 = vmatpush3.bf16.xpose.msra.mxu0 %v1769_v35  ;;  %v653_v36 = vpop.permute.xlu0 %652  ;;  %7299 = vmatprep.mubr.msk.bf16.mxu0 %vm8382_vm0, %v10717_v38 }
 0x33f   :  { %7309 = vmatprep.subr.bf16.mxu0 %v10717_v38 }
 0x340   :  { %v711_v37 = vpop.permute.xlu1 %710 }
 0x341   :  { %v1722_v40 = vsel %vm824_vm1, %v711_v37, 0  ;;  %7282 = vmatmul.mubr.msk.bf16.vlgmr.msra.gmra.mxu1 %vm824_vm1, %v647_v25 }
 0x342   :  { %7292 = vmatpush3.bf16.xpose.msra.mxu1 %v1722_v40  ;;  %v655_v41 = vpop.permute.xlu0 %654  ;;  %7293 = vmatprep.mubr.msk.bf16.mxu1 %vm8382_vm0, %v10717_v38 }
 0x343   :  { %7303 = vmatprep.subr.bf16.mxu1 %v10717_v38 }
 0x344   :  { %v723_v42 = vpop.permute.xlu1 %722 }
 0x345   :  { %7300 = vmatmul.mubr.msk.bf16.vlgmr.msra.gmra.mxu0 %vm824_vm1, %v653_v36  ;;  %v2004_v4 = vsel %vm824_vm1, %v723_v42, 0 }
 0x346   :  { %7310 = vmatpush3.bf16.xpose.msra.mxu0 %v1863_v44  ;;  %v657_v45 = vpop.permute.xlu0 %656  ;;  %7311 = vmatprep.mubr.msk.bf16.mxu0 %vm8382_vm0, %v10717_v38 }
 0x347   :  { %7321 = vmatprep.subr.bf16.mxu0 %v10717_v38 }
 0x348   :  { %v725_v47 = vpop.permute.xlu1 %724 }
 0x349   :  { %7294 = vmatmul.mubr.msk.bf16.vlgmr.msra.gmra.mxu1 %vm824_vm1, %v651_v33  ;;  %v2051_v0 = vsel %vm824_vm1, %v725_v47, 0 }
 0x34a   :  { %v8844_v49 = vpop.f32.mrf.mxu1  ;;  %7304 = vmatpush3.bf16.xpose.msra.mxu1 %v1816_v48  ;;  %v659_v50 = vpop.permute.xlu0 %658  ;;  %7305 = vmatprep.mubr.msk.bf16.mxu1 %vm8382_vm0, %v10717_v38 }
 0x34b   :  { %v2329_v52 = vsel %vm824_vm1, %v8844_v49, -inf  ;;  %7315 = vmatprep.subr.bf16.mxu1 %v10717_v38 }
 0x34c   :  { %v7181_v53 = vpop.f32.mrf.mxu1  ;;  %2330 = vmax.xlane.f32.xlu0 %v2329_v52  ;;  %v729_v22 = vpop.permute.xlu1 %728 }
 0x34d   :  { %7312 = vmatmul.mubr.msk.bf16.vlgmr.msra.gmra.mxu0 %vm824_vm1, %v657_v45  ;;  %v2145_v10 = vsel %vm824_vm1, %v729_v22, 0 }
 0x34e   :  { %v8853_v54 = vpop.f32.mrf.mxu1  ;;  %7322 = vmatpush3.bf16.xpose.msra.mxu0 %v1957_v15  ;;  %v661_v55 = vpop.permute.xlu0 %660  ;;  %7323 = vmatprep.mubr.msk.bf16.mxu0 %vm8382_vm0, %v10717_v38 }
 0x34f   :  { %v2332_v56 = vsel %vm824_vm1, %v8853_v54, -inf  ;;  %7333 = vmatprep.subr.bf16.mxu0 %v10717_v38 }
 0x350   :  { %v7182_v57 = vpop.f32.mrf.mxu1  ;;  %2333 = vmax.xlane.f32.xlu1 %v2332_v56  ;;  %v719_v23 = vpop.permute.xlu1 %718 }
 0x351   :  { %v1910_v30 = vsel %vm824_vm1, %v719_v23, 0  ;;  %7306 = vmatmul.mubr.msk.bf16.vlgmr.msra.gmra.mxu1 %vm824_vm1, %v655_v41 }
 0x352   :  { %v8862_v58 = vpop.f32.mrf.mxu1  ;;  %7316 = vmatpush3.bf16.xpose.msra.mxu1 %v1910_v30  ;;  %v663_v59 = vpop.permute.xlu0 %662  ;;  %7317 = vmatprep.mubr.msk.bf16.mxu1 %vm8382_vm0, %v10717_v38 }
 0x353   :  { %v2335_v60 = vsel %vm824_vm1, %v8862_v58, -inf  ;;  %7327 = vmatprep.subr.bf16.mxu1 %v10717_v38 }
 0x354   :  { %v7187_v61 = vpop.f32.mrf.mxu1  ;;  %2336 = vmax.xlane.f32.xlu0 %v2335_v60  ;;  %v731_v63 = vpop.permute.xlu1 %730 }
 0x355   :  { %7324 = vmatmul.mubr.msk.bf16.vlgmr.msra.gmra.mxu0 %vm824_vm1, %v661_v55  ;;  %v2192_v33 = vsel %vm824_vm1, %v731_v63, 0 }
 0x356   :  { %v8871_v31 = vpop.f32.mrf.mxu1  ;;  %7334 = vmatpush3.bf16.xpose.msra.mxu0 %v2051_v0  ;;  %v665_v1 = vpop.permute.xlu0 %664  ;;  %7335 = vmatprep.mubr.msk.bf16.mxu0 %vm8382_vm0, %v10717_v38 }
 0x357   :  { %v2338_v39 = vsel %vm824_vm1, %v8871_v31, -inf  ;;  %7345 = vmatprep.subr.bf16.mxu0 %v10717_v38 }
 0x358   :  { %v7188_v2 = vpop.f32.mrf.mxu1  ;;  %2339 = vmax.xlane.f32.xlu0 %v2338_v39  ;;  %v671_v3 = vpop.permute.xlu1 %670 }
 0x359   :  { %7318 = vmatmul.mubr.msk.bf16.vlgmr.msra.gmra.mxu1 %vm824_vm1, %v659_v50 }
 0x35a   :  { %v8880_v5 = vpop.f32.mrf.mxu0  ;;  %7328 = vmatpush3.bf16.xpose.msra.mxu1 %v2004_v4  ;;  %v667_v6 = vpop.permute.xlu0 %666  ;;  %7329 = vmatprep.mubr.msk.bf16.mxu1 %vm8382_vm0, %v10717_v38 }
 0x35b   :  { %v2341_v7 = vsel %vm824_vm1, %v8880_v5, -inf  ;;  %7339 = vmatprep.subr.bf16.mxu1 %v10717_v38 }
 0x35c   :  { %2342 = vmax.xlane.f32.xlu0 %v2341_v7  ;;  %v7193_v8 = vpop.f32.mrf.mxu0  ;;  %v675_v9 = vpop.permute.xlu1 %674 }
 0x35d   :  { %7336 = vmatmul.mubr.msk.bf16.vlgmr.msra.gmra.mxu0 %vm824_vm1, %v665_v1 }
 0x35e   :  { %v8889_v11 = vpop.f32.mrf.mxu0  ;;  %7346 = vmatpush3.bf16.xpose.msra.mxu0 %v2145_v10  ;;  %v669_v12 = vpop.permute.xlu0 %668  ;;  %7347 = vmatprep.mubr.msk.bf16.mxu0 %vm8382_vm0, %v10717_v38 }
 0x35f   :  { %v2344_v13 = vsel %vm824_vm1, %v8889_v11, -inf  ;;  %7357 = vmatprep.subr.bf16.mxu0 %v10717_v38 }
 0x360   :  { %v7194_v16 = vpop.f32.mrf.mxu0  ;;  %2345 = vmax.xlane.f32.xlu1 %v2344_v13  ;;  %v727_v17 = vpop.permute.xlu1 %726 }
 0x361   :  { %v2098_v18 = vsel %vm824_vm1, %v727_v17, 0  ;;  %7330 = vmatmul.mubr.msk.bf16.vlgmr.msra.gmra.mxu1 %vm824_vm1, %v663_v59 }
 0x362   :  { %v8898_v19 = vpop.f32.mrf.mxu1  ;;  %7340 = vmatpush3.bf16.xpose.msra.mxu1 %v2098_v18  ;;  %v733_v20 = vpop.permute.xlu0 %732  ;;  %7341 = vmatprep.mubr.msk.bf16.mxu1 %vm8382_vm0, %v10717_v38 }
 0x363   :  { %v2347_v21 = vsel %vm824_vm1, %v8898_v19, -inf  ;;  %7351 = vmatprep.subr.bf16.mxu1 %v10717_v38  ;;  %v2239_v26 = vsel %vm824_vm1, %v733_v20, 0 }
 0x364   :  { %v8905_v24 = vpop.permute.xlu1 %742  ;;  %2348 = vmax.xlane.f32.xlu0 %v2347_v21  ;;  %v7199_v25 = vpop.f32.mrf.mxu1 }
 0x365   :  { %10756 = vst [vmem:[#allocation29_spill] sm:$0xff] %v8905_v24  ;;  %7348 = vmatmul.mubr.msk.bf16.vlgmr.msra.gmra.mxu0 %vm824_vm1, %v669_v12 }
 0x366   :  { %v8909_v27 = vpop.f32.mrf.mxu1  ;;  %7358 = vmatpush3.bf16.xpose.msra.mxu0 %v2239_v26  ;;  %7359 = vmatprep.mubr.msk.bf16.mxu0 %vm8382_vm0, %v10717_v38  ;;  %v673_v34 = vpop.permute.xlu0 %672 }
 0x367   :  { %v2350_v28 = vsel %vm824_vm1, %v8909_v27, -inf  ;;  %7369 = vmatprep.subr.bf16.mxu0 %v10717_v38 }
 0x368   :  { %v8916_v29 = vpop.permute.xlu1 %746  ;;  %2351 = vmax.xlane.f32.xlu1 %v2350_v28  ;;  %v7200_v32 = vpop.f32.mrf.mxu1 }
 0x369   :  { %10757 = vst [vmem:[#allocation30_spill] sm:$0xff] %v8916_v29  ;;  %7342 = vmatmul.mubr.msk.bf16.vlgmr.msra.gmra.mxu1 %vm824_vm1, %v667_v6 }
 0x36a   :  { %7352 = vmatpush3.bf16.xpose.msra.mxu1 %v2192_v33  ;;  %7353 = vmatprep.mubr.msk.bf16.mxu1 %vm8382_vm0, %v10717_v38 }
 0x36b   :  { %7363 = vmatprep.subr.bf16.mxu1 %v10717_v38 }
 0x36c   :  { %v8923_v35 = vpop.permute.xlu1 %754 }
 0x36d   :  { %10758 = vst [vmem:[#allocation31_spill] sm:$0xff] %v8923_v35  ;;  %7360 = vmatmul.mubr.msk.bf16.vlgmr.msra.gmra.mxu0 %vm824_vm1, %v673_v34 }
 0x36e   :  { %7370 = vmatpush3.bf16.msra.mxu0 %v8705_v14  ;;  %7371 = vmatprep.mubr.msk.bf16.mxu0 %vm8382_vm0, %v10717_v38  ;;  %v8944_v14 = vpop.permute.xlu0 %740 }
 0x36f   :  { %7381 = vmatprep.subr.bf16.mxu0 %v10717_v38 }
 0x370   :  { %v8930_v36 = vpop.permute.xlu1 %758 }
 0x371   :  { %10759 = vst [vmem:[#allocation32_spill] sm:$0xff] %v8930_v36  ;;  %7354 = vmatmul.mubr.msk.bf16.vlgmr.msra.gmra.mxu1 %vm824_vm1, %v671_v3 }
 0x372   :  { %7365 = vmatprep.mubr.msk.bf16.mxu1 %vm8382_vm0, %v10717_v38  ;;  %v8946_v42 = vpop.permute.xlu0 %744 }
 0x373   :  { %10761 = vst [vmem:[#allocation34_spill] sm:$0xff] %v8946_v42 }
 0x374   :  { %v8935_v37 = vpop.permute.xlu1 %766 }
 0x375   :  { %10760 = vst [vmem:[#allocation33_spill] sm:$0xff] %v8935_v37 }
 0x376   :  { %v8948_v44 = vpop.permute.xlu0 %752 }
 0x377   :  { %10762 = vst [vmem:[#allocation35_spill] sm:$0xff] %v8948_v44 }
 0x378   :  { %v735_v40 = vpop.permute.xlu1 %734 }
 0x379   :  { %v2286_v41 = vsel %vm824_vm1, %v735_v40, 0 }
 0x37a   :  { %7364 = vmatpush3.bf16.xpose.msra.mxu1 %v2286_v41  ;;  %v8952_v47 = vpop.permute.xlu0 %756 }
 0x37b   :  { %7375 = vmatprep.subr.bf16.mxu1 %v10717_v38  ;;  %10764 = vst [vmem:[#allocation37_spill] sm:$0xff] %v8952_v47 }
 0x37c   :  { %v8950_v45 = vpop.permute.xlu1 %770 }
 0x37d   :  { %10763 = vst [vmem:[#allocation36_spill] sm:$0xff] %v8950_v45 }
 0x37e   :  { %v8956_v50 = vpop.permute.xlu0 %764 }
 0x37f   :  { %10766 = vst [vmem:[#allocation39_spill] sm:$0xff] %v8956_v50 }
 0x380   :  { %v8954_v48 = vpop.permute.xlu1 %778 }
 0x381   :  { %7366 = vmatmul.mubr.msk.bf16.vlgmr.msra.gmra.mxu1 %vm824_vm1, %v675_v9  ;;  %10765 = vst [vmem:[#allocation38_spill] sm:$0xff] %v8954_v48 }
 0x382   :  { %7376 = vmatpush3.bf16.msra.mxu1 %v8694_v43  ;;  %7377 = vmatprep.mubr.msk.bf16.mxu1 %vm8382_vm0, %v10717_v38  ;;  %v8960_v53 = vpop.permute.xlu0 %768 }
 0x383   :  { %7387 = vmatprep.subr.bf16.mxu1 %v10717_v38  ;;  %10768 = vst [vmem:[#allocation41_spill] sm:$0xff] %v8960_v53 }
 0x384   :  { %v8958_v52 = vpop.permute.xlu1 %782 }
 0x385   :  { %10767 = vst [vmem:[#allocation40_spill] sm:$0xff] %v8958_v52 }
 0x386   :  { %v8964_v15 = vpop.permute.xlu0 %776 }
 0x387   :  { %10770 = vst [vmem:[#allocation43_spill] sm:$0xff] %v8964_v15 }
 0x388   :  { %v8962_v22 = vpop.permute.xlu1 %790 }
 0x389   :  { %10769 = vst [vmem:[#allocation42_spill] sm:$0xff] %v8962_v22 }
 0x38a   :  { %v8972_v30 = vpop.permute.xlu0 %780 }
 0x38b   :  { %10772 = vst [vmem:[#allocation45_spill] sm:$0xff] %v8972_v30 }
 0x38c   :  { %v8968_v56 = vpop.permute.xlu1 %794 }
 0x38d   :  { %10771 = vst [vmem:[#allocation44_spill] sm:$0xff] %v8968_v56 }
 0x38e   :  { %v8984_v39 = vpop.permute.xlu0 %788 }
 0x38f   :  { %10774 = vst [vmem:[#allocation47_spill] sm:$0xff] %v8984_v39 }
 0x390   :  { %v8978_v63 = vpop.permute.xlu1 %800 }
 0x391   :  { %10773 = vst [vmem:[#allocation46_spill] sm:$0xff] %v8978_v63 }
 0x392   :  { %v8992_v8 = vpop.permute.xlu0 %792 }
 0x393   :  { %10776 = vst [vmem:[#allocation49_spill] sm:$0xff] %v8992_v8 }
 0x394   :  { %v8988_v4 = vpop.permute.xlu1 %802 }
 0x395   :  { %10775 = vst [vmem:[#allocation48_spill] sm:$0xff] %v8988_v4 }
 0x396   :  { %v9004_v18 = vpop.permute.xlu0 %804 }
 0x397   :  { %10778 = vst [vmem:[#allocation51_spill] sm:$0xff] %v9004_v18 }
 0x398   :  { %v8998_v13 = vpop.permute.xlu1 %806 }
 0x399   :  { %10777 = vst [vmem:[#allocation50_spill] sm:$0xff] %v8998_v13 }
 0x39c   :  { %v9008_v25 = vpop.permute.xlu1 %812 }
 0x39d   :  { %10779 = vst [vmem:[#allocation52_spill] sm:$0xff] %v9008_v25 }
 0x3bd   :  { %v8966_v55 = vpop.f32.mrf.mxu0 }
 0x3be   :  { %v2353_v57 = vsel %vm824_vm1, %v8966_v55, -inf }
 0x3bf   :  { %2354 = vmax.xlane.f32.xlu0 %v2353_v57  ;;  %v7205_v23 = vpop.f32.mrf.mxu0 }
 0x3c1   :  { %v8974_v59 = vpop.f32.mrf.mxu0 }
 0x3c2   :  { %v2356_v60 = vsel %vm824_vm1, %v8974_v59, -inf }
 0x3c3   :  { %2357 = vmax.xlane.f32.xlu1 %v2356_v60  ;;  %v7206_v61 = vpop.f32.mrf.mxu0 }
 0x3c5   :  { %v8980_v0 = vpop.f32.mrf.mxu1 }
 0x3c6   :  { %v2359_v1 = vsel %vm824_vm1, %v8980_v0, -inf }
 0x3c7   :  { %2360 = vmax.xlane.f32.xlu0 %v2359_v1  ;;  %v7211_v2 = vpop.f32.mrf.mxu1 }
 0x3c9   :  { %v8986_v3 = vpop.f32.mrf.mxu1 }
 0x3ca   :  { %v2362_v6 = vsel %vm824_vm1, %v8986_v3, -inf }
 0x3cb   :  { %2363 = vmax.xlane.f32.xlu1 %v2362_v6  ;;  %v7212_v7 = vpop.f32.mrf.mxu1 }
 0x3cd   :  { %v8994_v9 = vpop.f32.mrf.mxu0 }
 0x3ce   :  { %v2365_v10 = vsel %vm824_vm1, %v8994_v9, -inf }
 0x3cf   :  { %2366 = vmax.xlane.f32.xlu0 %v2365_v10  ;;  %v7217_v12 = vpop.f32.mrf.mxu0 }
 0x3d1   :  { %v9000_v16 = vpop.f32.mrf.mxu0 }
 0x3d2   :  { %v2368_v17 = vsel %vm824_vm1, %v9000_v16, -inf }
 0x3d3   :  { %2369 = vmax.xlane.f32.xlu1 %v2368_v17  ;;  %v7218_v20 = vpop.f32.mrf.mxu0 }
 0x3d5   :  { %v9006_v21 = vpop.f32.mrf.mxu0  ;;  %v2331_v26 = vpop.xlane.xlu0 %2330 }
 0x3d6   :  { %v2521_v33 = vsub.f32 %v8844_v49, %v2331_v26  ;;  %v2377_v49 = vsel %vm824_vm1, %v9006_v21, -inf }
 0x3d7   :  { %v7229_v28 = vpop.f32.mrf.mxu0 }
 0x3d8   :  { %v2585_v61 = vmul.f32 1.442695, %v2521_v33 }
 0x3d9   :  { %v9010_v32 = vpop.f32.mrf.mxu1  ;;  %v9013_v34 = vpop.f32.mrf.mxu0 }
 0x3da   :  { %v2371_v40 = vsel %vm824_vm1, %v9010_v32, -inf  ;;  %v2334_v41 = vpop.xlane.xlu1 %2333  ;;  %7768 = vpow2.f32 %v2585_v61 }
 0x3db   :  { %2372 = vmax.xlane.f32.xlu0 %v2371_v40  ;;  %v7223_v57 = vpop.f32.mrf.mxu1  ;;  %v7230_v23 = vpop.f32.mrf.mxu0  ;;  %v2522_v1 = vsub.f32 %v8853_v54, %v2334_v41  ;;  %v2380_v54 = vsel %vm824_vm1, %v9013_v34, -inf }
 0x3dd   :  { %v9017_v60 = vpop.f32.mrf.mxu1  ;;  %v9020_v2 = vpop.f32.mrf.mxu0  ;;  %v2587_v20 = vmul.f32 1.442695, %v2522_v1 }
 0x3de   :  { %v2374_v6 = vsel %vm824_vm1, %v9017_v60, -inf  ;;  %v2337_v12 = vpop.xlane.xlu0 %2336  ;;  %v2389_v1 = vsel %vm824_vm1, %v9020_v2, -inf }
 0x3df   :  { %2375 = vmax.xlane.f32.xlu1 %v2374_v6  ;;  %v7224_v7 = vpop.f32.mrf.mxu1  ;;  %2378 = vmax.xlane.f32.xlu0 %v2377_v49  ;;  %v7241_v10 = vpop.f32.mrf.mxu0  ;;  %7770 = vpow2.f32 %v2587_v20  ;;  %v2523_v57 = vsub.f32 %v8862_v58, %v2337_v12 }
 0x3e1   :  { %v9026_v17 = vpop.f32.mrf.mxu1  ;;  %v9028_v26 = vpop.f32.mrf.mxu0 }
 0x3e2   :  { %v2383_v28 = vsel %vm824_vm1, %v9026_v17, -inf  ;;  %v2340_v6 = vpop.xlane.xlu0 %2339  ;;  %v2392_v58 = vsel %vm824_vm1, %v9028_v26, -inf }
 0x3e3   :  { %2381 = vmax.xlane.f32.xlu1 %v2380_v54  ;;  %2384 = vmax.xlane.f32.xlu0 %v2383_v28  ;;  %v7235_v33 = vpop.f32.mrf.mxu1  ;;  %v7242_v40 = vpop.f32.mrf.mxu0  ;;  %v2589_v54 = vmul.f32 1.442695, %v2523_v57  ;;  %v2524_v20 = vsub.f32 %v8871_v31, %v2340_v6 }
 0x3e5   :  { %v9034_v41 = vpop.f32.mrf.mxu1  ;;  %v9037_v23 = vpop.f32.mrf.mxu0  ;;  %7772 = vpow2.f32 %v2589_v54 }
 0x3e6   :  { %v2386_v61 = vsel %vm824_vm1, %v9034_v41, -inf  ;;  %v2401_v57 = vsel %vm824_vm1, %v9037_v23, -inf }
 0x3e7   :  { %2387 = vmax.xlane.f32.xlu1 %v2386_v61  ;;  %v7236_v49 = vpop.f32.mrf.mxu1  ;;  %2390 = vmax.xlane.f32.xlu0 %v2389_v1  ;;  %v7253_v7 = vpop.f32.mrf.mxu0  ;;  %v2591_v1 = vmul.f32 1.442695, %v2524_v20 }
 0x3e8   :  { %v9060_v6 = vpop.eup %7768  ;;  %v2343_v7 = vpop.xlane.xlu0 %2342 }
 0x3e9   :  { %v9043_v10 = vpop.f32.mrf.mxu1  ;;  %v9046_v28 = vpop.f32.mrf.mxu0  ;;  %7774 = vpow2.f32 %v2591_v1  ;;  %v2525_v54 = vsub.f32 %v8880_v5, %v2343_v7  ;;  %v2713_v62 = vsel %vm824_vm1, %v9060_v6, 0.0 }
 0x3ea   :  { %v2395_v12 = vsel %vm824_vm1, %v9043_v10, -inf  ;;  %v2346_v13 = vpop.xlane.xlu1 %2345 }
 0x3eb   :  { %2393 = vmax.xlane.f32.xlu1 %v2392_v58  ;;  %2396 = vmax.xlane.f32.xlu0 %v2395_v12  ;;  %v7247_v33 = vpop.f32.mrf.mxu1  ;;  %v7254_v40 = vpop.f32.mrf.mxu0  ;;  %v2593_v1 = vmul.f32 1.442695, %v2525_v54  ;;  %v2526_v5 = vsub.f32 %v8889_v11, %v2346_v13 }
 0x3ec   :  { %v2404_v40 = vsel %vm824_vm1, %v9046_v28, -inf  ;;  %v9071_v38 = vpop.eup %7770 }
 0x3ed   :  { %v9052_v61 = vpop.f32.mrf.mxu1  ;;  %v9054_v49 = vpop.f32.mrf.mxu0  ;;  %7776 = vpow2.f32 %v2593_v1 }
 0x3ee   :  { %v2398_v31 = vsel %vm824_vm1, %v9052_v61, -inf  ;;  %v2413_v13 = vsel %vm824_vm1, %v9054_v49, -inf  ;;  %v2349_v18 = vpop.xlane.xlu0 %2348 }
 0x3ef   :  { %2399 = vmax.xlane.f32.xlu1 %v2398_v31  ;;  %v7248_v58 = vpop.f32.mrf.mxu1  ;;  %2402 = vmax.xlane.f32.xlu0 %v2401_v57  ;;  %v7265_v12 = vpop.f32.mrf.mxu0  ;;  %v2527_v1 = vsub.f32 %v8898_v19, %v2349_v18 }
 0x3f0   :  { %v2716_v12 = vsel %vm824_vm1, %v9071_v38, 0.0 }
 0x3f1   :  { %v9062_v33 = vpop.f32.mrf.mxu1  ;;  %v9065_v20 = vpop.f32.mrf.mxu0 }
 0x3f2   :  { %v2407_v25 = vsel %vm824_vm1, %v9062_v33, -inf  ;;  %v9090_v54 = vpop.eup %7772  ;;  %v2352_v22 = vpop.xlane.xlu1 %2351 }
 0x3f3   :  { %2405 = vmax.xlane.f32.xlu1 %v2404_v40  ;;  %v7259_v31 = vpop.f32.mrf.mxu1  ;;  %2714 = vadd.xlane.f32.xlu0 %v2713_v62  ;;  %v7266_v57 = vpop.f32.mrf.mxu0  ;;  %v2595_v62 = vmul.f32 1.442695, %v2526_v5  ;;  %v2719_v56 = vsel %vm824_vm1, %v9090_v54, 0.0  ;;  %v2528_v19 = vsub.f32 %v8909_v27, %v2352_v22 }
 0x3f5   :  { %v9073_v58 = vpop.f32.mrf.mxu1  ;;  %v9076_v7 = vpop.f32.mrf.mxu0  ;;  %7778 = vpow2.f32 %v2595_v62  ;;  %v2597_v62 = vmul.f32 1.442695, %v2527_v1 }
 0x3f6   :  { %v2410_v11 = vsel %vm824_vm1, %v9073_v58, -inf  ;;  %v9101_v63 = vpop.eup %7774  ;;  %v2425_v27 = vsel %vm824_vm1, %v9076_v7, -inf }
 0x3f7   :  { %2717 = vadd.xlane.f32.xlu1 %v2716_v12  ;;  %v7260_v4 = vpop.f32.mrf.mxu1  ;;  %2408 = vmax.xlane.f32.xlu0 %v2407_v25  ;;  %v7277_v40 = vpop.f32.mrf.mxu0  ;;  %v2722_v8 = vsel %vm824_vm1, %v9101_v63, 0.0  ;;  %7780 = vpow2.f32 %v2597_v62 }
 0x3f8   :  { %v2416_v40 = vsel %vm824_vm1, %v9065_v20, -inf }
 0x3f9   :  { %v9082_v31 = vpop.f32.mrf.mxu1  ;;  %v9084_v57 = vpop.f32.mrf.mxu0 }
 0x3fa   :  { %v9120_v1 = vpop.eup %7776  ;;  %v2428_v62 = vsel %vm824_vm1, %v9084_v57, -inf }
 0x3fb   :  { %2411 = vmax.xlane.f32.xlu1 %v2410_v11  ;;  %v7271_v12 = vpop.f32.mrf.mxu1  ;;  %2414 = vmax.xlane.f32.xlu0 %v2413_v13  ;;  %v7278_v4 = vpop.f32.mrf.mxu0 }
 0x3fc   :  { %v2419_v4 = vsel %vm824_vm1, %v9082_v31, -inf }
 0x3fd   :  { %v9092_v25 = vpop.f32.mrf.mxu1  ;;  %v9095_v5 = vpop.f32.mrf.mxu0 }
 0x3fe   :  { %v2422_v22 = vsel %vm824_vm1, %v9092_v25, -inf }
 0x3ff   :  { %2417 = vmax.xlane.f32.xlu1 %v2416_v40  ;;  %v7272_v11 = vpop.f32.mrf.mxu1  ;;  %2720 = vadd.xlane.f32.xlu0 %v2719_v56  ;;  %v7289_v13 = vpop.f32.mrf.mxu0  ;;  %v2599_v56 = vmul.f32 1.442695, %v2528_v19  ;;  %v2725_v19 = vsel %vm824_vm1, %v9120_v1, 0.0 }
 0x401   :  { %v9103_v12 = vpop.f32.mrf.mxu1  ;;  %v9106_v18 = vpop.f32.mrf.mxu0  ;;  %7782 = vpow2.f32 %v2599_v56 }
 0x403   :  { %v7283_v52 = vpop.f32.mrf.mxu1  ;;  %2420 = vmax.xlane.f32.xlu0 %v2419_v4  ;;  %2723 = vadd.xlane.f32.xlu1 %v2722_v8  ;;  %v7290_v40 = vpop.f32.mrf.mxu0 }
 0x404   :  { %v9130_v40 = vpop.eup %7778 }
 0x405   :  { %v9112_v11 = vpop.f32.mrf.mxu1  ;;  %v9114_v13 = vpop.f32.mrf.mxu0  ;;  %v2728_v56 = vsel %vm824_vm1, %v9130_v40, 0.0 }
 0x407   :  { %v7284_v39 = vpop.f32.mrf.mxu1  ;;  %2426 = vmax.xlane.f32.xlu0 %v2425_v27  ;;  %2423 = vmax.xlane.f32.xlu1 %v2422_v22  ;;  %v7301_v52 = vpop.f32.mrf.mxu0 }
 0x408   :  { %v2431_v52 = vsel %vm824_vm1, %v9103_v12, -inf }
 0x409   :  { %v9122_v8 = vpop.f32.mrf.mxu1  ;;  %v9124_v4 = vpop.f32.mrf.mxu0 }
 0x40a   :  { %10780 = vst [vmem:[#allocation53_spill] sm:$0xff] %v9124_v4 }
 0x40b   :  { %v7295_v48 = vpop.f32.mrf.mxu1  ;;  %2429 = vmax.xlane.f32.xlu1 %v2428_v62  ;;  %2726 = vadd.xlane.f32.xlu0 %v2725_v19  ;;  %v7302_v39 = vpop.f32.mrf.mxu0  ;;  %v2434_v62 = vsel %vm824_vm1, %v9112_v11, -inf  ;;  %v2437_v19 = vsel %vm824_vm1, %v9095_v5, -inf }
 0x40c   :  { %v9148_v39 = vpop.eup %7780 }
 0x40d   :  { %v9132_v27 = vpop.f32.mrf.mxu1  ;;  %v9134_v22 = vpop.f32.mrf.mxu0  ;;  %10784 = vst [vmem:[#allocation57_spill] sm:$0xff] %v9148_v39 }
 0x40e   :  { %10781 = vst [vmem:[#allocation54_spill] sm:$0xff] %v9134_v22  ;;  %v9158_v50 = vpop.eup %7782 }
 0x40f   :  { %v7296_v30 = vpop.f32.mrf.mxu1  ;;  %2729 = vadd.xlane.f32.xlu1 %v2728_v56  ;;  %2432 = vmax.xlane.f32.xlu0 %v2431_v52  ;;  %v7313_v45 = vpop.f32.mrf.mxu0  ;;  %v2731_v52 = vsel %vm824_vm1, %v9148_v39, 0.0  ;;  %10786 = vst [vmem:[#allocation59_spill] sm:$0xff] %v9158_v50 }
 0x410   :  { %v2440_v45 = vsel %vm824_vm1, %v9106_v18, -inf }
 0x411   :  { %v9140_v15 = vpop.f32.mrf.mxu1  ;;  %v9142_v48 = vpop.f32.mrf.mxu0 }
 0x412   :  { %10782 = vst [vmem:[#allocation55_spill] sm:$0xff] %v9140_v15  ;;  %10783 = vst [vmem:[#allocation56_spill] sm:$0xff] %v9142_v48 }
 0x413   :  { %v7307_v37 = vpop.f32.mrf.mxu1  ;;  %2435 = vmax.xlane.f32.xlu1 %v2434_v62  ;;  %2438 = vmax.xlane.f32.xlu0 %v2437_v19  ;;  %v7314_v53 = vpop.f32.mrf.mxu0  ;;  %v2443_v19 = vsel %vm824_vm1, %v9122_v8, -inf }
 0x414   :  { %v2734_v53 = vsel %vm824_vm1, %v9158_v50, 0.0 }
 0x415   :  { %v9150_v30 = vpop.f32.mrf.mxu1  ;;  %v9152_v56 = vpop.f32.mrf.mxu0 }
 0x416   :  { %10785 = vst [vmem:[#allocation58_spill] sm:$0xff] %v9150_v30 }
 0x417   :  { %v7308_v36 = vpop.f32.mrf.mxu1  ;;  %2441 = vmax.xlane.f32.xlu1 %v2440_v45  ;;  %2732 = vadd.xlane.f32.xlu0 %v2731_v52  ;;  %v7325_v47 = vpop.f32.mrf.mxu0  ;;  %v2449_v45 = vsel %vm824_vm1, %v9114_v13, -inf }
 0x418   :  { %v2446_v47 = vsel %vm824_vm1, %v9132_v27, -inf }
 0x419   :  { %v9160_v37 = vpop.f32.mrf.mxu1  ;;  %v9162_v62 = vpop.f32.mrf.mxu0 }
 0x41a   :  { %10787 = vst [vmem:[#allocation60_spill] sm:$0xff] %v9160_v37 }
 0x41b   :  { %v7319_v35 = vpop.f32.mrf.mxu1  ;;  %2735 = vadd.xlane.f32.xlu1 %v2734_v53  ;;  %2444 = vmax.xlane.f32.xlu0 %v2443_v19  ;;  %v7326_v44 = vpop.f32.mrf.mxu0  ;;  %v2455_v53 = vsel %vm824_vm1, %v9140_v15, -inf }
 0x41c   :  { %v2452_v44 = vsel %vm824_vm1, %v9124_v4, -inf }
 0x41d   :  { %v9168_v29 = vpop.f32.mrf.mxu1  ;;  %v9170_v36 = vpop.f32.mrf.mxu0 }
 0x41e   :  { %10788 = vst [vmem:[#allocation61_spill] sm:$0xff] %v9168_v29 }
 0x41f   :  { %v7320_v52 = vpop.f32.mrf.mxu1  ;;  %2447 = vmax.xlane.f32.xlu1 %v2446_v47  ;;  %2450 = vmax.xlane.f32.xlu0 %v2449_v45  ;;  %v7337_v42 = vpop.f32.mrf.mxu0  ;;  %v2461_v47 = vsel %vm824_vm1, %v9134_v22, -inf }
 0x420   :  { %v2458_v42 = vsel %vm824_vm1, %v9150_v30, -inf }
 0x421   :  { %v9176_v43 = vpop.f32.mrf.mxu1  ;;  %v9178_v35 = vpop.f32.mrf.mxu0 }
 0x423   :  { %v7331_v19 = vpop.f32.mrf.mxu1  ;;  %2453 = vmax.xlane.f32.xlu1 %v2452_v44  ;;  %2456 = vmax.xlane.f32.xlu0 %v2455_v53  ;;  %v7338_v24 = vpop.f32.mrf.mxu0  ;;  %v2467_v44 = vsel %vm824_vm1, %v9160_v37, -inf }
 0x424   :  { %v2464_v24 = vsel %vm824_vm1, %v9142_v48, -inf }
 0x425   :  { %v9184_v50 = vpop.f32.mrf.mxu1  ;;  %v9186_v52 = vpop.f32.mrf.mxu0 }
 0x426   :  { %10789 = vst [vmem:[#allocation62_spill] sm:$0xff] %v9186_v52 }
 0x427   :  { %v7332_v45 = vpop.f32.mrf.mxu1  ;;  %2459 = vmax.xlane.f32.xlu1 %v2458_v42  ;;  %2462 = vmax.xlane.f32.xlu0 %v2461_v47  ;;  %v7349_v39 = vpop.f32.mrf.mxu0  ;;  %v2473_v42 = vsel %vm824_vm1, %v9152_v56, -inf }
 0x428   :  { %v2470_v39 = vsel %vm824_vm1, %v9168_v29, -inf }
 0x429   :  { %v9192_v4 = vpop.f32.mrf.mxu1  ;;  %v9194_v19 = vpop.f32.mrf.mxu0 }
 0x42a   :  { %10790 = vst [vmem:[#allocation63_spill] sm:$0xff] %v9194_v19 }
 0x42b   :  { %v7343_v53 = vpop.f32.mrf.mxu1  ;;  %2465 = vmax.xlane.f32.xlu1 %v2464_v24  ;;  %2468 = vmax.xlane.f32.xlu0 %v2467_v44  ;;  %v7350_v30 = vpop.f32.mrf.mxu0  ;;  %v2479_v24 = vsel %vm824_vm1, %v9176_v43, -inf }
 0x42c   :  { %v2476_v30 = vsel %vm824_vm1, %v9162_v62, -inf }
 0x42d   :  { %v9200_v15 = vpop.f32.mrf.mxu1  ;;  %v9202_v45 = vpop.f32.mrf.mxu0 }
 0x42f   :  { %v7344_v47 = vpop.f32.mrf.mxu1  ;;  %2471 = vmax.xlane.f32.xlu1 %v2470_v39  ;;  %2474 = vmax.xlane.f32.xlu0 %v2473_v42  ;;  %v7361_v48 = vpop.f32.mrf.mxu0  ;;  %v2482_v39 = vsel %vm824_vm1, %v9184_v50, -inf }
 0x430   :  { %v2485_v48 = vsel %vm824_vm1, %v9170_v36, -inf  ;;  %v2488_v47 = vsel %vm824_vm1, %v9178_v35, -inf }
 0x431   :  { %v9208_v22 = vpop.f32.mrf.mxu1  ;;  %v9210_v53 = vpop.f32.mrf.mxu0 }
 0x432   :  { %10791 = vst [vmem:[#allocation64_spill] sm:$0xff] %v9208_v22  ;;  %10792 = vst [vmem:[#allocation65_spill] sm:$0xff] %v9210_v53 }
 0x433   :  { %v7355_v44 = vpop.f32.mrf.mxu1  ;;  %2477 = vmax.xlane.f32.xlu1 %v2476_v30  ;;  %2480 = vmax.xlane.f32.xlu0 %v2479_v24  ;;  %v7362_v29 = vpop.f32.mrf.mxu0  ;;  %v2497_v30 = vsel %vm824_vm1, %v9186_v52, -inf }
 0x434   :  { %v2491_v44 = vsel %vm824_vm1, %v9192_v4, -inf  ;;  %v2494_v29 = vsel %vm824_vm1, %v9200_v15, -inf }
 0x435   :  { %v9216_v37 = vpop.f32.mrf.mxu1 }
 0x436   :  { %10793 = vst [vmem:[#allocation66_spill] sm:$0xff] %v9216_v37 }
 0x437   :  { %v7356_v42 = vpop.f32.mrf.mxu1  ;;  %2483 = vmax.xlane.f32.xlu1 %v2482_v39  ;;  %2486 = vmax.xlane.f32.xlu0 %v2485_v48  ;;  %v2500_v39 = vsel %vm824_vm1, %v9194_v19, -inf  ;;  %v2503_v48 = vsel %vm824_vm1, %v9208_v22, -inf  ;;  %v2512_v22 = vsel %vm824_vm1, %v9210_v53, -inf }
 0x43b   :  { %2489 = vmax.xlane.f32.xlu1 %v2488_v47  ;;  %2492 = vmax.xlane.f32.xlu0 %v2491_v44  ;;  %v2506_v44 = vsel %vm824_vm1, %v9216_v37, -inf }
 0x43f   :  { %2495 = vmax.xlane.f32.xlu1 %v2494_v29  ;;  %2498 = vmax.xlane.f32.xlu0 %v2497_v30  ;;  %v2509_v29 = vsel %vm824_vm1, %v9202_v45, -inf }
 0x441   :  { %v9230_v24 = vpop.f32.mrf.mxu1 }
 0x443   :  { %v7367_v42 = vpop.f32.mrf.mxu1  ;;  %2501 = vmax.xlane.f32.xlu1 %v2500_v39  ;;  %2504 = vmax.xlane.f32.xlu0 %v2503_v48  ;;  %v2515_v39 = vsel %vm824_vm1, %v9230_v24, -inf }
 0x445   :  { %v9236_v47 = vpop.f32.mrf.mxu1 }
 0x447   :  { %v7368_v30 = vpop.f32.mrf.mxu1  ;;  %2507 = vmax.xlane.f32.xlu1 %v2506_v44  ;;  %2510 = vmax.xlane.f32.xlu0 %v2509_v29  ;;  %v2518_v44 = vsel %vm824_vm1, %v9236_v47, -inf }
 0x448   :  { %v2355_v52 = vpop.xlane.xlu0 %2354 }
 0x449   :  { %v2529_v19 = vsub.f32 %v8966_v55, %v2355_v52 }
 0x44b   :  { %v2601_v48 = vmul.f32 1.442695, %v2529_v19  ;;  %2513 = vmax.xlane.f32.xlu1 %v2512_v22  ;;  %2516 = vmax.xlane.f32.xlu0 %v2515_v39 }
 0x44c   :  { %v2358_v42 = vpop.xlane.xlu1 %2357 }
 0x44d   :  { %7784 = vpow2.f32 %v2601_v48  ;;  %v2530_v37 = vsub.f32 %v8974_v59, %v2358_v42 }
 0x44f   :  { %v2603_v29 = vmul.f32 1.442695, %v2530_v37  ;;  %2519 = vmax.xlane.f32.xlu1 %v2518_v44 }
 0x450   :  { %v2361_v30 = vpop.xlane.xlu0 %2360 }
 0x451   :  { %7786 = vpow2.f32 %v2603_v29  ;;  %v2531_v55 = vsub.f32 %v8980_v0, %v2361_v30 }
 0x453   :  { %v2605_v52 = vmul.f32 1.442695, %v2531_v55 }
 0x454   :  { %v2364_v53 = vpop.xlane.xlu1 %2363 }
 0x455   :  { %7788 = vpow2.f32 %v2605_v52  ;;  %v2532_v19 = vsub.f32 %v8986_v3, %v2364_v53 }
 0x457   :  { %v2607_v22 = vmul.f32 1.442695, %v2532_v19 }
 0x458   :  { %v2367_v39 = vpop.xlane.xlu0 %2366 }
 0x459   :  { %7790 = vpow2.f32 %v2607_v22  ;;  %v2533_v48 = vsub.f32 %v8994_v9, %v2367_v39 }
 0x45a   :  { %v9253_v59 = vpop.eup %7784 }
 0x45b   :  { %v2609_v42 = vmul.f32 1.442695, %v2533_v48  ;;  %v2737_v37 = vsel %vm824_vm1, %v9253_v59, 0.0 }
 0x45c   :  { %v2370_v44 = vpop.xlane.xlu1 %2369  ;;  %2738 = vadd.xlane.f32.xlu0 %v2737_v37 }
 0x45d   :  { %7792 = vpow2.f32 %v2609_v42  ;;  %v2534_v0 = vsub.f32 %v9000_v16, %v2370_v44 }
 0x45e   :  { %v9258_v29 = vpop.eup %7786 }
 0x45f   :  { %v2611_v30 = vmul.f32 1.442695, %v2534_v0  ;;  %v2740_v3 = vsel %vm824_vm1, %v9258_v29, 0.0 }
 0x460   :  { %2741 = vadd.xlane.f32.xlu1 %v2740_v3 }
 0x461   :  { %7794 = vpow2.f32 %v2611_v30 }
 0x462   :  { %v9262_v9 = vpop.eup %7788 }
 0x463   :  { %v2743_v53 = vsel %vm824_vm1, %v9262_v9, 0.0 }
 0x464   :  { %2744 = vadd.xlane.f32.xlu0 %v2743_v53  ;;  %v2373_v55 = vpop.xlane.xlu0 %2372 }
 0x465   :  { %v2535_v52 = vsub.f32 %v9010_v32, %v2373_v55 }
 0x466   :  { %v9267_v19 = vpop.eup %7790 }
 0x467   :  { %v2613_v16 = vmul.f32 1.442695, %v2535_v52  ;;  %v2746_v22 = vsel %vm824_vm1, %v9267_v19, 0.0 }
 0x468   :  { %v2376_v39 = vpop.xlane.xlu1 %2375  ;;  %2747 = vadd.xlane.f32.xlu1 %v2746_v22  ;;  %v2379_v48 = vpop.xlane.xlu0 %2378 }
 0x469   :  { %7796 = vpow2.f32 %v2613_v16  ;;  %v2536_v42 = vsub.f32 %v9017_v60, %v2376_v39  ;;  %v2537_v37 = vsub.f32 %v9006_v21, %v2379_v48 }
 0x46a   :  { %v9273_v44 = vpop.eup %7792 }
 0x46b   :  { %v2615_v0 = vmul.f32 1.442695, %v2536_v42  ;;  %v2617_v30 = vmul.f32 1.442695, %v2537_v37  ;;  %v2749_v32 = vsel %vm824_vm1, %v9273_v44, 0.0 }
 0x46c   :  { %v2382_v3 = vpop.xlane.xlu1 %2381  ;;  %2750 = vadd.xlane.f32.xlu0 %v2749_v32  ;;  %v2385_v53 = vpop.xlane.xlu0 %2384 }
 0x46d   :  { %7798 = vpow2.f32 %v2615_v0  ;;  %v2538_v55 = vsub.f32 %v9013_v34, %v2382_v3  ;;  %v2539_v52 = vsub.f32 %v9026_v17, %v2385_v53 }
 0x46e   :  { %v9279_v16 = vpop.eup %7794  ;;  %7800 = vpow2.f32 %v2617_v30 }
 0x46f   :  { %v2619_v60 = vmul.f32 1.442695, %v2538_v55  ;;  %v2621_v21 = vmul.f32 1.442695, %v2539_v52  ;;  %v2752_v22 = vsel %vm824_vm1, %v9279_v16, 0.0 }
 0x470   :  { %v2388_v39 = vpop.xlane.xlu1 %2387  ;;  %2753 = vadd.xlane.f32.xlu1 %v2752_v22  ;;  %v2391_v48 = vpop.xlane.xlu0 %2390 }
 0x471   :  { %7802 = vpow2.f32 %v2619_v60  ;;  %v2540_v42 = vsub.f32 %v9034_v41, %v2388_v39  ;;  %v2541_v37 = vsub.f32 %v9020_v2, %v2391_v48 }
 0x472   :  { %7804 = vpow2.f32 %v2621_v21 }
 0x473   :  { %v2623_v34 = vmul.f32 1.442695, %v2540_v42  ;;  %v2625_v0 = vmul.f32 1.442695, %v2541_v37 }
 0x474   :  { %v2394_v17 = vpop.xlane.xlu1 %2393  ;;  %v2397_v32 = vpop.xlane.xlu0 %2396 }
 0x475   :  { %7806 = vpow2.f32 %v2623_v34  ;;  %v2542_v30 = vsub.f32 %v9028_v26, %v2394_v17  ;;  %v2543_v3 = vsub.f32 %v9043_v10, %v2397_v32 }
 0x476   :  { %v9287_v53 = vpop.eup %7796  ;;  %7808 = vpow2.f32 %v2625_v0 }
 0x477   :  { %v2627_v55 = vmul.f32 1.442695, %v2542_v30  ;;  %v2629_v52 = vmul.f32 1.442695, %v2543_v3  ;;  %v2755_v41 = vsel %vm824_vm1, %v9287_v53, 0.0 }
 0x478   :  { %v2400_v60 = vpop.xlane.xlu1 %2399  ;;  %2756 = vadd.xlane.f32.xlu0 %v2755_v41  ;;  %v2403_v2 = vpop.xlane.xlu0 %2402 }
 0x479   :  { %7810 = vpow2.f32 %v2627_v55  ;;  %v2544_v21 = vsub.f32 %v9052_v61, %v2400_v60  ;;  %v2545_v22 = vsub.f32 %v9037_v23, %v2403_v2 }
 0x47a   :  { %v9293_v39 = vpop.eup %7798  ;;  %7812 = vpow2.f32 %v2629_v52 }
 0x47b   :  { %v9295_v26 = vpop.eup %7800  ;;  %v2631_v10 = vmul.f32 1.442695, %v2544_v21  ;;  %v2633_v48 = vmul.f32 1.442695, %v2545_v22  ;;  %v2758_v42 = vsel %vm824_vm1, %v9293_v39, 0.0 }
 0x47c   :  { %v2406_v37 = vpop.xlane.xlu1 %2405  ;;  %2759 = vadd.xlane.f32.xlu1 %v2758_v42  ;;  %v2761_v34 = vsel %vm824_vm1, %v9295_v26, 0.0  ;;  %v2715_v0 = vpop.xlane.xlu0 %2714 }
 0x47d   :  { %v2546_v61 = vsub.f32 %v9046_v28, %v2406_v37  ;;  %2762 = vadd.xlane.f32.xlu0 %v2761_v34  ;;  %7814 = vpow2.f32 %v2633_v48 }
 0x47e   :  { %v9302_v23 = vpop.eup %7802  ;;  %7816 = vpow2.f32 %v2631_v10 }
 0x47f   :  { %v9304_v17 = vpop.eup %7804  ;;  %v2635_v32 = vmul.f32 1.442695, %v2546_v61  ;;  %v2764_v30 = vsel %vm824_vm1, %v9302_v23, 0.0  ;;  %7818 = vrcp.f32 %v2715_v0 }
 0x480   :  { %v2718_v3 = vpop.xlane.xlu1 %2717  ;;  %2765 = vadd.xlane.f32.xlu1 %v2764_v30  ;;  %v2767_v55 = vsel %vm824_vm1, %v9304_v17, 0.0  ;;  %v2409_v52 = vpop.xlane.xlu0 %2408 }
 0x481   :  { %7820 = vpow2.f32 %v2635_v32  ;;  %2768 = vadd.xlane.f32.xlu0 %v2767_v55  ;;  %v2547_v28 = vsub.f32 %v9062_v33, %v2409_v52 }
 0x482   :  { %v9311_v41 = vpop.eup %7806  ;;  %7822 = vrcp.f32 %v2718_v3 }
 0x483   :  { %v9313_v60 = vpop.eup %7808  ;;  %v2637_v2 = vmul.f32 1.442695, %v2547_v28  ;;  %v2770_v21 = vsel %vm824_vm1, %v9311_v41, 0.0 }
 0x484   :  { %v2412_v22 = vpop.xlane.xlu1 %2411  ;;  %2771 = vadd.xlane.f32.xlu1 %v2770_v21  ;;  %v2773_v10 = vsel %vm824_vm1, %v9313_v60, 0.0  ;;  %v2415_v48 = vpop.xlane.xlu0 %2414 }
 0x485   :  { %7824 = vpow2.f32 %v2637_v2  ;;  %v2548_v42 = vsub.f32 %v9073_v58, %v2412_v22  ;;  %2774 = vadd.xlane.f32.xlu0 %v2773_v10  ;;  %v2549_v33 = vsub.f32 %v9054_v49, %v2415_v48 }
 0x486   :  { %v9321_v37 = vpop.eup %7810 }
 0x487   :  { %v9323_v34 = vpop.eup %7812  ;;  %v2639_v0 = vmul.f32 1.442695, %v2548_v42  ;;  %v2641_v61 = vmul.f32 1.442695, %v2549_v33  ;;  %v2776_v32 = vsel %vm824_vm1, %v9321_v37, 0.0 }
 0x488   :  { %v2418_v30 = vpop.xlane.xlu1 %2417  ;;  %2777 = vadd.xlane.f32.xlu1 %v2776_v32  ;;  %v2779_v3 = vsel %vm824_vm1, %v9323_v34, 0.0  ;;  %v2721_v55 = vpop.xlane.xlu0 %2720 }
 0x489   :  { %v2550_v58 = vsub.f32 %v9065_v20, %v2418_v30  ;;  %2780 = vadd.xlane.f32.xlu0 %v2779_v3  ;;  %7826 = vpow2.f32 %v2641_v61 }
 0x48a   :  { %v9330_v49 = vpop.eup %7814  ;;  %7828 = vpow2.f32 %v2639_v0 }
 0x48b   :  { %v2643_v52 = vmul.f32 1.442695, %v2550_v58  ;;  %v9332_v28 = vpop.eup %7816  ;;  %7830 = vrcp.f32 %v2721_v55  ;;  %v2785_v21 = vsel %vm824_vm1, %v9330_v49, 0.0 }
 0x48c   :  { %v2724_v2 = vpop.xlane.xlu1 %2723  ;;  %v2421_v22 = vpop.xlane.xlu0 %2420  ;;  %2786 = vadd.xlane.f32.xlu1 %v2785_v21  ;;  %v2782_v32 = vsel %vm824_vm1, %v9332_v28, 0.0 }
 0x48d   :  { %v7819_v10 = vpop.eup %7818  ;;  %7832 = vpow2.f32 %v2643_v52  ;;  %v2551_v48 = vsub.f32 %v9082_v31, %v2421_v22 }
 0x48e   :  { %v9337_v20 = vpop.eup %7820  ;;  %7834 = vrcp.f32 %v2724_v2  ;;  %v2969_v3 = vmul.f32 %v7819_v10, %v9060_v6 }
 0x48f   :  { %v7823_v42 = vpop.eup %7822  ;;  %v2645_v33 = vmul.f32 1.442695, %v2551_v48  ;;  %v2788_v0 = vsel %vm824_vm1, %v9337_v20, 0.0 }
 0x490   :  { %v2424_v61 = vpop.xlane.xlu1 %2423  ;;  %2789 = vadd.xlane.f32.xlu0 %v2788_v0  ;;  %v2427_v30 = vpop.xlane.xlu0 %2426  ;;  %v2970_v55 = vmul.f32 %v7823_v42, %v9071_v38  ;;  %2783 = vadd.xlane.f32.xlu1 %v2782_v32 }
 0x491   :  { %7836 = vpow2.f32 %v2645_v33  ;;  %v2552_v31 = vsub.f32 %v9092_v25, %v2424_v61  ;;  %v2553_v58 = vsub.f32 %v9076_v7, %v2427_v30  ;;  %v10794_v25 = vmov 0.0  }
 0x492   :  { %v9347_v52 = vpop.eup %7824  ;;  %v3033_v2 = vpack.c.bf16 %v2970_v55, %v2969_v3 }
 0x493   :  { %v2647_v21 = vmul.f32 1.442695, %v2552_v31  ;;  %v2649_v22 = vmul.f32 1.442695, %v2553_v58  ;;  %v2791_v48 = vsel %vm824_vm1, %v9347_v52, 0.0 }
 0x494   :  { %7372 = vmatmul.mubr.msk.bf16.vlgmr.msra.gmra.mxu0 %vm824_vm1, %v3033_v2  ;;  %v2430_v0 = vpop.xlane.xlu1 %2429  ;;  %2792 = vadd.xlane.f32.xlu0 %v2791_v48  ;;  %v2727_v6 = vpop.xlane.xlu0 %2726 }
 0x495   :  { %7382 = vmatpush3.bf16.msra.mxu0 %v8712_v51  ;;  %v2554_v38 = vsub.f32 %v9084_v57, %v2430_v0  ;;  %7383 = vmatprep.mubr.msk.bf16.mxu0 %vm8382_vm0, %v10794_v25  ;;  %7838 = vpow2.f32 %v2649_v22 }
 0x496   :  { %7393 = vmatprep.subr.bf16.mxu0 %v10794_v25  ;;  %v9357_v7 = vpop.eup %7826  ;;  %7840 = vpow2.f32 %v2647_v21 }
 0x497   :  { %v2651_v10 = vmul.f32 1.442695, %v2554_v38  ;;  %v9359_v42 = vpop.eup %7828  ;;  %7842 = vrcp.f32 %v2727_v6  ;;  %v2797_v61 = vsel %vm824_vm1, %v9357_v7, 0.0 }
 0x498   :  { %v2730_v33 = vpop.xlane.xlu1 %2729  ;;  %v2433_v32 = vpop.xlane.xlu0 %2432  ;;  %2798 = vadd.xlane.f32.xlu1 %v2797_v61  ;;  %v2794_v21 = vsel %vm824_vm1, %v9359_v42, 0.0 }
 0x499   :  { %v7831_v30 = vpop.eup %7830  ;;  %7844 = vpow2.f32 %v2651_v10  ;;  %v2555_v57 = vsub.f32 %v9103_v12, %v2433_v32 }
 0x49a   :  { %v9364_v3 = vpop.eup %7832  ;;  %7846 = vrcp.f32 %v2730_v33  ;;  %v2971_v48 = vmul.f32 %v7831_v30, %v9090_v54 }
 0x49b   :  { %v7835_v55 = vpop.eup %7834  ;;  %v2653_v31 = vmul.f32 1.442695, %v2555_v57  ;;  %v2800_v58 = vsel %vm824_vm1, %v9364_v3, 0.0 }
 0x49c   :  { %v2436_v2 = vpop.xlane.xlu1 %2435  ;;  %2801 = vadd.xlane.f32.xlu0 %v2800_v58  ;;  %v2439_v22 = vpop.xlane.xlu0 %2438  ;;  %v2972_v0 = vmul.f32 %v7835_v55, %v9101_v63  ;;  %2795 = vadd.xlane.f32.xlu1 %v2794_v21 }
 0x49d   :  { %7848 = vpow2.f32 %v2653_v31  ;;  %v2556_v12 = vsub.f32 %v9112_v11, %v2436_v2  ;;  %v2557_v6 = vsub.f32 %v9095_v5, %v2439_v22 }
 0x49e   :  { %v9374_v38 = vpop.eup %7836  ;;  %v3034_v10 = vpack.c.bf16 %v2972_v0, %v2971_v48 }
 0x49f   :  { %v2655_v33 = vmul.f32 1.442695, %v2556_v12  ;;  %v2657_v61 = vmul.f32 1.442695, %v2557_v6  ;;  %v2803_v32 = vsel %vm824_vm1, %v9374_v38, 0.0 }
 0x4a0   :  { %7378 = vmatmul.mubr.msk.bf16.vlgmr.msra.gmra.mxu1 %vm824_vm1, %v3034_v10  ;;  %v2442_v57 = vpop.xlane.xlu1 %2441  ;;  %2804 = vadd.xlane.f32.xlu0 %v2803_v32  ;;  %v2733_v54 = vpop.xlane.xlu0 %2732 }
 0x4a1   :  { %7388 = vmatpush3.bf16.msra.mxu1 %v8700_v46  ;;  %v2558_v63 = vsub.f32 %v9106_v18, %v2442_v57  ;;  %7389 = vmatprep.mubr.msk.bf16.mxu1 %vm8382_vm0, %v10794_v25  ;;  %7850 = vpow2.f32 %v2657_v61 }
 0x4a2   :  { %7399 = vmatprep.subr.bf16.mxu1 %v10794_v25  ;;  %v9384_v5 = vpop.eup %7838  ;;  %7852 = vpow2.f32 %v2655_v33 }
 0x4a3   :  { %v2659_v11 = vmul.f32 1.442695, %v2558_v63  ;;  %v9386_v30 = vpop.eup %7840  ;;  %7854 = vrcp.f32 %v2733_v54  ;;  %v2809_v31 = vsel %vm824_vm1, %v9384_v5, 0.0 }
 0x4a4   :  { %v2736_v55 = vpop.xlane.xlu1 %2735  ;;  %v2445_v58 = vpop.xlane.xlu0 %2444  ;;  %2810 = vadd.xlane.f32.xlu1 %v2809_v31  ;;  %v2806_v6 = vsel %vm824_vm1, %v9386_v30, 0.0 }
 0x4a5   :  { %v7843_v2 = vpop.eup %7842  ;;  %7856 = vpow2.f32 %v2659_v11  ;;  %v2559_v18 = vsub.f32 %v9122_v8, %v2445_v58  ;;  %v10796_v58 = vld [vmem:[#allocation55_spill] sm:$0xff] }
 0x4a6   :  { %v9391_v21 = vpop.eup %7844  ;;  %7858 = vrcp.f32 %v2736_v55  ;;  %v2973_v33 = vmul.f32 %v7843_v2, %v9120_v1 }
 0x4a7   :  { %v7847_v22 = vpop.eup %7846  ;;  %v2661_v48 = vmul.f32 1.442695, %v2559_v18  ;;  %v2812_v0 = vsel %vm824_vm1, %v9391_v21, 0.0 }
 0x4a8   :  { %v2448_v12 = vpop.xlane.xlu1 %2447  ;;  %2813 = vadd.xlane.f32.xlu0 %v2812_v0  ;;  %v2451_v10 = vpop.xlane.xlu0 %2450  ;;  %v2974_v61 = vmul.f32 %v7847_v22, %v9130_v40  ;;  %2807 = vadd.xlane.f32.xlu1 %v2806_v6  ;;  %v10795_v40 = vld [vmem:[#allocation53_spill] sm:$0xff] }
 0x4a9   :  { %7860 = vpow2.f32 %v2661_v48  ;;  %v2560_v8 = vsub.f32 %v9132_v27, %v2448_v12  ;;  %v2561_v32 = vsub.f32 %v9114_v13, %v2451_v10  ;;  %v10797_v10 = vld [vmem:[#allocation58_spill] sm:$0xff] }
 0x4aa   :  { %v9401_v57 = vpop.eup %7848  ;;  %v3035_v54 = vpack.c.bf16 %v2974_v61, %v2973_v33  ;;  %v10798_v61 = vld [vmem:[#allocation54_spill] sm:$0xff] }
 0x4ab   :  { %v2665_v63 = vmul.f32 1.442695, %v2561_v32  ;;  %v2815_v11 = vsel %vm824_vm1, %v9401_v57, 0.0  ;;  %v2663_v55 = vmul.f32 1.442695, %v2560_v8 }
 0x4ac   :  { %7384 = vmatmul.mubr.msk.bf16.vlgmr.msra.gmra.mxu0 %vm824_vm1, %v3035_v54  ;;  %v2454_v31 = vpop.xlane.xlu1 %2453  ;;  %2816 = vadd.xlane.f32.xlu0 %v2815_v11  ;;  %v2457_v1 = vpop.xlane.xlu0 %2456 }
 0x4ad   :  { %7394 = vmatpush3.bf16.msra.mxu0 %v8944_v14  ;;  %v2562_v27 = vsub.f32 %v10795_v40, %v2454_v31  ;;  %v2563_v2 = vsub.f32 %v10796_v58, %v2457_v1  ;;  %7395 = vmatprep.mubr.msk.bf16.mxu0 %vm8382_vm0, %v10794_v25  ;;  %7862 = vpow2.f32 %v2665_v63 }
 0x4ae   :  { %7405 = vmatprep.subr.bf16.mxu0 %v10794_v25  ;;  %v9412_v13 = vpop.eup %7850  ;;  %7864 = vpow2.f32 %v2663_v55 }
 0x4af   :  { %v2667_v18 = vmul.f32 1.442695, %v2562_v27  ;;  %v2669_v22 = vmul.f32 1.442695, %v2563_v2  ;;  %v9414_v48 = vpop.eup %7852  ;;  %v2821_v14 = vsel %vm824_vm1, %v9412_v13, 0.0  ;;  %v10799_v27 = vld [vmem:[#allocation57_spill] sm:$0xff] }
 0x4b0   :  { %v2460_v0 = vpop.xlane.xlu1 %2459  ;;  %v2463_v12 = vpop.xlane.xlu0 %2462  ;;  %2822 = vadd.xlane.f32.xlu1 %v2821_v14  ;;  %v2818_v1 = vsel %vm824_vm1, %v9414_v48, 0.0  ;;  %v10800_v2 = vld [vmem:[#allocation59_spill] sm:$0xff] }
 0x4b1   :  { %v7855_v6 = vpop.eup %7854  ;;  %7866 = vpow2.f32 %v2667_v18  ;;  %v2564_v33 = vsub.f32 %v10797_v10, %v2460_v0  ;;  %v2565_v8 = vsub.f32 %v10798_v61, %v2463_v12  ;;  %v10801_v0 = vld [vmem:[#allocation56_spill] sm:$0xff] }
 0x4b2   :  { %v9420_v32 = vpop.eup %7856  ;;  %7868 = vpow2.f32 %v2669_v22  ;;  %v2975_v58 = vmul.f32 %v7855_v6, %v10799_v27  ;;  %v10802_v12 = vld [vmem:[#allocation60_spill] sm:$0xff] }
 0x4b3   :  { %v7859_v54 = vpop.eup %7858  ;;  %v2673_v63 = vmul.f32 1.442695, %v2565_v8  ;;  %v2824_v11 = vsel %vm824_vm1, %v9420_v32, 0.0  ;;  %v2671_v55 = vmul.f32 1.442695, %v2564_v33 }
 0x4b4   :  { %v2466_v31 = vpop.xlane.xlu1 %2465  ;;  %2825 = vadd.xlane.f32.xlu0 %v2824_v11  ;;  %v2469_v40 = vpop.xlane.xlu0 %2468  ;;  %v2976_v18 = vmul.f32 %v7859_v54, %v10800_v2  ;;  %2819 = vadd.xlane.f32.xlu1 %v2818_v1  ;;  %v10804_v1 = vld [vmem:[#allocation61_spill] sm:$0xff] }
 0x4b5   :  { %v2566_v14 = vsub.f32 %v10801_v0, %v2466_v31  ;;  %v2567_v22 = vsub.f32 %v10802_v12, %v2469_v40  ;;  %7870 = vpow2.f32 %v2673_v63  ;;  %v10803_v31 = vld [vmem:[#allocation29_spill] sm:$0xff] }
 0x4b6   :  { %v9430_v10 = vpop.eup %7860  ;;  %v3036_v61 = vpack.c.bf16 %v2976_v18, %v2975_v58  ;;  %7872 = vpow2.f32 %v2671_v55 }
 0x4b7   :  { %v2675_v33 = vmul.f32 1.442695, %v2566_v14  ;;  %v2677_v8 = vmul.f32 1.442695, %v2567_v22  ;;  %v2827_v11 = vsel %vm824_vm1, %v9430_v10, 0.0 }
 0x4b8   :  { %7390 = vmatmul.mubr.msk.bf16.vlgmr.msra.gmra.mxu1 %vm824_vm1, %v3036_v61  ;;  %v2472_v6 = vpop.xlane.xlu1 %2471  ;;  %2828 = vadd.xlane.f32.xlu0 %v2827_v11  ;;  %v2475_v54 = vpop.xlane.xlu0 %2474 }
 0x4b9   :  { %7874 = vpow2.f32 %v2675_v33  ;;  %7400 = vmatpush3.bf16.msra.mxu1 %v10803_v31  ;;  %v2568_v40 = vsub.f32 %v10804_v1, %v2472_v6  ;;  %v2569_v27 = vsub.f32 %v9152_v56, %v2475_v54  ;;  %7401 = vmatprep.mubr.msk.bf16.mxu1 %vm8382_vm0, %v10794_v25 }
 0x4ba   :  { %7411 = vmatprep.subr.bf16.mxu1 %v10794_v25  ;;  %v9441_v63 = vpop.eup %7862  ;;  %7876 = vpow2.f32 %v2677_v8 }
 0x4bb   :  { %v2681_v55 = vmul.f32 1.442695, %v2569_v27  ;;  %v2679_v58 = vmul.f32 1.442695, %v2568_v40  ;;  %v2833_v18 = vsel %vm824_vm1, %v9441_v63, 0.0  ;;  %v9445_v14 = vpop.eup %7864 }
 0x4bc   :  { %v2478_v2 = vpop.xlane.xlu1 %2477  ;;  %v2481_v0 = vpop.xlane.xlu0 %2480  ;;  %2834 = vadd.xlane.f32.xlu1 %v2833_v18  ;;  %v2830_v54 = vsel %vm824_vm1, %v9445_v14, 0.0 }
 0x4bd   :  { %v2570_v12 = vsub.f32 %v9162_v62, %v2478_v2  ;;  %v2571_v56 = vsub.f32 %v9176_v43, %v2481_v0  ;;  %7878 = vpow2.f32 %v2681_v55 }
 0x4be   :  { %v9449_v22 = vpop.eup %7866  ;;  %7880 = vpow2.f32 %v2679_v58 }
 0x4bf   :  { %v2683_v61 = vmul.f32 1.442695, %v2570_v12  ;;  %v2685_v33 = vmul.f32 1.442695, %v2571_v56  ;;  %v2836_v8 = vsel %vm824_vm1, %v9449_v22, 0.0  ;;  %v9453_v11 = vpop.eup %7868 }
 0x4c0   :  { %v2484_v6 = vpop.xlane.xlu1 %2483  ;;  %2837 = vadd.xlane.f32.xlu0 %v2836_v8  ;;  %v2487_v62 = vpop.xlane.xlu0 %2486  ;;  %2831 = vadd.xlane.f32.xlu1 %v2830_v54  ;;  %v2839_v27 = vsel %vm824_vm1, %v9453_v11, 0.0 }
 0x4c1   :  { %7882 = vpow2.f32 %v2683_v61  ;;  %v2572_v43 = vsub.f32 %v9184_v50, %v2484_v6  ;;  %v2573_v31 = vsub.f32 %v9170_v36, %v2487_v62  ;;  %v10805_v62 = vld [vmem:[#allocation62_spill] sm:$0xff] }
 0x4c2   :  { %v9459_v1 = vpop.eup %7870  ;;  %7884 = vpow2.f32 %v2685_v33 }
 0x4c3   :  { %v2689_v40 = vmul.f32 1.442695, %v2573_v31  ;;  %v2687_v55 = vmul.f32 1.442695, %v2572_v43  ;;  %v2845_v2 = vsel %vm824_vm1, %v9459_v1, 0.0  ;;  %v9465_v0 = vpop.eup %7872 }
 0x4c4   :  { %v2490_v58 = vpop.xlane.xlu1 %2489  ;;  %2840 = vadd.xlane.f32.xlu0 %v2839_v27  ;;  %v2493_v18 = vpop.xlane.xlu0 %2492  ;;  %2846 = vadd.xlane.f32.xlu1 %v2845_v2  ;;  %v2842_v54 = vsel %vm824_vm1, %v9465_v0, 0.0 }
 0x4c5   :  { %v2574_v50 = vsub.f32 %v9178_v35, %v2490_v58  ;;  %v2575_v36 = vsub.f32 %v9192_v4, %v2493_v18  ;;  %7886 = vpow2.f32 %v2689_v40 }
 0x4c6   :  { %v9469_v12 = vpop.eup %7874  ;;  %7888 = vpow2.f32 %v2687_v55 }
 0x4c7   :  { %v2691_v56 = vmul.f32 1.442695, %v2574_v50  ;;  %v2693_v61 = vmul.f32 1.442695, %v2575_v36  ;;  %v2848_v33 = vsel %vm824_vm1, %v9469_v12, 0.0  ;;  %v9473_v8 = vpop.eup %7876 }
 0x4c8   :  { %v2496_v6 = vpop.xlane.xlu1 %2495  ;;  %2849 = vadd.xlane.f32.xlu0 %v2848_v33  ;;  %v2499_v35 = vpop.xlane.xlu0 %2498  ;;  %2843 = vadd.xlane.f32.xlu1 %v2842_v54  ;;  %v2851_v27 = vsel %vm824_vm1, %v9473_v8, 0.0 }
 0x4c9   :  { %7890 = vpow2.f32 %v2691_v56  ;;  %v2576_v4 = vsub.f32 %v9200_v15, %v2496_v6  ;;  %v2577_v43 = vsub.f32 %v10805_v62, %v2499_v35  ;;  %v10806_v15 = vld [vmem:[#allocation63_spill] sm:$0xff]  ;;  %v10807_v56 = vld [vmem:[#allocation64_spill] sm:$0xff] }
 0x4ca   :  { %v9479_v31 = vpop.eup %7878  ;;  %7892 = vpow2.f32 %v2693_v61 }
 0x4cb   :  { %v2697_v40 = vmul.f32 1.442695, %v2577_v43  ;;  %v2695_v55 = vmul.f32 1.442695, %v2576_v4  ;;  %v2857_v2 = vsel %vm824_vm1, %v9479_v31, 0.0  ;;  %v9485_v50 = vpop.eup %7880 }
 0x4cc   :  { %v2502_v58 = vpop.xlane.xlu1 %2501  ;;  %2852 = vadd.xlane.f32.xlu0 %v2851_v27  ;;  %v2505_v18 = vpop.xlane.xlu0 %2504  ;;  %2858 = vadd.xlane.f32.xlu1 %v2857_v2  ;;  %v2854_v43 = vsel %vm824_vm1, %v9485_v50, 0.0 }
 0x4cd   :  { %v2578_v36 = vsub.f32 %v10806_v15, %v2502_v58  ;;  %v2579_v33 = vsub.f32 %v10807_v56, %v2505_v18  ;;  %7894 = vpow2.f32 %v2697_v40  ;;  %v10808_v58 = vld [vmem:[#allocation66_spill] sm:$0xff] }
 0x4ce   :  { %v9489_v6 = vpop.eup %7882  ;;  %7896 = vpow2.f32 %v2695_v55 }
 0x4cf   :  { %v2699_v61 = vmul.f32 1.442695, %v2578_v36  ;;  %v2701_v54 = vmul.f32 1.442695, %v2579_v33  ;;  %v2860_v35 = vsel %vm824_vm1, %v9489_v6, 0.0  ;;  %v9493_v4 = vpop.eup %7884 }
 0x4d0   :  { %v2508_v62 = vpop.xlane.xlu1 %2507  ;;  %2861 = vadd.xlane.f32.xlu0 %v2860_v35  ;;  %v2511_v27 = vpop.xlane.xlu0 %2510  ;;  %2855 = vadd.xlane.f32.xlu1 %v2854_v43  ;;  %v2863_v55 = vsel %vm824_vm1, %v9493_v4, 0.0 }
 0x4d1   :  { %7898 = vpow2.f32 %v2699_v61  ;;  %v2580_v2 = vsub.f32 %v10808_v58, %v2508_v62  ;;  %v2581_v40 = vsub.f32 %v9202_v45, %v2511_v27 }
 0x4d2   :  { %v9499_v18 = vpop.eup %7886  ;;  %7900 = vpow2.f32 %v2701_v54 }
 0x4d3   :  { %v2703_v15 = vmul.f32 1.442695, %v2580_v2  ;;  %v2705_v36 = vmul.f32 1.442695, %v2581_v40  ;;  %v2869_v33 = vsel %vm824_vm1, %v9499_v18, 0.0  ;;  %v9507_v35 = vpop.eup %7888 }
 0x4d4   :  { %v9503_v56 = vpop.xlane.xlu1 %2513  ;;  %2864 = vadd.xlane.f32.xlu0 %v2863_v55  ;;  %v2517_v61 = vpop.xlane.xlu0 %2516  ;;  %2870 = vadd.xlane.f32.xlu1 %v2869_v33  ;;  %v2866_v2 = vsel %vm824_vm1, %v9507_v35, 0.0 }
 0x4d5   :  { %7902 = vpow2.f32 %v2703_v15  ;;  %v2583_v45 = vsub.f32 %v9230_v24, %v2517_v61 }
 0x4d6   :  { %v9510_v62 = vpop.eup %7890  ;;  %7904 = vpow2.f32 %v2705_v36 }
 0x4d7   :  { %v2709_v54 = vmul.f32 1.442695, %v2583_v45  ;;  %v2872_v43 = vsel %vm824_vm1, %v9510_v62, 0.0  ;;  %v9514_v27 = vpop.eup %7892 }
 0x4d8   :  { %10809 = vst [vmem:[#allocation53_spill] sm:$0xff] %v9514_v27  ;;  %v2520_v58 = vpop.xlane.xlu1 %2519  ;;  %2873 = vadd.xlane.f32.xlu0 %v2872_v43  ;;  %2867 = vadd.xlane.f32.xlu1 %v2866_v2  ;;  %v2875_v36 = vsel %vm824_vm1, %v9514_v27, 0.0 }
 0x4d9   :  { %v2584_v40 = vsub.f32 %v9236_v47, %v2520_v58  ;;  %7906 = vpow2.f32 %v2709_v54 }
 0x4da   :  { %v9519_v15 = vpop.eup %7894 }
 0x4db   :  { %v2711_v24 = vmul.f32 1.442695, %v2584_v40  ;;  %v2881_v55 = vsel %vm824_vm1, %v9519_v15, 0.0  ;;  %v9525_v33 = vpop.eup %7896 }
 0x4dc   :  { %2876 = vadd.xlane.f32.xlu0 %v2875_v36  ;;  %10810 = vst [vmem:[#allocation55_spill] sm:$0xff] %v9525_v33  ;;  %2882 = vadd.xlane.f32.xlu1 %v2881_v55  ;;  %v2878_v54 = vsel %vm824_vm1, %v9525_v33, 0.0 }
 0x4dd   :  { %7908 = vpow2.f32 %v2711_v24 }
 0x4de   :  { %v9527_v61 = vpop.eup %7898 }
 0x4df   :  { %v2884_v47 = vsel %vm824_vm1, %v9527_v61, 0.0  ;;  %v9531_v45 = vpop.eup %7900 }
 0x4e0   :  { %10811 = vst [vmem:[#allocation58_spill] sm:$0xff] %v9531_v45  ;;  %2885 = vadd.xlane.f32.xlu0 %v2884_v47  ;;  %2879 = vadd.xlane.f32.xlu1 %v2878_v54  ;;  %v2887_v2 = vsel %vm824_vm1, %v9531_v45, 0.0 }
 0x4e2   :  { %v9535_v43 = vpop.eup %7902 }
 0x4e3   :  { %10812 = vst [vmem:[#allocation54_spill] sm:$0xff] %v9535_v43  ;;  %v2890_v58 = vsel %vm824_vm1, %v9535_v43, 0.0  ;;  %v9541_v40 = vpop.eup %7904 }
 0x4e4   :  { %10813 = vst [vmem:[#allocation57_spill] sm:$0xff] %v9541_v40  ;;  %2888 = vadd.xlane.f32.xlu0 %v2887_v2  ;;  %2891 = vadd.xlane.f32.xlu1 %v2890_v58  ;;  %v2893_v36 = vsel %vm824_vm1, %v9541_v40, 0.0 }
 0x4e5   :  { %v2739_v24 = vpop.xlane.xlu0 %2738 }
 0x4e6   :  { %v9545_v55 = vpop.eup %7906  ;;  %7910 = vrcp.f32 %v2739_v24  ;;  %v10815_v24 = vld [vmem:[#allocation28_spill] sm:$0xff] }
 0x4e7   :  { %10814 = vst [vmem:[#allocation59_spill] sm:$0xff] %v9545_v55  ;;  %v2899_v54 = vsel %vm824_vm1, %v9545_v55, 0.0 }
 0x4e8   :  { %2894 = vadd.xlane.f32.xlu0 %v2893_v36 }
 0x4e9   :  { %v2742_v47 = vpop.xlane.xlu1 %2741 }
 0x4ea   :  { %7912 = vrcp.f32 %v2742_v47  ;;  %v9549_v43 = vpop.eup %7908 }
 0x4eb   :  { %v2902_v58 = vsel %vm824_vm1, %v9549_v43, 0.0 }
 0x4ec   :  { %2900 = vadd.xlane.f32.xlu0 %v2899_v54 }
 0x4ed   :  { %v2745_v45 = vpop.xlane.xlu0 %2744 }
 0x4ee   :  { %7914 = vrcp.f32 %v2745_v45 }
 0x4f0   :  { %2903 = vadd.xlane.f32.xlu0 %v2902_v58  ;;  %v10816_v58 = vld [vmem:[#allocation34_spill] sm:$0xff] }
 0x4f1   :  { %v2748_v2 = vpop.xlane.xlu1 %2747 }
 0x4f2   :  { %7916 = vrcp.f32 %v2748_v2 }
 0x4f3   :  { %v7911_v40 = vpop.eup %7910 }
 0x4f4   :  { %v2977_v47 = vmul.f32 %v7911_v40, %v9253_v59 }
 0x4f5   :  { %v2751_v33 = vpop.xlane.xlu0 %2750  ;;  %814 = vrot.lane.b32.xlu1 %v10815_v24, %s8378_s27 }
 0x4f6   :  { %7918 = vrcp.f32 %v2751_v33 }
 0x4f7   :  { %v7913_v36 = vpop.eup %7912 }
 0x4f8   :  { %v2978_v55 = vmul.f32 %v7913_v36, %v9258_v29  ;;  %v10817_v29 = vld [vmem:[#allocation65_spill] sm:$0xff] }
 0x4f9   :  { %v2754_v54 = vpop.xlane.xlu1 %2753  ;;  %v2582_v40 = vsub.f32 %v10817_v29, %v9503_v56 }
 0x4fa   :  { %7920 = vrcp.f32 %v2754_v54  ;;  %v3037_v27 = vpack.c.bf16 %v2978_v55, %v2977_v47  ;;  %v10818_v47 = vld [vmem:[#allocation30_spill] sm:$0xff] }
 0x4fb   :  { %v7915_v45 = vpop.eup %7914  ;;  %v2707_v36 = vmul.f32 1.442695, %v2582_v40 }
 0x4fc   :  { %7396 = vmatmul.mubr.msk.bf16.vlgmr.msra.gmra.mxu0 %vm824_vm1, %v3037_v27  ;;  %v2979_v33 = vmul.f32 %v7915_v45, %v9262_v9 }
 0x4fd   :  { %7406 = vmatpush3.bf16.msra.mxu0 %v10816_v58  ;;  %7407 = vmatprep.mubr.msk.bf16.mxu0 %vm8382_vm0, %v10794_v25 }
 0x4fe   :  { %7417 = vmatprep.subr.bf16.mxu0 %v10794_v25 }
 0x4ff   :  { %v7917_v2 = vpop.eup %7916 }
 0x500   :  { %v2980_v59 = vmul.f32 %v7917_v2, %v9267_v19 }
 0x501   :  { %v2757_v24 = vpop.xlane.xlu0 %2756 }
 0x502   :  { %v3038_v55 = vpack.c.bf16 %v2980_v59, %v2979_v33  ;;  %7922 = vrcp.f32 %v2757_v24  ;;  %v10819_v59 = vld [vmem:[#allocation35_spill] sm:$0xff] }
 0x503   :  { %v7919_v27 = vpop.eup %7918 }
 0x504   :  { %7402 = vmatmul.mubr.msk.bf16.vlgmr.msra.gmra.mxu1 %vm824_vm1, %v3038_v55  ;;  %v2981_v56 = vmul.f32 %v7919_v27, %v9273_v44 }
 0x505   :  { %7412 = vmatpush3.bf16.msra.mxu1 %v10818_v47  ;;  %v2760_v54 = vpop.xlane.xlu1 %2759  ;;  %7413 = vmatprep.mubr.msk.bf16.mxu1 %vm8382_vm0, %v10794_v25 }
 0x506   :  { %7924 = vrcp.f32 %v2760_v54  ;;  %v2763_v9 = vpop.xlane.xlu0 %2762  ;;  %816 = vrot.lane.b32.xlu0 %v8712_v51, %s8378_s27  ;;  %7423 = vmatprep.subr.bf16.mxu1 %v10794_v25 }
 0x507   :  { %v7921_v19 = vpop.eup %7920  ;;  %7926 = vrcp.f32 %v2763_v9 }
 0x508   :  { %v2982_v45 = vmul.f32 %v7921_v19, %v9279_v16  ;;  %7928 = vpow2.f32 %v2707_v36 }
 0x509   :  { %v2766_v58 = vpop.xlane.xlu1 %2765 }
 0x50a   :  { %7930 = vrcp.f32 %v2766_v58  ;;  %v2769_v2 = vpop.xlane.xlu0 %2768  ;;  %v3039_v33 = vpack.c.bf16 %v2982_v45, %v2981_v56 }
 0x50b   :  { %7932 = vrcp.f32 %v2769_v2  ;;  %v10820_v2 = vld [vmem:[#allocation31_spill] sm:$0xff] }
 0x50c   :  { %7408 = vmatmul.mubr.msk.bf16.vlgmr.msra.gmra.mxu0 %vm824_vm1, %v3039_v33 }
 0x50d   :  { %7418 = vmatpush3.bf16.msra.mxu0 %v10819_v59  ;;  %v2772_v29 = vpop.xlane.xlu1 %2771  ;;  %7419 = vmatprep.mubr.msk.bf16.mxu0 %vm8382_vm0, %v10794_v25 }
 0x50e   :  { %7934 = vrcp.f32 %v2772_v29  ;;  %v2775_v51 = vpop.xlane.xlu0 %2774  ;;  %7429 = vmatprep.subr.bf16.mxu0 %v10794_v25 }
 0x50f   :  { %7936 = vrcp.f32 %v2775_v51  ;;  %v7923_v44 = vpop.eup %7922 }
 0x510   :  { %v2983_v24 = vmul.f32 %v7923_v44, %v9287_v53  ;;  %v10821_v44 = vld [vmem:[#allocation37_spill] sm:$0xff] }
 0x511   :  { %v2778_v16 = vpop.xlane.xlu1 %2777 }
 0x512   :  { %7938 = vrcp.f32 %v2778_v16  ;;  %v2781_v36 = vpop.xlane.xlu0 %2780 }
 0x513   :  { %v7925_v40 = vpop.eup %7924 }
 0x514   :  { %v2984_v55 = vmul.f32 %v7925_v40, %v9293_v39  ;;  %v7927_v27 = vpop.eup %7926 }
 0x515   :  { %v9582_v47 = vpop.eup %7928  ;;  %v2787_v54 = vpop.xlane.xlu1 %2786  ;;  %v2985_v56 = vmul.f32 %v7927_v27, %v9295_v26 }
 0x516   :  { %v3040_v9 = vpack.c.bf16 %v2984_v55, %v2983_v24  ;;  %7940 = vrcp.f32 %v2787_v54  ;;  %v2896_v53 = vsel %vm824_vm1, %v9582_v47, 0.0 }
 0x517   :  { %v7931_v19 = vpop.eup %7930  ;;  %7942 = vrcp.f32 %v2781_v36 }
 0x518   :  { %7414 = vmatmul.mubr.msk.bf16.vlgmr.msra.gmra.mxu1 %vm824_vm1, %v3040_v9  ;;  %v2986_v45 = vmul.f32 %v7931_v19, %v9302_v23  ;;  %v7933_v58 = vpop.eup %7932  ;;  %v10823_v9 = vld [vmem:[#allocation39_spill] sm:$0xff] }
 0x519   :  { %7424 = vmatpush3.bf16.msra.mxu1 %v10820_v2  ;;  %v2790_v39 = vpop.xlane.xlu0 %2789  ;;  %7425 = vmatprep.mubr.msk.bf16.mxu1 %vm8382_vm0, %v10794_v25  ;;  %v2784_v33 = vpop.xlane.xlu1 %2783  ;;  %v2987_v23 = vmul.f32 %v7933_v58, %v9304_v17  ;;  %v10822_v17 = vld [vmem:[#allocation32_spill] sm:$0xff] }
 0x51a   :  { %2897 = vadd.xlane.f32.xlu1 %v2896_v53  ;;  %7944 = vrcp.f32 %v2790_v39  ;;  %v3041_v59 = vpack.c.bf16 %v2986_v45, %v2985_v56  ;;  %7435 = vmatprep.subr.bf16.mxu1 %v10794_v25 }
 0x51b   :  { %v7935_v26 = vpop.eup %7934  ;;  %7946 = vrcp.f32 %v2784_v33 }
 0x51c   :  { %7420 = vmatmul.mubr.msk.bf16.vlgmr.msra.gmra.mxu0 %vm824_vm1, %v3041_v59  ;;  %v2988_v29 = vmul.f32 %v7935_v26, %v9311_v41  ;;  %v7937_v51 = vpop.eup %7936 }
 0x51d   :  { %7430 = vmatpush3.bf16.msra.mxu0 %v10821_v44  ;;  %7431 = vmatprep.mubr.msk.bf16.mxu0 %vm8382_vm0, %v10794_v25  ;;  %v2989_v24 = vmul.f32 %v7937_v51, %v9313_v60  ;;  %v2793_v27 = vpop.xlane.xlu0 %2792 }
 0x51e   :  { %v3042_v16 = vpack.c.bf16 %v2988_v29, %v2987_v23  ;;  %7441 = vmatprep.subr.bf16.mxu0 %v10794_v25  ;;  %v10824_v23 = vld [vmem:[#allocation41_spill] sm:$0xff] }
 0x51f   :  { %v7939_v40 = vpop.eup %7938  ;;  %v10825_v29 = vld [vmem:[#allocation33_spill] sm:$0xff] }
 0x520   :  { %7426 = vmatmul.mubr.msk.bf16.vlgmr.msra.gmra.mxu1 %vm824_vm1, %v3042_v16  ;;  %v2990_v55 = vmul.f32 %v7939_v40, %v9321_v37 }
 0x521   :  { %7436 = vmatpush3.bf16.msra.mxu1 %v10822_v17  ;;  %7437 = vmatprep.mubr.msk.bf16.mxu1 %vm8382_vm0, %v10794_v25  ;;  %v2799_v41 = vpop.xlane.xlu1 %2798 }
 0x522   :  { %v3043_v36 = vpack.c.bf16 %v2990_v55, %v2989_v24  ;;  %7447 = vmatprep.subr.bf16.mxu1 %v10794_v25  ;;  %7948 = vrcp.f32 %v2799_v41 }
 0x523   :  { %v7941_v54 = vpop.eup %7940  ;;  %7950 = vrcp.f32 %v2793_v27 }
 0x524   :  { %7432 = vmatmul.mubr.msk.bf16.vlgmr.msra.gmra.mxu0 %vm824_vm1, %v3043_v36  ;;  %v7943_v37 = vpop.eup %7942  ;;  %v2993_v58 = vmul.f32 %v7941_v54, %v9330_v49  ;;  %v10826_v36 = vld [vmem:[#allocation43_spill] sm:$0xff]  ;;  %v10827_v54 = vld [vmem:[#allocation36_spill] sm:$0xff] }
 0x525   :  { %7442 = vmatpush3.bf16.msra.mxu0 %v10823_v9  ;;  %v2802_v60 = vpop.xlane.xlu0 %2801  ;;  %7443 = vmatprep.mubr.msk.bf16.mxu0 %vm8382_vm0, %v10794_v25  ;;  %v2796_v19 = vpop.xlane.xlu1 %2795  ;;  %v2991_v53 = vmul.f32 %v7943_v37, %v9323_v34 }
 0x526   :  { %7952 = vrcp.f32 %v2802_v60  ;;  %7453 = vmatprep.subr.bf16.mxu0 %v10794_v25 }
 0x527   :  { %v7945_v56 = vpop.eup %7944  ;;  %7954 = vrcp.f32 %v2796_v19 }
 0x528   :  { %v7947_v45 = vpop.eup %7946  ;;  %v2994_v2 = vmul.f32 %v7945_v56, %v9337_v20 }
 0x529   :  { %v2992_v39 = vmul.f32 %v7947_v45, %v9332_v28  ;;  %v2805_v26 = vpop.xlane.xlu0 %2804 }
 0x52a   :  { %v3045_v33 = vpack.c.bf16 %v2994_v2, %v2993_v58 }
 0x52b   :  { %818 = vrot.lane.b32.xlu1 %v8700_v46, %s8378_s27  ;;  %v3044_v59 = vpack.c.bf16 %v2992_v39, %v2991_v53 }
 0x52c   :  { %7444 = vmatmul.mubr.msk.bf16.vlgmr.msra.gmra.mxu0 %vm824_vm1, %v3045_v33  ;;  %v10828_v33 = vld [vmem:[#allocation45_spill] sm:$0xff] }
 0x52d   :  { %7438 = vmatmul.mubr.msk.bf16.vlgmr.msra.gmra.mxu1 %vm824_vm1, %v3044_v59  ;;  %7454 = vmatpush3.bf16.msra.mxu0 %v10824_v23  ;;  %v2811_v49 = vpop.xlane.xlu1 %2810  ;;  %v10829_v59 = vld [vmem:[#allocation38_spill] sm:$0xff] }
 0x52e   :  { %7448 = vmatpush3.bf16.msra.mxu1 %v10825_v29  ;;  %7449 = vmatprep.mubr.msk.bf16.mxu1 %vm8382_vm0, %v10794_v25  ;;  %7956 = vrcp.f32 %v2811_v49 }
 0x52f   :  { %7455 = vmatprep.mubr.msk.bf16.mxu0 %vm8382_vm0, %v10794_v25  ;;  %7459 = vmatprep.subr.bf16.mxu1 %v10794_v25  ;;  %v7949_v46 = vpop.eup %7948  ;;  %7958 = vrcp.f32 %v2805_v26 }
 0x530   :  { %7465 = vmatprep.subr.bf16.mxu0 %v10794_v25  ;;  %v7951_v28 = vpop.eup %7950  ;;  %v2997_v16 = vmul.f32 %v7949_v46, %v9357_v7 }
 0x531   :  { %v2814_v34 = vpop.xlane.xlu0 %2813  ;;  %v2808_v20 = vpop.xlane.xlu1 %2807  ;;  %v2995_v24 = vmul.f32 %v7951_v28, %v9347_v52 }
 0x532   :  { %7960 = vrcp.f32 %v2814_v34 }
 0x533   :  { %v7953_v51 = vpop.eup %7952  ;;  %7962 = vrcp.f32 %v2808_v20 }
 0x534   :  { %v7955_v44 = vpop.eup %7954  ;;  %v2998_v40 = vmul.f32 %v7953_v51, %v9364_v3 }
 0x535   :  { %v2996_v55 = vmul.f32 %v7955_v44, %v9359_v42  ;;  %v2817_v41 = vpop.xlane.xlu0 %2816 }
 0x536   :  { %v3047_v27 = vpack.c.bf16 %v2998_v40, %v2997_v16  ;;  %v10830_v40 = vld [vmem:[#allocation47_spill] sm:$0xff] }
 0x537   :  { %v3046_v17 = vpack.c.bf16 %v2996_v55, %v2995_v24 }
 0x538   :  { %7456 = vmatmul.mubr.msk.bf16.vlgmr.msra.gmra.mxu0 %vm824_vm1, %v3047_v27 }
 0x539   :  { %7450 = vmatmul.mubr.msk.bf16.vlgmr.msra.gmra.mxu1 %vm824_vm1, %v3046_v17  ;;  %7466 = vmatpush3.bf16.msra.mxu0 %v10826_v36  ;;  %v2823_v9 = vpop.xlane.xlu1 %2822 }
 0x53a   :  { %7460 = vmatpush3.bf16.msra.mxu1 %v10827_v54  ;;  %7461 = vmatprep.mubr.msk.bf16.mxu1 %vm8382_vm0, %v10794_v25  ;;  %7964 = vrcp.f32 %v2823_v9 }
 0x53b   :  { %7467 = vmatprep.mubr.msk.bf16.mxu0 %vm8382_vm0, %v10794_v25  ;;  %7471 = vmatprep.subr.bf16.mxu1 %v10794_v25  ;;  %v7957_v52 = vpop.eup %7956  ;;  %7966 = vrcp.f32 %v2817_v41 }
 0x53c   :  { %7477 = vmatprep.subr.bf16.mxu0 %v10794_v25  ;;  %v7959_v42 = vpop.eup %7958  ;;  %v3001_v19 = vmul.f32 %v7957_v52, %v9384_v5 }
 0x53d   :  { %v2826_v7 = vpop.xlane.xlu0 %2825  ;;  %v2820_v3 = vpop.xlane.xlu1 %2819  ;;  %v2999_v45 = vmul.f32 %v7959_v42, %v9374_v38 }
 0x53e   :  { %7968 = vrcp.f32 %v2826_v7 }
 0x53f   :  { %v7961_v60 = vpop.eup %7960  ;;  %7970 = vrcp.f32 %v2820_v3 }
 0x540   :  { %v7963_v37 = vpop.eup %7962  ;;  %v3002_v56 = vmul.f32 %v7961_v60, %v9391_v21 }
 0x541   :  { %v3000_v58 = vmul.f32 %v7963_v37, %v9386_v30  ;;  %v2829_v39 = vpop.xlane.xlu0 %2828 }
 0x542   :  { %v3049_v2 = vpack.c.bf16 %v3002_v56, %v3001_v19 }
 0x543   :  { %v3048_v53 = vpack.c.bf16 %v3000_v58, %v2999_v45 }
 0x544   :  { %7468 = vmatmul.mubr.msk.bf16.vlgmr.msra.gmra.mxu0 %vm824_vm1, %v3049_v2 }
 0x545   :  { %7462 = vmatmul.mubr.msk.bf16.vlgmr.msra.gmra.mxu1 %vm824_vm1, %v3048_v53  ;;  %7478 = vmatpush3.bf16.msra.mxu0 %v10828_v33  ;;  %v2835_v26 = vpop.xlane.xlu1 %2834  ;;  %v10833_v53 = vld [vmem:[#allocation42_spill] sm:$0xff] }
 0x546   :  { %7472 = vmatpush3.bf16.msra.mxu1 %v10829_v59  ;;  %7473 = vmatprep.mubr.msk.bf16.mxu1 %vm8382_vm0, %v10794_v25  ;;  %7972 = vrcp.f32 %v2835_v26 }
 0x547   :  { %7479 = vmatprep.mubr.msk.bf16.mxu0 %vm8382_vm0, %v10794_v25  ;;  %7483 = vmatprep.subr.bf16.mxu1 %v10794_v25  ;;  %v7965_v38 = vpop.eup %7964  ;;  %7974 = vrcp.f32 %v2829_v39 }
 0x548   :  { %7489 = vmatprep.subr.bf16.mxu0 %v10794_v25  ;;  %v7967_v30 = vpop.eup %7966  ;;  %v3005_v49 = vmul.f32 %v7965_v38, %v9412_v13  ;;  %v10831_v13 = vld [vmem:[#allocation40_spill] sm:$0xff] }
 0x549   :  { %v2838_v5 = vpop.xlane.xlu0 %2837  ;;  %v2832_v21 = vpop.xlane.xlu1 %2831  ;;  %v3003_v28 = vmul.f32 %v7967_v30, %v9401_v57 }
 0x54a   :  { %7976 = vrcp.f32 %v2838_v5 }
 0x54b   :  { %v7969_v23 = vpop.eup %7968  ;;  %7978 = vrcp.f32 %v2832_v21 }
 0x54c   :  { %v7971_v29 = vpop.eup %7970  ;;  %v3006_v46 = vmul.f32 %v7969_v23, %v9420_v32 }
 0x54d   :  { %v2841_v34 = vpop.xlane.xlu0 %2840  ;;  %v3004_v20 = vmul.f32 %v7971_v29, %v9414_v48  ;;  %v2847_v51 = vpop.xlane.xlu1 %2846 }
 0x54e   :  { %v3051_v44 = vpack.c.bf16 %v3006_v46, %v3005_v49  ;;  %7980 = vrcp.f32 %v2847_v51 }
 0x54f   :  { %v3050_v16 = vpack.c.bf16 %v3004_v20, %v3003_v28  ;;  %7982 = vrcp.f32 %v2841_v34 }
 0x550   :  { %7480 = vmatmul.mubr.msk.bf16.vlgmr.msra.gmra.mxu0 %vm824_vm1, %v3051_v44  ;;  %v10835_v44 = vld [vmem:[#allocation44_spill] sm:$0xff] }
 0x551   :  { %7474 = vmatmul.mubr.msk.bf16.vlgmr.msra.gmra.mxu1 %vm824_vm1, %v3050_v16  ;;  %7490 = vmatpush3.bf16.msra.mxu0 %v10830_v40  ;;  %v2850_v24 = vpop.xlane.xlu0 %2849  ;;  %v2844_v32 = vpop.xlane.xlu1 %2843 }
 0x552   :  { %7484 = vmatpush3.bf16.msra.mxu1 %v10831_v13  ;;  %7984 = vrcp.f32 %v2850_v24  ;;  %7485 = vmatprep.mubr.msk.bf16.mxu1 %vm8382_vm0, %v10794_v25 }
 0x553   :  { %7986 = vrcp.f32 %v2844_v32  ;;  %7491 = vmatprep.mubr.msk.bf16.mxu0 %vm8382_vm0, %v10794_v25  ;;  %7495 = vmatprep.subr.bf16.mxu1 %v10794_v25  ;;  %v7973_v48 = vpop.eup %7972 }
 0x554   :  { %v3102_v57 = vpop.f32.mrf.mxu0  ;;  %7501 = vmatprep.subr.bf16.mxu0 %v10794_v25  ;;  %v7975_v17 = vpop.eup %7974  ;;  %v3009_v52 = vmul.f32 %v7973_v48, %v9441_v63 }
 0x555   :  { %v6857_v55 = vpack.c.bf16 %v3102_v57, %v3102_v57  ;;  %v2853_v27 = vpop.xlane.xlu0 %2852  ;;  %v2859_v36 = vpop.xlane.xlu1 %2858  ;;  %v3007_v3 = vmul.f32 %v7975_v17, %v9430_v10 }
 0x556   :  { %v7373_v41 = vpop.f32.mrf.mxu0  ;;  %7988 = vrcp.f32 %v2859_v36 }
 0x557   :  { %v7977_v54 = vpop.eup %7976  ;;  %4534 = vst.msk [vmem:[#allocation2] sm:$0xf] %vm4533_vm2, %v6857_v55  ;;  %7990 = vrcp.f32 %v2853_v27 }
 0x558   :  { %v7979_v9 = vpop.eup %7978  ;;  %v3010_v7 = vmul.f32 %v7977_v54, %v9449_v22  ;;  %v3105_v42 = vpop.f32.mrf.mxu0  ;;  %v10832_v22 = vld [vmem:[#allocation49_spill] sm:$0xff] }
 0x559   :  { %v3008_v60 = vmul.f32 %v7979_v9, %v9445_v14  ;;  %v6858_v37 = vpack.c.bf16 %v3105_v42, %v3105_v42  ;;  %v2862_v19 = vpop.xlane.xlu0 %2861  ;;  %v2856_v45 = vpop.xlane.xlu1 %2855 }
 0x55a   :  { %v7374_v56 = vpop.f32.mrf.mxu0  ;;  %7992 = vrcp.f32 %v2862_v19  ;;  %v3053_v58 = vpack.c.bf16 %v3010_v7, %v3009_v52  ;;  %v10837_v7 = vld [vmem:[#allocation48_spill] sm:$0xff] }
 0x55b   :  { %4535 = vst.msk [vmem:[#allocation2 + $0x4] sm:$0xf] %vm4533_vm2, %v6858_v37  ;;  %7994 = vrcp.f32 %v2856_v45  ;;  %v3052_v2 = vpack.c.bf16 %v3008_v60, %v3007_v3  ;;  %v7981_v63 = vpop.eup %7980 }
 0x55c   :  { %7492 = vmatmul.mubr.msk.bf16.vlgmr.msra.gmra.mxu0 %vm824_vm1, %v3053_v58  ;;  %v7983_v14 = vpop.eup %7982  ;;  %v3013_v26 = vmul.f32 %v7981_v63, %v9459_v1 }
 0x55d   :  { %7486 = vmatmul.mubr.msk.bf16.vlgmr.msra.gmra.mxu1 %vm824_vm1, %v3052_v2  ;;  %7502 = vmatpush3.bf16.msra.mxu0 %v10832_v22  ;;  %v2865_v10 = vpop.xlane.xlu0 %2864  ;;  %v2871_v39 = vpop.xlane.xlu1 %2870  ;;  %v3011_v30 = vmul.f32 %v7983_v14, %v9453_v11  ;;  %v10834_v11 = vld [vmem:[#allocation46_spill] sm:$0xff] }
 0x55e   :  { %7496 = vmatpush3.bf16.msra.mxu1 %v10833_v53  ;;  %7497 = vmatprep.mubr.msk.bf16.mxu1 %vm8382_vm0, %v10794_v25  ;;  %7996 = vrcp.f32 %v2871_v39 }
 0x55f   :  { %v7985_v33 = vpop.eup %7984  ;;  %7503 = vmatprep.mubr.msk.bf16.mxu0 %vm8382_vm0, %v10794_v25  ;;  %7507 = vmatprep.subr.bf16.mxu1 %v10794_v25  ;;  %7998 = vrcp.f32 %v2865_v10 }
 0x560   :  { %v7987_v59 = vpop.eup %7986  ;;  %v3014_v38 = vmul.f32 %v7985_v33, %v9469_v12  ;;  %v3146_v5 = vpop.f32.mrf.mxu1  ;;  %7513 = vmatprep.subr.bf16.mxu0 %v10794_v25  ;;  %v10839_v33 = vld [vmem:[#allocation50_spill] sm:$0xff] }
 0x561   :  { %v3012_v21 = vmul.f32 %v7987_v59, %v9465_v0  ;;  %v6859_v23 = vpack.c.bf16 %v3146_v5, %v3146_v5  ;;  %v2874_v29 = vpop.xlane.xlu0 %2873  ;;  %v2868_v46 = vpop.xlane.xlu1 %2867  ;;  %v10840_v5 = vld [vmem:[#allocation53_spill] sm:$0xff] }
 0x562   :  { %v7379_v49 = vpop.f32.mrf.mxu1  ;;  %8000 = vrcp.f32 %v2874_v29  ;;  %v3055_v34 = vpack.c.bf16 %v3014_v38, %v3013_v26 }
 0x563   :  { %4536 = vst.msk [vmem:[#allocation2 + $0x8] sm:$0xf] %vm4533_vm2, %v6859_v23  ;;  %8002 = vrcp.f32 %v2868_v46  ;;  %v3054_v1 = vpack.c.bf16 %v3012_v21, %v3011_v30  ;;  %v7989_v28 = vpop.eup %7988  ;;  %v10841_v21 = vld [vmem:[#allocation55_spill] sm:$0xff] }
 0x564   :  { %v3149_v12 = vpop.f32.mrf.mxu1  ;;  %7504 = vmatmul.mubr.msk.bf16.vlgmr.msra.gmra.mxu0 %vm824_vm1, %v3055_v34  ;;  %v7991_v51 = vpop.eup %7990  ;;  %v3017_v32 = vmul.f32 %v7989_v28, %v9479_v31 }
 0x565   :  { %v6860_v20 = vpack.c.bf16 %v3149_v12, %v3149_v12  ;;  %7498 = vmatmul.mubr.msk.bf16.vlgmr.msra.gmra.mxu1 %vm824_vm1, %v3054_v1  ;;  %7514 = vmatpush3.bf16.msra.mxu0 %v10834_v11  ;;  %v2877_v0 = vpop.xlane.xlu0 %2876  ;;  %v2883_v40 = vpop.xlane.xlu1 %2882  ;;  %v3015_v48 = vmul.f32 %v7991_v51, %v9473_v8  ;;  %v10842_v51 = vld [vmem:[#allocation54_spill] sm:$0xff] }
 0x566   :  { %7508 = vmatpush3.bf16.msra.mxu1 %v10835_v44  ;;  %v7380_v16 = vpop.f32.mrf.mxu1  ;;  %7509 = vmatprep.mubr.msk.bf16.mxu1 %vm8382_vm0, %v10794_v25  ;;  %8004 = vrcp.f32 %v2883_v40 }
 0x567   :  { %v7993_v24 = vpop.eup %7992  ;;  %4537 = vst.msk [vmem:[#allocation2 + $0xc] sm:$0xf] %vm4533_vm2, %v6860_v20  ;;  %7515 = vmatprep.mubr.msk.bf16.mxu0 %vm8382_vm0, %v10794_v25  ;;  %7519 = vmatprep.subr.bf16.mxu1 %v10794_v25  ;;  %8006 = vrcp.f32 %v2877_v0  ;;  %v10843_v16 = vld [vmem:[#allocation58_spill] sm:$0xff] }
 0x568   :  { %v7995_v13 = vpop.eup %7994  ;;  %v3018_v57 = vmul.f32 %v7993_v24, %v9489_v6  ;;  %7525 = vmatprep.subr.bf16.mxu0 %v10794_v25  ;;  %v10836_v6 = vld [vmem:[#allocation51_spill] sm:$0xff] }
 0x569   :  { %v3016_v55 = vmul.f32 %v7995_v13, %v9485_v50  ;;  %v2886_v27 = vpop.xlane.xlu0 %2885  ;;  %v2880_v17 = vpop.xlane.xlu1 %2879 }
 0x56a   :  { %8008 = vrcp.f32 %v2886_v27  ;;  %v3057_v41 = vpack.c.bf16 %v3018_v57, %v3017_v32 }
 0x56b   :  { %8010 = vrcp.f32 %v2880_v17  ;;  %v3056_v36 = vpack.c.bf16 %v3016_v55, %v3015_v48  ;;  %v7997_v31 = vpop.eup %7996  ;;  %v10844_v55 = vld [vmem:[#allocation59_spill] sm:$0xff] }
 0x56c   :  { %v3190_v54 = vpop.f32.mrf.mxu0  ;;  %7516 = vmatmul.mubr.msk.bf16.vlgmr.msra.gmra.mxu0 %vm824_vm1, %v3057_v41  ;;  %v7999_v8 = vpop.eup %7998  ;;  %v3021_v37 = vmul.f32 %v7997_v31, %v9499_v18  ;;  %v10838_v18 = vld [vmem:[#allocation52_spill] sm:$0xff]  ;;  %v10846_v31 = vld [vmem:[#allocation57_spill] sm:$0xff] }
 0x56d   :  { %v6861_v9 = vpack.c.bf16 %v3190_v54, %v3190_v54  ;;  %7510 = vmatmul.mubr.msk.bf16.vlgmr.msra.gmra.mxu1 %vm824_vm1, %v3056_v36  ;;  %7526 = vmatpush3.bf16.msra.mxu0 %v10836_v6  ;;  %v2889_v52 = vpop.xlane.xlu0 %2888  ;;  %v2892_v42 = vpop.xlane.xlu1 %2891  ;;  %v3019_v45 = vmul.f32 %v7999_v8, %v9493_v4  ;;  %v10845_v36 = vmov 0  }
 0x56e   :  { %7520 = vmatpush3.bf16.msra.mxu1 %v10837_v7  ;;  %v7385_v50 = vpop.f32.mrf.mxu0  ;;  %8012 = vrcp.f32 %v2889_v52  ;;  %7521 = vmatprep.mubr.msk.bf16.mxu1 %vm8382_vm0, %v10794_v25 }
 0x56f   :  { %v8001_v3 = vpop.eup %8000  ;;  %4538 = vst.msk [vmem:[#allocation2 + $0x10] sm:$0xf] %vm4533_vm2, %v6861_v9  ;;  %8014 = vrcp.f32 %v2892_v42  ;;  %7527 = vmatprep.mubr.msk.bf16.mxu0 %vm8382_vm0, %v10794_v25  ;;  %7531 = vmatprep.subr.bf16.mxu1 %v10794_v25 }
 0x570   :  { %v8003_v60 = vpop.eup %8002  ;;  %v3022_v19 = vmul.f32 %v8001_v3, %v9510_v62  ;;  %v3193_v56 = vpop.f32.mrf.mxu0  ;;  %7537 = vmatprep.subr.bf16.mxu0 %v10794_v25 }
 0x571   :  { %v3020_v58 = vmul.f32 %v8003_v60, %v9507_v35  ;;  %v6862_v2 = vpack.c.bf16 %v3193_v56, %v3193_v56  ;;  %v2895_v63 = vpop.xlane.xlu0 %2894 }
 0x572   :  { %v7386_v22 = vpop.f32.mrf.mxu0  ;;  %v3059_v10 = vpack.c.bf16 %v3022_v19, %v3021_v37 }
 0x573   :  { %4539 = vst.msk [vmem:[#allocation2 + $0x14] sm:$0xf] %vm4533_vm2, %v6862_v2  ;;  %v3058_v14 = vpack.c.bf16 %v3020_v58, %v3019_v45  ;;  %v8005_v53 = vpop.eup %8004 }
 0x574   :  { %7528 = vmatmul.mubr.msk.bf16.vlgmr.msra.gmra.mxu0 %vm824_vm1, %v3059_v10  ;;  %v8007_v39 = vpop.eup %8006  ;;  %v3025_v59 = vmul.f32 %v8005_v53, %v9519_v15  ;;  %v815_v15 = vpop.permute.xlu1 %814 }
 0x575   :  { %7522 = vmatmul.mubr.msk.bf16.vlgmr.msra.gmra.mxu1 %vm824_vm1, %v3058_v14  ;;  %7538 = vmatpush3.bf16.msra.mxu0 %v10838_v18  ;;  %v2901_v62 = vpop.xlane.xlu0 %2900  ;;  %v3023_v30 = vmul.f32 %v8007_v39, %v10840_v5 }
 0x576   :  { %7532 = vmatpush3.bf16.msra.mxu1 %v10839_v33  ;;  %7533 = vmatprep.mubr.msk.bf16.mxu1 %vm8382_vm0, %v10794_v25 }
 0x577   :  { %v8009_v4 = vpop.eup %8008  ;;  %7539 = vmatprep.mubr.msk.bf16.mxu0 %vm8382_vm0, %v10794_v25  ;;  %7543 = vmatprep.subr.bf16.mxu1 %v10794_v25 }
 0x578   :  { %v8011_v35 = vpop.eup %8010  ;;  %v3026_v26 = vmul.f32 %v8009_v4, %v9527_v61  ;;  %v3234_v38 = vpop.f32.mrf.mxu1  ;;  %7549 = vmatprep.subr.bf16.mxu0 %v10794_v25 }
 0x579   :  { %v3024_v23 = vmul.f32 %v8011_v35, %v10841_v21  ;;  %v6863_v29 = vpack.c.bf16 %v3234_v38, %v3234_v38  ;;  %v2904_v49 = vpop.xlane.xlu0 %2903 }
 0x57a   :  { %v7391_v46 = vpop.f32.mrf.mxu1  ;;  %v3061_v34 = vpack.c.bf16 %v3026_v26, %v3025_v59  ;;  %8016 = vrcp.f32 %v2904_v49 }
 0x57b   :  { %v8013_v1 = vpop.eup %8012  ;;  %v3060_v12 = vpack.c.bf16 %v3024_v23, %v3023_v30  ;;  %4540 = vst.msk [vmem:[#allocation2 + $0x18] sm:$0xf] %vm4533_vm2, %v6863_v29  ;;  %8018 = vrcp.f32 %v2901_v62 }
 0x57c   :  { %v8015_v28 = vpop.eup %8014  ;;  %v3237_v20 = vpop.f32.mrf.mxu1  ;;  %7540 = vmatmul.mubr.msk.bf16.vlgmr.msra.gmra.mxu0 %vm824_vm1, %v3061_v34  ;;  %v3027_v40 = vmul.f32 %v8013_v1, %v10843_v16  ;;  %8020 = vrcp.f32 %v2895_v63 }
 0x57d   :  { %v6864_v61 = vpack.c.bf16 %v3237_v20, %v3237_v20  ;;  %7534 = vmatmul.mubr.msk.bf16.vlgmr.msra.gmra.mxu1 %vm824_vm1, %v3060_v12  ;;  %v817_v11 = vpop.permute.xlu0 %816  ;;  %7551 = vmatprep.mubr.msk.bf16.mxu0 %vm8382_vm0, %v10794_v25  ;;  %v3028_v44 = vmul.f32 %v8015_v28, %v10842_v51 }
 0x57e   :  { %7544 = vmatpush3.bf16.msra.mxu1 %v815_v15  ;;  %v7392_v0 = vpop.f32.mrf.mxu1  ;;  %7550 = vmatpush3.bf16.msra.mxu0 %v817_v11 }
 0x57f   :  { %4541 = vst.msk [vmem:[#allocation2 + $0x1c] sm:$0xf] %vm4533_vm2, %v6864_v61  ;;  %7545 = vmatprep.mubr.msk.bf16.mxu1 %vm8382_vm0, %v10794_v25  ;;  %7555 = vmatprep.subr.bf16.mxu1 %v10794_v25  ;;  %v3062_v24 = vpack.c.bf16 %v3028_v44, %v3027_v40 }
 0x585   :  { %7546 = vmatmul.mubr.msk.bf16.vlgmr.msra.gmra.mxu1 %vm824_vm1, %v3062_v24 }
 0x586   :  { %7557 = vmatprep.mubr.msk.bf16.mxu1 %vm8382_vm0, %v10794_v25 }
 0x587   :  { %v8017_v13 = vpop.eup %8016 }
 0x588   :  { %v8019_v57 = vpop.eup %8018  ;;  %v3032_v48 = vmul.f32 %v8017_v13, %v9549_v43 }
 0x589   :  { %v3031_v27 = vmul.f32 %v8019_v57, %v10844_v55  ;;  %v8021_v54 = vpop.eup %8020 }
 0x58a   :  { %v3029_v9 = vmul.f32 %v8021_v54, %v10846_v31 }
 0x58b   :  { %v3064_v41 = vpack.c.bf16 %v3032_v48, %v3031_v27 }
 0x5a3   :  { %v2898_v32 = vpop.xlane.xlu1 %2897 }
 0x5a4   :  { %8022 = vrcp.f32 %v2898_v32 }
 0x5a7   :  { %v819_v17 = vpop.permute.xlu1 %818 }
 0x5a8   :  { %7556 = vmatpush3.bf16.msra.mxu1 %v819_v17 }
 0x5ab   :  { %7558 = vmatmul.mubr.msk.bf16.vlgmr.msra.gmra.mxu1 %vm824_vm1, %v3064_v41 }
 0x5ac   :  { %5457 = vmatprep.mubr.bf16.mxu1 %v10845_v36 }
 0x5b1   :  { %v8023_v25 = vpop.eup %8022 }
 0x5b2   :  { %v3030_v6 = vmul.f32 %v8023_v25, %v9582_v47 }
 0x5b4   :  { %v3063_v52 = vpack.c.bf16 %v3030_v6, %v3029_v9 }
 0x5b6   :  { %7552 = vmatmul.mubr.msk.bf16.vlgmr.msra.gmra.mxu0 %vm824_vm1, %v3063_v52 }
 0x5bc   :  { %v3278_v8 = vpop.f32.mrf.mxu0 }
 0x5bd   :  { %v6865_v43 = vpack.c.bf16 %v3278_v8, %v3278_v8 }
 0x5be   :  { %v7397_v7 = vpop.f32.mrf.mxu0 }
 0x5bf   :  { %4562 = vrot.lane.b32.xlu0 %v6865_v43, %s8378_s27 }
 0x5c0   :  { %v3281_v50 = vpop.f32.mrf.mxu0 }
 0x5c1   :  { %v6866_v42 = vpack.c.bf16 %v3281_v50, %v3281_v50 }
 0x5c2   :  { %v7398_v3 = vpop.f32.mrf.mxu0 }
 0x5c3   :  { %4564 = vrot.lane.b32.xlu1 %v6866_v42, %s8378_s27 }
 0x5c4   :  { %v3322_v60 = vpop.f32.mrf.mxu1 }
 0x5c5   :  { %v6867_v37 = vpack.c.bf16 %v3322_v60, %v3322_v60 }
 0x5c6   :  { %v7403_v19 = vpop.f32.mrf.mxu1 }
 0x5c7   :  { %4566 = vrot.lane.b32.xlu0 %v6867_v37, %s8378_s27 }
 0x5c8   :  { %v3325_v56 = vpop.f32.mrf.mxu1 }
 0x5c9   :  { %v6868_v47 = vpack.c.bf16 %v3325_v56, %v3325_v56 }
 0x5ca   :  { %v7404_v45 = vpop.f32.mrf.mxu1 }
 0x5cb   :  { %4568 = vrot.lane.b32.xlu1 %v6868_v47, %s8378_s27 }
 0x5cc   :  { %v3366_v58 = vpop.f32.mrf.mxu0 }
 0x5cd   :  { %v6869_v2 = vpack.c.bf16 %v3366_v58, %v3366_v58 }
 0x5ce   :  { %v7409_v63 = vpop.f32.mrf.mxu0 }
 0x5cf   :  { %4570 = vrot.lane.b32.xlu0 %v6869_v2, %s8378_s27 }
 0x5d0   :  { %v3369_v22 = vpop.f32.mrf.mxu0 }
 0x5d1   :  { %v6870_v10 = vpack.c.bf16 %v3369_v22, %v3369_v22 }
 0x5d2   :  { %v7410_v14 = vpop.f32.mrf.mxu0 }
 0x5d3   :  { %4572 = vrot.lane.b32.xlu1 %v6870_v10, %s8378_s27 }
 0x5d8   :  { %v3410_v53 = vpop.f32.mrf.mxu1 }
 0x5d9   :  { %v6871_v38 = vpack.c.bf16 %v3410_v53, %v3410_v53 }
 0x5da   :  { %v7415_v18 = vpop.f32.mrf.mxu1 }
 0x5dc   :  { %v3413_v62 = vpop.f32.mrf.mxu1  ;;  %v3454_v39 = vpop.f32.mrf.mxu0 }
 0x5dd   :  { %v6873_v33 = vpack.c.bf16 %v3454_v39, %v3454_v39  ;;  %v6872_v49 = vpack.c.bf16 %v3413_v62, %v3413_v62 }
 0x5de   :  { %v7416_v4 = vpop.f32.mrf.mxu1  ;;  %v7421_v35 = vpop.f32.mrf.mxu0 }
 0x5df   :  { %4615 = vrot.lane.b32.xlu0 %v6873_v33, %s8387_s16 }
 0x5e0   :  { %v3457_v59 = vpop.f32.mrf.mxu0  ;;  %v3498_v26 = vpop.f32.mrf.mxu1 }
 0x5e1   :  { %v6874_v5 = vpack.c.bf16 %v3457_v59, %v3457_v59  ;;  %v6875_v46 = vpack.c.bf16 %v3498_v26, %v3498_v26 }
 0x5e2   :  { %v7422_v30 = vpop.f32.mrf.mxu0  ;;  %v7427_v21 = vpop.f32.mrf.mxu1 }
 0x5e3   :  { %4574 = vrot.lane.b32.xlu0 %v6871_v38, %s8378_s27  ;;  %4617 = vrot.lane.b32.xlu1 %v6874_v5, %s8387_s16 }
 0x5e4   :  { %v3501_v23 = vpop.f32.mrf.mxu1  ;;  %v3542_v29 = vpop.f32.mrf.mxu0 }
 0x5e5   :  { %v6876_v28 = vpack.c.bf16 %v3501_v23, %v3501_v23  ;;  %v6877_v20 = vpack.c.bf16 %v3542_v29, %v3542_v29 }
 0x5e6   :  { %v7428_v34 = vpop.f32.mrf.mxu1  ;;  %v7433_v1 = vpop.f32.mrf.mxu0 }
 0x5e7   :  { %4576 = vrot.lane.b32.xlu1 %v6872_v49, %s8378_s27  ;;  %4619 = vrot.lane.b32.xlu0 %v6875_v46, %s8387_s16 }
 0x5e8   :  { %v3545_v12 = vpop.f32.mrf.mxu0 }
 0x5e9   :  { %v6878_v11 = vpack.c.bf16 %v3545_v12, %v3545_v12 }
 0x5ea   :  { %v7434_v15 = vpop.f32.mrf.mxu0 }
 0x5eb   :  { %4621 = vrot.lane.b32.xlu1 %v6876_v28, %s8387_s16  ;;  %4623 = vrot.lane.b32.xlu0 %v6877_v20, %s8387_s16 }
 0x5ec   :  { %v3630_v61 = vpop.f32.mrf.mxu0 }
 0x5ed   :  { %v3586_v0 = vpop.f32.mrf.mxu1  ;;  %v6881_v51 = vpack.c.bf16 %v3630_v61, %v3630_v61 }
 0x5ee   :  { %v7445_v44 = vpop.f32.mrf.mxu0  ;;  %v6879_v24 = vpack.c.bf16 %v3586_v0, %v3586_v0 }
 0x5ef   :  { %v7439_v16 = vpop.f32.mrf.mxu1  ;;  %4625 = vrot.lane.b32.xlu1 %v6878_v11, %s8387_s16  ;;  %4668 = vrot.lane.b32.xlu0 %v6881_v51, %s8386_s3  ;;  %v7660_v51 = vld [vmem:[#allocation11 + $0x38] sm:$0xff]  }
 0x5f0   :  { %v3633_v40 = vpop.f32.mrf.mxu0  ;;  %7561 = vmatprep.subr.bf16.mxu0 %v7660_v51 }
 0x5f1   :  { %v3589_v13 = vpop.f32.mrf.mxu1  ;;  %v6882_v32 = vpack.c.bf16 %v3633_v40, %v3633_v40  ;;  %7562 = vmatpush3.bf16.msra.mxu0 %v7660_v51 }
 0x5f2   :  { %v7446_v57 = vpop.f32.mrf.mxu0  ;;  %v6880_v55 = vpack.c.bf16 %v3589_v13, %v3589_v13 }
 0x5f3   :  { %v7440_v48 = vpop.f32.mrf.mxu1  ;;  %4627 = vrot.lane.b32.xlu0 %v6879_v24, %s8387_s16  ;;  %4670 = vrot.lane.b32.xlu1 %v6882_v32, %s8386_s3  ;;  %v7661_v57 = vld [vmem:[#allocation11 + $0x30] sm:$0xff]  }
 0x5f4   :  { %7563 = vmatprep.subr.bf16.mxu0 %v7661_v57 }
 0x5f5   :  { %7564 = vmatpush3.bf16.msra.mxu0 %v7661_v57 }
 0x5f7   :  { %4629 = vrot.lane.b32.xlu1 %v6880_v55, %s8387_s16 }
 0x5f8   :  { %v3718_v27 = vpop.f32.mrf.mxu0 }
 0x5f9   :  { %v3674_v17 = vpop.f32.mrf.mxu1  ;;  %v6885_v6 = vpack.c.bf16 %v3718_v27, %v3718_v27 }
 0x5fa   :  { %v6883_v41 = vpack.c.bf16 %v3674_v17, %v3674_v17  ;;  %v7457_v54 = vpop.f32.mrf.mxu0 }
 0x5fb   :  { %v7451_v25 = vpop.f32.mrf.mxu1 }
 0x5fc   :  { %4672 = vrot.lane.b32.xlu0 %v6883_v41, %s8386_s3  ;;  %v3721_v31 = vpop.f32.mrf.mxu0  ;;  %v7662_v25 = vld [vmem:[#allocation11 + $0x28] sm:$0xff]  }
 0x5fd   :  { %v3677_v9 = vpop.f32.mrf.mxu1  ;;  %v6886_v7 = vpack.c.bf16 %v3721_v31, %v3721_v31  ;;  %7565 = vmatprep.subr.bf16.mxu0 %v7662_v25 }
 0x5fe   :  { %v6884_v52 = vpack.c.bf16 %v3677_v9, %v3677_v9  ;;  %v7458_v8 = vpop.f32.mrf.mxu0  ;;  %7566 = vmatpush3.bf16.msra.mxu0 %v7662_v25 }
 0x5ff   :  { %v7452_v43 = vpop.f32.mrf.mxu1 }
 0x600   :  { %4674 = vrot.lane.b32.xlu1 %v6884_v52, %s8386_s3  ;;  %4676 = vrot.lane.b32.xlu0 %v6885_v6, %s8386_s3 }
 0x604   :  { %4678 = vrot.lane.b32.xlu1 %v6886_v7, %s8386_s3  ;;  %v3806_v50 = vpop.f32.mrf.mxu0  ;;  %v7663_v7 = vld [vmem:[#allocation11 + $0x20] sm:$0xff]  }
 0x605   :  { %v3762_v42 = vpop.f32.mrf.mxu1  ;;  %v6889_v3 = vpack.c.bf16 %v3806_v50, %v3806_v50  ;;  %7567 = vmatprep.subr.bf16.mxu0 %v7663_v7 }
 0x606   :  { %v7469_v60 = vpop.f32.mrf.mxu0  ;;  %v6887_v56 = vpack.c.bf16 %v3762_v42, %v3762_v42  ;;  %7568 = vmatpush3.bf16.msra.mxu0 %v7663_v7 }
 0x607   :  { %v7463_v37 = vpop.f32.mrf.mxu1  ;;  %4721 = vrot.lane.b32.xlu0 %v6889_v3, %s8373_s0 }
 0x608   :  { %v3809_v19 = vpop.f32.mrf.mxu0 }
 0x609   :  { %v3765_v47 = vpop.f32.mrf.mxu1  ;;  %v6890_v45 = vpack.c.bf16 %v3809_v19, %v3809_v19 }
 0x60a   :  { %v7470_v58 = vpop.f32.mrf.mxu0  ;;  %v6888_v63 = vpack.c.bf16 %v3765_v47, %v3765_v47  ;;  %v7664_v47 = vld [vmem:[#allocation11 + $0x18] sm:$0xff]  }
 0x60b   :  { %v7464_v2 = vpop.f32.mrf.mxu1  ;;  %4680 = vrot.lane.b32.xlu0 %v6887_v56, %s8386_s3  ;;  %4723 = vrot.lane.b32.xlu1 %v6890_v45, %s8373_s0 }
 0x60c   :  { %7569 = vmatprep.subr.bf16.mxu0 %v7664_v47 }
 0x60d   :  { %7570 = vmatpush3.bf16.msra.mxu0 %v7664_v47 }
 0x60f   :  { %4682 = vrot.lane.b32.xlu1 %v6888_v63, %s8386_s3 }
 0x610   :  { %v3894_v22 = vpop.f32.mrf.mxu0 }
 0x611   :  { %v3850_v10 = vpop.f32.mrf.mxu1  ;;  %v6893_v33 = vpack.c.bf16 %v3894_v22, %v3894_v22 }
 0x612   :  { %v6891_v14 = vpack.c.bf16 %v3850_v10, %v3850_v10  ;;  %v7481_v53 = vpop.f32.mrf.mxu0 }
 0x613   :  { %v7475_v18 = vpop.f32.mrf.mxu1  ;;  %v7665_v53 = vld [vmem:[#allocation11 + $0x10] sm:$0xff]  }
 0x614   :  { %4725 = vrot.lane.b32.xlu0 %v6891_v14, %s8373_s0  ;;  %v3897_v62 = vpop.f32.mrf.mxu0  ;;  %7571 = vmatprep.subr.bf16.mxu0 %v7665_v53 }
 0x615   :  { %v3853_v39 = vpop.f32.mrf.mxu1  ;;  %v6894_v26 = vpack.c.bf16 %v3897_v62, %v3897_v62  ;;  %7572 = vmatpush3.bf16.msra.mxu0 %v7665_v53 }
 0x616   :  { %v6892_v4 = vpack.c.bf16 %v3853_v39, %v3853_v39  ;;  %v7482_v35 = vpop.f32.mrf.mxu0 }
 0x617   :  { %v7476_v59 = vpop.f32.mrf.mxu1 }
 0x618   :  { %4727 = vrot.lane.b32.xlu1 %v6892_v4, %s8373_s0  ;;  %4729 = vrot.lane.b32.xlu0 %v6893_v33, %s8373_s0  ;;  %v7666_v59 = vld [vmem:[#allocation11 + $0x8] sm:$0xff]  }
 0x619   :  { %7573 = vmatprep.subr.bf16.mxu0 %v7666_v59 }
 0x61a   :  { %7574 = vmatpush3.bf16.msra.mxu0 %v7666_v59 }
 0x61c   :  { %4731 = vrot.lane.b32.xlu1 %v6894_v26, %s8373_s0  ;;  %v3982_v38 = vpop.f32.mrf.mxu0 }
 0x61d   :  { %v3938_v5 = vpop.f32.mrf.mxu1  ;;  %v6897_v30 = vpack.c.bf16 %v3982_v38, %v3982_v38 }
 0x61e   :  { %v7493_v21 = vpop.f32.mrf.mxu0  ;;  %v6895_v49 = vpack.c.bf16 %v3938_v5, %v3938_v5 }
 0x61f   :  { %v7487_v23 = vpop.f32.mrf.mxu1  ;;  %4774 = vrot.lane.b32.xlu0 %v6897_v30, %s8385_s18 }
 0x620   :  { %v3985_v29 = vpop.f32.mrf.mxu0 }
 0x621   :  { %v3941_v46 = vpop.f32.mrf.mxu1  ;;  %v6898_v34 = vpack.c.bf16 %v3985_v29, %v3985_v29  ;;  %v7668_v29 = vld [vmem:[#allocation11] sm:$0xff]  }
 0x622   :  { %v7494_v1 = vpop.f32.mrf.mxu0  ;;  %v6896_v20 = vpack.c.bf16 %v3941_v46, %v3941_v46  ;;  %7575 = vmatprep.subr.bf16.mxu0 %v7668_v29 }
 0x623   :  { %v7488_v12 = vpop.f32.mrf.mxu1  ;;  %4733 = vrot.lane.b32.xlu0 %v6895_v49, %s8373_s0  ;;  %4776 = vrot.lane.b32.xlu1 %v6898_v34, %s8385_s18 }
 0x624   :  { %v4070_v28 = vpop.f32.mrf.mxu0  ;;  %7576 = vmatpush3.bf16.msra.mxu0 %v7668_v29 }
 0x625   :  { %v4026_v15 = vpop.f32.mrf.mxu1  ;;  %v6901_v40 = vpack.c.bf16 %v4070_v28, %v4070_v28 }
 0x626   :  { %v6899_v61 = vpack.c.bf16 %v4026_v15, %v4026_v15  ;;  %v7505_v11 = vpop.f32.mrf.mxu0 }
 0x627   :  { %v7499_v0 = vpop.f32.mrf.mxu1  ;;  %4735 = vrot.lane.b32.xlu1 %v6896_v20, %s8373_s0 }
 0x628   :  { %4778 = vrot.lane.b32.xlu0 %v6899_v61, %s8385_s18  ;;  %v4073_v44 = vpop.f32.mrf.mxu0 }
 0x629   :  { %v4029_v16 = vpop.f32.mrf.mxu1  ;;  %v6902_v17 = vpack.c.bf16 %v4073_v44, %v4073_v44 }
 0x62a   :  { %v6900_v24 = vpack.c.bf16 %v4029_v16, %v4029_v16  ;;  %v7506_v13 = vpop.f32.mrf.mxu0 }
 0x62b   :  { %v7500_v32 = vpop.f32.mrf.mxu1 }
 0x62c   :  { %4780 = vrot.lane.b32.xlu1 %v6900_v24, %s8385_s18  ;;  %4782 = vrot.lane.b32.xlu0 %v6901_v40, %s8385_s18  ;;  %v4158_v48 = vpop.f32.mrf.mxu0 }
 0x62d   :  { %v4114_v55 = vpop.f32.mrf.mxu1  ;;  %v6905_v27 = vpack.c.bf16 %v4158_v48, %v4158_v48 }
 0x62e   :  { %v7517_v41 = vpop.f32.mrf.mxu0  ;;  %v6903_v8 = vpack.c.bf16 %v4114_v55, %v4114_v55 }
 0x62f   :  { %v7511_v54 = vpop.f32.mrf.mxu1 }
 0x630   :  { %4784 = vrot.lane.b32.xlu1 %v6902_v17, %s8385_s18  ;;  %4827 = vrot.lane.b32.xlu0 %v6905_v27, %s8384_s12  ;;  %v4161_v31 = vpop.f32.mrf.mxu0 }
 0x631   :  { %v4117_v9 = vpop.f32.mrf.mxu1  ;;  %v6906_v6 = vpack.c.bf16 %v4161_v31, %v4161_v31  ;;  %v4563_v52 = vpop.permute.xlu0 %4562 }
 0x632   :  { %4587 = vst.msk [vmem:[#allocation2] sm:$0xf] %vm4586_vm3, %v4563_v52  ;;  %v7518_v43 = vpop.f32.mrf.mxu0  ;;  %v6904_v37 = vpack.c.bf16 %v4117_v9, %v4117_v9 }
 0x633   :  { %v7512_v50 = vpop.f32.mrf.mxu1 }
 0x634   :  { %4786 = vrot.lane.b32.xlu0 %v6903_v8, %s8385_s18  ;;  %4829 = vrot.lane.b32.xlu1 %v6906_v6, %s8384_s12  ;;  %v4246_v42 = vpop.f32.mrf.mxu0 }
 0x635   :  { %v4202_v3 = vpop.f32.mrf.mxu1  ;;  %v4565_v60 = vpop.permute.xlu1 %4564  ;;  %v6909_v28 = vpack.c.bf16 %v4246_v42, %v4246_v42 }
 0x636   :  { %v6907_v19 = vpack.c.bf16 %v4202_v3, %v4202_v3  ;;  %4588 = vst.msk [vmem:[#allocation2 + $0x4] sm:$0xf] %vm4586_vm3, %v4565_v60  ;;  %v7529_v56 = vpop.f32.mrf.mxu0 }
 0x637   :  { %v7523_v45 = vpop.f32.mrf.mxu1 }
 0x638   :  { %4788 = vrot.lane.b32.xlu1 %v6904_v37, %s8385_s18  ;;  %4831 = vrot.lane.b32.xlu0 %v6907_v19, %s8384_s12  ;;  %v4249_v58 = vpop.f32.mrf.mxu0 }
 0x639   :  { %v4205_v2 = vpop.f32.mrf.mxu1  ;;  %v4567_v63 = vpop.permute.xlu0 %4566  ;;  %v6910_v61 = vpack.c.bf16 %v4249_v58, %v4249_v58 }
 0x63a   :  { %v6908_v22 = vpack.c.bf16 %v4205_v2, %v4205_v2  ;;  %4589 = vst.msk [vmem:[#allocation2 + $0x8] sm:$0xf] %vm4586_vm3, %v4567_v63  ;;  %v7530_v10 = vpop.f32.mrf.mxu0 }
 0x63b   :  { %v7524_v14 = vpop.f32.mrf.mxu1 }
 0x63c   :  { %4833 = vrot.lane.b32.xlu1 %v6908_v22, %s8384_s12  ;;  %v4334_v18 = vpop.f32.mrf.mxu0 }
 0x63d   :  { %v4290_v62 = vpop.f32.mrf.mxu1  ;;  %v6913_v39 = vpack.c.bf16 %v4334_v18, %v4334_v18  ;;  %v4569_v33 = vpop.permute.xlu1 %4568 }
 0x63e   :  { %4590 = vst.msk [vmem:[#allocation2 + $0xc] sm:$0xf] %vm4586_vm3, %v4569_v33  ;;  %v7541_v4 = vpop.f32.mrf.mxu0  ;;  %v6911_v11 = vpack.c.bf16 %v4290_v62, %v4290_v62 }
 0x63f   :  { %v7535_v35 = vpop.f32.mrf.mxu1  ;;  %4880 = vrot.lane.b32.xlu0 %v6913_v39, %s8383_s8 }
 0x640   :  { %v4337_v26 = vpop.f32.mrf.mxu0 }
 0x641   :  { %v4293_v38 = vpop.f32.mrf.mxu1  ;;  %v6914_v5 = vpack.c.bf16 %v4337_v26, %v4337_v26  ;;  %v4571_v30 = vpop.permute.xlu0 %4570 }
 0x642   :  { %4591 = vst.msk [vmem:[#allocation2 + $0x10] sm:$0xf] %vm4586_vm3, %v4571_v30  ;;  %v7542_v21 = vpop.f32.mrf.mxu0  ;;  %v6912_v51 = vpack.c.bf16 %v4293_v38, %v4293_v38 }
 0x643   :  { %v7536_v23 = vpop.f32.mrf.mxu1  ;;  %4882 = vrot.lane.b32.xlu1 %v6914_v5, %s8383_s8 }
 0x645   :  { %v4378_v49 = vpop.f32.mrf.mxu1  ;;  %v4573_v46 = vpop.permute.xlu1 %4572 }
 0x646   :  { %v6915_v34 = vpack.c.bf16 %v4378_v49, %v4378_v49  ;;  %4592 = vst.msk [vmem:[#allocation2 + $0x14] sm:$0xf] %vm4586_vm3, %v4573_v46 }
 0x647   :  { %v7547_v1 = vpop.f32.mrf.mxu1 }
 0x648   :  { %4884 = vrot.lane.b32.xlu0 %v6915_v34, %s8383_s8 }
 0x649   :  { %v4381_v12 = vpop.f32.mrf.mxu1 }
 0x64a   :  { %v6916_v20 = vpack.c.bf16 %v4381_v12, %v4381_v12 }
 0x64b   :  { %v7548_v15 = vpop.f32.mrf.mxu1 }
 0x64c   :  { %4835 = vrot.lane.b32.xlu0 %v6909_v28, %s8384_s12  ;;  %4886 = vrot.lane.b32.xlu1 %v6916_v20, %s8383_s8 }
 0x650   :  { %4839 = vrot.lane.b32.xlu0 %v6911_v11, %s8384_s12  ;;  %4837 = vrot.lane.b32.xlu1 %v6910_v61, %s8384_s12 }
 0x651   :  { %v4616_v0 = vpop.permute.xlu0 %4615 }
 0x652   :  { %4640 = vst.msk [vmem:[#allocation2] sm:$0xf] %vm4639_vm4, %v4616_v0 }
 0x654   :  { %4841 = vrot.lane.b32.xlu1 %v6912_v51, %s8384_s12 }
 0x655   :  { %v4618_v44 = vpop.permute.xlu1 %4617  ;;  %v4575_v16 = vpop.permute.xlu0 %4574 }
 0x656   :  { %4641 = vst.msk [vmem:[#allocation2 + $0x4] sm:$0xf] %vm4639_vm4, %v4618_v44 }
 0x657   :  { %4593 = vst.msk [vmem:[#allocation2 + $0x18] sm:$0xf] %vm4586_vm3, %v4575_v16 }
 0x659   :  { %v4577_v40 = vpop.permute.xlu1 %4576  ;;  %v4620_v24 = vpop.permute.xlu0 %4619 }
 0x65a   :  { %4594 = vst.msk [vmem:[#allocation2 + $0x1c] sm:$0xf] %vm4586_vm3, %v4577_v40 }
 0x65b   :  { %4642 = vst.msk [vmem:[#allocation2 + $0x8] sm:$0xf] %vm4639_vm4, %v4620_v24  ;;  %v6777_v24 = vld [vmem:[#allocation12] ss:$0 sm:$0xff] }
 0x65d   :  { %v4622_v13 = vpop.permute.xlu1 %4621  ;;  %v4624_v32 = vpop.permute.xlu0 %4623 }
 0x65e   :  { %4643 = vst.msk [vmem:[#allocation2 + $0xc] sm:$0xf] %vm4639_vm4, %v4622_v13  ;;  %4644 = vst.msk [vmem:[#allocation2 + $0x10] sm:$0xf] %vm4639_vm4, %v4624_v32 }
 0x661   :  { %v4626_v57 = vpop.permute.xlu1 %4625  ;;  %v4669_v48 = vpop.permute.xlu0 %4668 }
 0x662   :  { %4645 = vst.msk [vmem:[#allocation2 + $0x14] sm:$0xf] %vm4639_vm4, %v4626_v57 }
 0x663   :  { %4693 = vst.msk [vmem:[#allocation2] sm:$0xf] %vm4692_vm5, %v4669_v48 }
 0x665   :  { %v4671_v55 = vpop.permute.xlu1 %4670  ;;  %v4628_v27 = vpop.permute.xlu0 %4627 }
 0x666   :  { %4694 = vst.msk [vmem:[#allocation2 + $0x4] sm:$0xf] %vm4692_vm5, %v4671_v55  ;;  %v8120_v55 = vld [vmem:[#allocation3] sm:$0xff] }
 0x667   :  { %4646 = vst.msk [vmem:[#allocation2 + $0x18] sm:$0xf] %vm4639_vm4, %v4628_v27 }
 0x669   :  { %v4630_v17 = vpop.permute.xlu1 %4629 }
 0x66a   :  { %4647 = vst.msk [vmem:[#allocation2 + $0x1c] sm:$0xf] %vm4639_vm4, %v4630_v17 }
 0x66b   :  { %v4466_v41 = vpop.f32.mrf.mxu1 }
 0x66c   :  { %v6919_v60 = vpack.c.bf16 %v4466_v41, %v4466_v41 }
 0x66d   :  { %v7559_v54 = vpop.f32.mrf.mxu1 }
 0x66e   :  { %v4673_v25 = vpop.permute.xlu0 %4672  ;;  %v8121_v54 = vld [vmem:[#allocation3 + $0x10] sm:$0xff] }
 0x66f   :  { %4695 = vst.msk [vmem:[#allocation2 + $0x8] sm:$0xf] %vm4692_vm5, %v4673_v25  ;;  %v4469_v31 = vpop.f32.mrf.mxu1 }
 0x670   :  { %v6920_v45 = vpack.c.bf16 %v4469_v31, %v4469_v31 }
 0x671   :  { %v7560_v9 = vpop.f32.mrf.mxu1 }
 0x672   :  { %v4675_v6 = vpop.permute.xlu1 %4674  ;;  %v4677_v52 = vpop.permute.xlu0 %4676  ;;  %v8122_v9 = vld [vmem:[#allocation3 + $0x8] sm:$0xff] }
 0x673   :  { %4696 = vst.msk [vmem:[#allocation2 + $0xc] sm:$0xf] %vm4692_vm5, %v4675_v6  ;;  %4697 = vst.msk [vmem:[#allocation2 + $0x10] sm:$0xf] %vm4692_vm5, %v4677_v52  ;;  %v8123_v52 = vld [vmem:[#allocation3 + $0x18] sm:$0xff] }
 0x676   :  { %v4679_v8 = vpop.permute.xlu1 %4678  ;;  %v4422_v43 = vpop.f32.mrf.mxu0 }
 0x677   :  { %4698 = vst.msk [vmem:[#allocation2 + $0x14] sm:$0xf] %vm4692_vm5, %v4679_v8  ;;  %v6917_v7 = vpack.c.bf16 %v4422_v43, %v4422_v43 }
 0x678   :  { %v7553_v50 = vpop.f32.mrf.mxu0 }
 0x679   :  { %4888 = vrot.lane.b32.xlu0 %v6917_v7, %s8383_s8  ;;  %v4722_v42 = vpop.permute.xlu0 %4721 }
 0x67a   :  { %v4425_v3 = vpop.f32.mrf.mxu0  ;;  %4746 = vst.msk [vmem:[#allocation2] sm:$0xf] %vm4745_vm6, %v4722_v42 }
 0x67b   :  { %v6918_v37 = vpack.c.bf16 %v4425_v3, %v4425_v3 }
 0x67c   :  { %v7554_v19 = vpop.f32.mrf.mxu0 }
 0x67d   :  { %4892 = vrot.lane.b32.xlu0 %v6919_v60, %s8383_s8  ;;  %4890 = vrot.lane.b32.xlu1 %v6918_v37, %s8383_s8  ;;  %v4724_v56 = vpop.permute.xlu1 %4723  ;;  %v4681_v47 = vpop.permute.xlu0 %4680  ;;  %v8124_v60 = vld [vmem:[#allocation3 + $0x20] sm:$0xff] }
 0x67e   :  { %4747 = vst.msk [vmem:[#allocation2 + $0x4] sm:$0xf] %vm4745_vm6, %v4724_v56 }
 0x67f   :  { %4699 = vst.msk [vmem:[#allocation2 + $0x18] sm:$0xf] %vm4692_vm5, %v4681_v47  ;;  %v8125_v47 = vld [vmem:[#allocation3 + $0x30] sm:$0xff] }
 0x681   :  { %4894 = vrot.lane.b32.xlu1 %v6920_v45, %s8383_s8  ;;  %v4683_v58 = vpop.permute.xlu1 %4682 }
 0x682   :  { %4700 = vst.msk [vmem:[#allocation2 + $0x1c] sm:$0xf] %vm4692_vm5, %v4683_v58 }
 0x686   :  { %v4726_v2 = vpop.permute.xlu0 %4725 }
 0x687   :  { %4748 = vst.msk [vmem:[#allocation2 + $0x8] sm:$0xf] %vm4745_vm6, %v4726_v2  ;;  %v8126_v2 = vld [vmem:[#allocation3 + $0x28] sm:$0xff] }
 0x68a   :  { %v4728_v63 = vpop.permute.xlu1 %4727  ;;  %v4730_v22 = vpop.permute.xlu0 %4729 }
 0x68b   :  { %4749 = vst.msk [vmem:[#allocation2 + $0xc] sm:$0xf] %vm4745_vm6, %v4728_v63  ;;  %4750 = vst.msk [vmem:[#allocation2 + $0x10] sm:$0xf] %vm4745_vm6, %v4730_v22  ;;  %v8127_v22 = vld [vmem:[#allocation3 + $0x38] sm:$0xff] }
 0x68e   :  { %v4732_v10 = vpop.permute.xlu1 %4731 }
 0x68f   :  { %4751 = vst.msk [vmem:[#allocation2 + $0x14] sm:$0xf] %vm4745_vm6, %v4732_v10 }
 0x691   :  { %v4775_v14 = vpop.permute.xlu0 %4774 }
 0x692   :  { %4799 = vst.msk [vmem:[#allocation2] sm:$0xf] %vm4798_vm7, %v4775_v14  ;;  %v7672_v14 = vld [vmem:[#allocation17 + $0xe0] ss:$16 sps:$4 sm:$0xff]  }
 0x695   :  { %v4777_v53 = vpop.permute.xlu1 %4776  ;;  %v4734_v18 = vpop.permute.xlu0 %4733 }
 0x696   :  { %4800 = vst.msk [vmem:[#allocation2 + $0x4] sm:$0xf] %vm4798_vm7, %v4777_v53  ;;  %v7674_v53 = vld [vmem:[#allocation17 + $0xe4] ss:$16 sps:$4 sm:$0xff]  }
 0x697   :  { %4752 = vst.msk [vmem:[#allocation2 + $0x18] sm:$0xf] %vm4745_vm6, %v4734_v18  ;;  %v7675_v18 = vld [vmem:[#allocation17 + $0xe8] ss:$16 sps:$4 sm:$0xff]   ;;  %5425 = vmatprep.subr.bf16.mxu1 %v7674_v53 }
 0x698   :  { %5426 = vmatpush1.bf16.msra.mxu1 %v7672_v14 }
 0x699   :  { %v4736_v62 = vpop.permute.xlu1 %4735 }
 0x69a   :  { %4753 = vst.msk [vmem:[#allocation2 + $0x1c] sm:$0xf] %vm4745_vm6, %v4736_v62  ;;  %v4779_v39 = vpop.permute.xlu0 %4778  ;;  %v7677_v62 = vld [vmem:[#allocation17 + $0xec] ss:$16 sps:$4 sm:$0xff]  }
 0x69b   :  { %4801 = vst.msk [vmem:[#allocation2 + $0x8] sm:$0xf] %vm4798_vm7, %v4779_v39  ;;  %5498 = vmatprep.subr.bf16.mxu0 %v7677_v62 }
 0x69e   :  { %v4781_v33 = vpop.permute.xlu1 %4780  ;;  %v4783_v4 = vpop.permute.xlu0 %4782 }
 0x69f   :  { %4802 = vst.msk [vmem:[#allocation2 + $0xc] sm:$0xf] %vm4798_vm7, %v4781_v33  ;;  %4803 = vst.msk [vmem:[#allocation2 + $0x10] sm:$0xf] %vm4798_vm7, %v4783_v4 }
 0x6a2   :  { %v4785_v35 = vpop.permute.xlu1 %4784  ;;  %v4828_v59 = vpop.permute.xlu0 %4827 }
 0x6a3   :  { %4804 = vst.msk [vmem:[#allocation2 + $0x14] sm:$0xf] %vm4798_vm7, %v4785_v35 }
 0x6a4   :  { %4852 = vst.msk [vmem:[#allocation2] sm:$0xf] %vm4851_vm8, %v4828_v59 }
 0x6a6   :  { %v4830_v26 = vpop.permute.xlu1 %4829  ;;  %v4787_v38 = vpop.permute.xlu0 %4786 }
 0x6a7   :  { %4853 = vst.msk [vmem:[#allocation2 + $0x4] sm:$0xf] %vm4851_vm8, %v4830_v26 }
 0x6a8   :  { %4805 = vst.msk [vmem:[#allocation2 + $0x18] sm:$0xf] %vm4798_vm7, %v4787_v38 }
 0x6aa   :  { %v4789_v5 = vpop.permute.xlu1 %4788  ;;  %v4832_v30 = vpop.permute.xlu0 %4831 }
 0x6ab   :  { %4806 = vst.msk [vmem:[#allocation2 + $0x1c] sm:$0xf] %vm4798_vm7, %v4789_v5 }
 0x6ac   :  { %4854 = vst.msk [vmem:[#allocation2 + $0x8] sm:$0xf] %vm4851_vm8, %v4832_v30 }
 0x6ae   :  { %v4834_v21 = vpop.permute.xlu1 %4833 }
 0x6af   :  { %4855 = vst.msk [vmem:[#allocation2 + $0xc] sm:$0xf] %vm4851_vm8, %v4834_v21 }
 0x6b1   :  { %v4881_v23 = vpop.permute.xlu0 %4880 }
 0x6b2   :  { %4905 = vst.msk [vmem:[#allocation2] sm:$0xf] %vm4904_vm9, %v4881_v23 }
 0x6b5   :  { %v4883_v29 = vpop.permute.xlu1 %4882 }
 0x6b6   :  { %4906 = vst.msk [vmem:[#allocation2 + $0x4] sm:$0xf] %vm4904_vm9, %v4883_v29 }
 0x6ba   :  { %v4885_v49 = vpop.permute.xlu0 %4884 }
 0x6bb   :  { %4907 = vst.msk [vmem:[#allocation2 + $0x8] sm:$0xf] %vm4904_vm9, %v4885_v49 }
 0x6bd   :  { %v7667_v46 = vld [vmem:[#allocation2] sm:$0xff]  }
 0x6be   :  { %v4887_v34 = vpop.permute.xlu1 %4886  ;;  %v4836_v1 = vpop.permute.xlu0 %4835  ;;  %7577 = vmatprep.mubr.bf16.mxu0 %v7667_v46 }
 0x6bf   :  { %4908 = vst.msk [vmem:[#allocation2 + $0xc] sm:$0xf] %vm4904_vm9, %v4887_v34 }
 0x6c0   :  { %4856 = vst.msk [vmem:[#allocation2 + $0x10] sm:$0xf] %vm4851_vm8, %v4836_v1 }
 0x6c2   :  { %v4838_v12 = vpop.permute.xlu1 %4837  ;;  %v4840_v28 = vpop.permute.xlu0 %4839 }
 0x6c3   :  { %4857 = vst.msk [vmem:[#allocation2 + $0x14] sm:$0xf] %vm4851_vm8, %v4838_v12  ;;  %4858 = vst.msk [vmem:[#allocation2 + $0x18] sm:$0xf] %vm4851_vm8, %v4840_v28  ;;  %v7680_v12 = vld [vmem:[#allocation17 + $0xc4] ss:$16 sps:$4 sm:$0xff]  }
 0x6c4   :  { %v7683_v28 = vld [vmem:[#allocation17 + $0xcc] ss:$16 sps:$4 sm:$0xff]   ;;  %5427 = vmatprep.subr.bf16.mxu1 %v7680_v12 }
 0x6c6   :  { %v4842_v20 = vpop.permute.xlu1 %4841  ;;  %v7669_v15 = vld [vmem:[#allocation2 + $0x8] sm:$0xff]  }
 0x6c7   :  { %4859 = vst.msk [vmem:[#allocation2 + $0x1c] sm:$0xf] %vm4851_vm8, %v4842_v20  ;;  %7578 = vmatmul.mubr.bf16.vlgmr.msra.gmra.mxu0 %v7669_v15  ;;  %v7678_v20 = vld [vmem:[#allocation17 + $0xc0] ss:$16 sps:$4 sm:$0xff]   ;;  %v7681_v15 = vld [vmem:[#allocation17 + $0xc8] ss:$16 sps:$4 sm:$0xff]  }
 0x6c8   :  { %5499 = vmatpush1.bf16.msra.mxu0 %v7675_v18  ;;  %5428 = vmatpush1.bf16.msra.mxu1 %v7678_v20 }
 0x6c9   :  { %5500 = vmatprep.subr.bf16.mxu0 %v7683_v28 }
 0x6cc   :  { %5501 = vmatpush1.bf16.msra.mxu0 %v7681_v15 }
 0x6eb   :  { %v4889_v61 = vpop.permute.xlu0 %4888 }
 0x6ec   :  { %4909 = vst.msk [vmem:[#allocation2 + $0x10] sm:$0xf] %vm4904_vm9, %v4889_v61  ;;  %v7686_v61 = vld [vmem:[#allocation17 + $0xa4] ss:$16 sps:$4 sm:$0xff]  }
 0x6ed   :  { %5429 = vmatprep.subr.bf16.mxu1 %v7686_v61 }
 0x6ef   :  { %v4891_v11 = vpop.permute.xlu1 %4890  ;;  %v4893_v0 = vpop.permute.xlu0 %4892 }
 0x6f0   :  { %4910 = vst.msk [vmem:[#allocation2 + $0x14] sm:$0xf] %vm4904_vm9, %v4891_v11  ;;  %4911 = vst.msk [vmem:[#allocation2 + $0x18] sm:$0xf] %vm4904_vm9, %v4893_v0  ;;  %v7689_v11 = vld [vmem:[#allocation17 + $0xac] ss:$16 sps:$4 sm:$0xff]  }
 0x6f1   :  { %v7684_v0 = vld [vmem:[#allocation17 + $0xa0] ss:$16 sps:$4 sm:$0xff]   ;;  %5502 = vmatprep.subr.bf16.mxu0 %v7689_v11 }
 0x6f2   :  { %5430 = vmatpush1.bf16.msra.mxu1 %v7684_v0 }
 0x6f3   :  { %v4895_v51 = vpop.permute.xlu1 %4894 }
 0x6f4   :  { %4912 = vst.msk [vmem:[#allocation2 + $0x1c] sm:$0xf] %vm4904_vm9, %v4895_v51  ;;  %v7687_v51 = vld [vmem:[#allocation17 + $0xa8] ss:$16 sps:$4 sm:$0xff]  }
 0x6f5   :  { %5503 = vmatpush1.bf16.msra.mxu0 %v7687_v51  ;;  %v6790_v51 = vld [vmem:[#allocation14] ss:$0 sm:$0xff] }
 0x6f7   :  { %v7670_v44 = vld [vmem:[#allocation2 + $0x10] sm:$0xff]  }
 0x6f8   :  { %7581 = vmatprep.mubr.bf16.mxu0 %v7670_v44  ;;  %v7692_v44 = vld [vmem:[#allocation17 + $0x84] ss:$16 sps:$4 sm:$0xff]  }
 0x6f9   :  { %5431 = vmatprep.subr.bf16.mxu1 %v7692_v44 }
 0x6fb   :  { %v7671_v16 = vld [vmem:[#allocation2 + $0x18] sm:$0xff]  }
 0x6fc   :  { %7582 = vmatmul.mubr.bf16.gmra.mxu0 %v7671_v16  ;;  %v7695_v16 = vld [vmem:[#allocation17 + $0x8c] ss:$16 sps:$4 sm:$0xff]  }
 0x6fd   :  { %5530 = vmatprep.mubr.bf16.mxu0 %v10845_v36  ;;  %5504 = vmatprep.subr.bf16.mxu0 %v7695_v16 }
 0x787   :  { %v7579_v40 = vpop.f32.mrf.mxu0 }
 0x788   :  { %v5059_v48 = vadd.f32 %v7579_v40, %v6777_v24  ;;  %v7690_v40 = vld [vmem:[#allocation17 + $0x80] ss:$16 sps:$4 sm:$0xff]  }
 0x789   :  { %v5050_v13 = vpop.f32.mrf.mxu0  ;;  %5432 = vmatpush1.bf16.msra.mxu1 %v7690_v40 }
 0x78a   :  { %v5051_v32 = vadd.f32 %v6777_v24, %v5050_v13  ;;  %v9873_v25 = vadd.f32 %v8121_v54, %v5059_v48  ;;  %v7698_v13 = vld [vmem:[#allocation17 + $0x64] ss:$16 sps:$4 sm:$0xff]   ;;  %v7699_v48 = vld [vmem:[#allocation17 + $0x68] ss:$16 sps:$4 sm:$0xff]  }
 0x78b   :  { %v7580_v57 = vpop.f32.mrf.mxu0  ;;  %5433 = vmatprep.subr.bf16.mxu1 %v7698_v13  ;;  %v7705_v54 = vld [vmem:[#allocation17 + $0x48] ss:$16 sps:$4 sm:$0xff]   ;;  %v6791_v13 = vld [vmem:[#allocation15] ss:$0 sm:$0xff] }
 0x78c   :  { %v9870_v27 = vadd.f32 %v8120_v55, %v5051_v32  ;;  %10848 = vst [vmem:[#allocation60_spill] sm:$0xff] %v9873_v25  ;;  %v5062_v31 = vadd.f32 %v7580_v57, %v6777_v24  ;;  %v7701_v32 = vld [vmem:[#allocation17 + $0x6c] ss:$16 sps:$4 sm:$0xff]   ;;  %v7696_v57 = vld [vmem:[#allocation17 + $0x60] ss:$16 sps:$4 sm:$0xff]  }
 0x78d   :  { %v5053_v17 = vpop.f32.mrf.mxu0  ;;  %5434 = vmatpush1.bf16.msra.mxu1 %v7696_v57  ;;  %v7704_v55 = vld [vmem:[#allocation17 + $0x44] ss:$16 sps:$4 sm:$0xff]  }
 0x78e   :  { %10847 = vst [vmem:[#allocation56_spill] sm:$0xff] %v9870_v27  ;;  %v5054_v41 = vadd.f32 %v6777_v24, %v5053_v17  ;;  %5091 = vadd.xlane.f32.xlu0 %v9870_v27  ;;  %v9879_v8 = vadd.f32 %v8123_v52, %v5062_v31  ;;  %v7707_v17 = vld [vmem:[#allocation17 + $0x4c] ss:$16 sps:$4 sm:$0xff]   ;;  %5435 = vmatprep.subr.bf16.mxu1 %v7704_v55  ;;  %v7710_v31 = vld [vmem:[#allocation17 + $0x24] ss:$16 sps:$4 sm:$0xff]  }
 0x78f   :  { %v7708_v52 = vld [vmem:[#allocation17 + $0x20] ss:$16 sps:$4 sm:$0xff]  }
 0x790   :  { %v9875_v6 = vadd.f32 %v8122_v9, %v5054_v41  ;;  %10850 = vst [vmem:[#allocation61_spill] sm:$0xff] %v9879_v8  ;;  %v7702_v41 = vld [vmem:[#allocation17 + $0x40] ss:$16 sps:$4 sm:$0xff]   ;;  %v7713_v9 = vld [vmem:[#allocation17 + $0x2c] ss:$16 sps:$4 sm:$0xff]  }
 0x791   :  { %5436 = vmatpush1.bf16.msra.mxu1 %v7702_v41 }
 0x792   :  { %10849 = vst [vmem:[#allocation29_spill] sm:$0xff] %v9875_v6  ;;  %5093 = vadd.xlane.f32.xlu1 %v9875_v6  ;;  %5095 = vadd.xlane.f32.xlu0 %v9873_v25 }
 0x793   :  { %5437 = vmatprep.subr.bf16.mxu1 %v7710_v31 }
 0x795   :  { %5438 = vmatpush1.bf16.msra.mxu1 %v7708_v52 }
 0x796   :  { %5097 = vadd.xlane.f32.xlu0 %v9879_v8 }
 0x7bc   :  { %v7583_v43 = vpop.f32.mrf.mxu0 }
 0x7bd   :  { %v5075_v3 = vadd.f32 %v7583_v43, %v6777_v24  ;;  %v7711_v43 = vld [vmem:[#allocation17 + $0x28] ss:$16 sps:$4 sm:$0xff]  }
 0x7be   :  { %v5066_v7 = vpop.f32.mrf.mxu0 }
 0x7bf   :  { %v5067_v50 = vadd.f32 %v6777_v24, %v5066_v7  ;;  %v9885_v45 = vadd.f32 %v8125_v47, %v5075_v3  ;;  %v7716_v7 = vld [vmem:[#allocation17 + $0x4] ss:$16 sps:$4 sm:$0xff]   ;;  %v7717_v3 = vld [vmem:[#allocation17 + $0x8] ss:$16 sps:$4 sm:$0xff]  }
 0x7c0   :  { %v7584_v42 = vpop.f32.mrf.mxu0  ;;  %5439 = vmatprep.subr.bf16.mxu1 %v7716_v7 }
 0x7c1   :  { %v9882_v37 = vadd.f32 %v8124_v60, %v5067_v50  ;;  %10852 = vst [vmem:[#allocation63_spill] sm:$0xff] %v9885_v45  ;;  %v5078_v58 = vadd.f32 %v7584_v42, %v6777_v24  ;;  %v7719_v50 = vld [vmem:[#allocation17 + $0xc] ss:$16 sps:$4 sm:$0xff]   ;;  %v7714_v42 = vld [vmem:[#allocation17] ss:$16 sps:$4 sm:$0xff]  }
 0x7c2   :  { %v5069_v19 = vpop.f32.mrf.mxu0  ;;  %5440 = vmatpush1.bf16.msra.mxu1 %v7714_v42 }
 0x7c3   :  { %10851 = vst [vmem:[#allocation62_spill] sm:$0xff] %v9882_v37  ;;  %v5070_v56 = vadd.f32 %v6777_v24, %v5069_v19  ;;  %5099 = vadd.xlane.f32.xlu0 %v9882_v37  ;;  %v9891_v10 = vadd.f32 %v8127_v22, %v5078_v58  ;;  %v7693_v24 = vld [vmem:[#allocation17 + $0x88] ss:$16 sps:$4 sm:$0xff]  }
 0x7c4   :  { %5505 = vmatpush1.bf16.msra.mxu0 %v7693_v24 }
 0x7c5   :  { %v9887_v63 = vadd.f32 %v8126_v2, %v5070_v56  ;;  %10854 = vst [vmem:[#allocation66_spill] sm:$0xff] %v9891_v10  ;;  %5506 = vmatprep.subr.bf16.mxu0 %v7701_v32 }
 0x7c7   :  { %10853 = vst [vmem:[#allocation64_spill] sm:$0xff] %v9887_v63  ;;  %5101 = vadd.xlane.f32.xlu1 %v9887_v63  ;;  %5103 = vadd.xlane.f32.xlu0 %v9885_v45 }
 0x7c8   :  { %5507 = vmatpush1.bf16.msra.mxu0 %v7699_v48 }
 0x7c9   :  { %5508 = vmatprep.subr.bf16.mxu0 %v7707_v17 }
 0x7cb   :  { %5105 = vadd.xlane.f32.xlu1 %v9891_v10 }
 0x7cc   :  { %5509 = vmatpush1.bf16.msra.mxu0 %v7705_v54 }
 0x7cd   :  { %5510 = vmatprep.subr.bf16.mxu0 %v7713_v9 }
 0x7d0   :  { %5511 = vmatpush1.bf16.msra.mxu0 %v7711_v43 }
 0x7d1   :  { %5512 = vmatprep.subr.bf16.mxu0 %v7719_v50 }
 0x7d4   :  { %5513 = vmatpush1.bf16.msra.mxu0 %v7717_v3 }
 0x817   :  { %v5092_v39 = vpop.xlane.xlu0 %5091 }
 0x818   :  { %v5107_v33 = vmul.f32 0.0078125, %v5092_v39 }
 0x81a   :  { %v9895_v4 = vsub.f32 %v9870_v27, %v5107_v33 }
 0x81b   :  { %v5094_v35 = vpop.xlane.xlu1 %5093  ;;  %v5096_v59 = vpop.xlane.xlu0 %5095 }
 0x81c   :  { %v5108_v26 = vmul.f32 0.0078125, %v5094_v35  ;;  %v5109_v38 = vmul.f32 0.0078125, %v5096_v59  ;;  %v5123_v5 = vmul.f32 %v9895_v4, %v9895_v4 }
 0x81e   :  { %v9900_v30 = vsub.f32 %v9875_v6, %v5108_v26  ;;  %v9903_v21 = vsub.f32 %v9873_v25, %v5109_v38  ;;  %5131 = vadd.xlane.f32.xlu0 %v5123_v5 }
 0x81f   :  { %v5098_v23 = vpop.xlane.xlu0 %5097 }
 0x820   :  { %v5110_v29 = vmul.f32 0.0078125, %v5098_v23  ;;  %v5124_v49 = vmul.f32 %v9900_v30, %v9900_v30  ;;  %v5125_v46 = vmul.f32 %v9903_v21, %v9903_v21 }
 0x822   :  { %v9910_v34 = vsub.f32 %v9879_v8, %v5110_v29  ;;  %5133 = vadd.xlane.f32.xlu1 %v5124_v49  ;;  %5135 = vadd.xlane.f32.xlu0 %v5125_v46 }
 0x824   :  { %v5126_v1 = vmul.f32 %v9910_v34, %v9910_v34 }
 0x826   :  { %5137 = vadd.xlane.f32.xlu1 %v5126_v1 }
 0x84c   :  { %v5100_v60 = vpop.xlane.xlu0 %5099 }
 0x84d   :  { %v5111_v19 = vmul.f32 0.0078125, %v5100_v60 }
 0x84f   :  { %v9915_v56 = vsub.f32 %v9882_v37, %v5111_v19 }
 0x850   :  { %v5102_v47 = vpop.xlane.xlu1 %5101  ;;  %v5104_v58 = vpop.xlane.xlu0 %5103 }
 0x851   :  { %v5112_v2 = vmul.f32 0.0078125, %v5102_v47  ;;  %v5113_v22 = vmul.f32 0.0078125, %v5104_v58  ;;  %v5127_v14 = vmul.f32 %v9915_v56, %v9915_v56 }
 0x853   :  { %v9920_v53 = vsub.f32 %v9887_v63, %v5112_v2  ;;  %v9923_v18 = vsub.f32 %v9885_v45, %v5113_v22  ;;  %5139 = vadd.xlane.f32.xlu0 %v5127_v14 }
 0x854   :  { %v5106_v62 = vpop.xlane.xlu1 %5105 }
 0x855   :  { %v5114_v39 = vmul.f32 0.0078125, %v5106_v62  ;;  %v5128_v33 = vmul.f32 %v9920_v53, %v9920_v53  ;;  %v5129_v35 = vmul.f32 %v9923_v18, %v9923_v18 }
 0x857   :  { %v9930_v59 = vsub.f32 %v9891_v10, %v5114_v39  ;;  %5141 = vadd.xlane.f32.xlu1 %v5128_v33  ;;  %5143 = vadd.xlane.f32.xlu0 %v5129_v35 }
 0x859   :  { %v5130_v26 = vmul.f32 %v9930_v59, %v9930_v59 }
 0x85b   :  { %5145 = vadd.xlane.f32.xlu1 %v5130_v26 }
 0x8a7   :  { %v5132_v38 = vpop.xlane.xlu0 %5131 }
 0x8a8   :  { %v5147_v5 = vmul.f32 0.0078125, %v5132_v38 }
 0x8aa   :  { %v5155_v23 = vadd.f32 1e-05, %v5147_v5 }
 0x8ab   :  { %v5134_v29 = vpop.xlane.xlu1 %5133  ;;  %v5136_v49 = vpop.xlane.xlu0 %5135 }
 0x8ac   :  { %8024 = vrsqrt.f32 %v5155_v23  ;;  %v5148_v46 = vmul.f32 0.0078125, %v5134_v29  ;;  %v5149_v1 = vmul.f32 0.0078125, %v5136_v49 }
 0x8ae   :  { %v5156_v12 = vadd.f32 1e-05, %v5148_v46  ;;  %v5157_v28 = vadd.f32 1e-05, %v5149_v1 }
 0x8af   :  { %v5138_v20 = vpop.xlane.xlu1 %5137 }
 0x8b0   :  { %8026 = vrsqrt.f32 %v5156_v12  ;;  %v5150_v15 = vmul.f32 0.0078125, %v5138_v20  ;;  %v5245_v20 = vlaneseq }
 0x8b1   :  { %8028 = vrsqrt.f32 %v5157_v28 }
 0x8b2   :  { %v5158_v61 = vadd.f32 1e-05, %v5150_v15  ;;  %v5246_v15 = vshrl.u32 %v5245_v20, 7 }
 0x8b4   :  { %8030 = vrsqrt.f32 %v5158_v61  ;;  %v9948_v61 = vsub.s32 0, %v5246_v15 }
 0x8b9   :  { %v8025_v11 = vpop.eup %8024 }
 0x8ba   :  { %v5171_v0 = vmul.f32 %v8025_v11, %v9895_v4  ;;  %v9955_v11 = vsub.s32 1, %v5246_v15 }
 0x8bc   :  { %v5185_v40 = vmul.f32 %v6790_v51, %v5171_v0  ;;  %v9957_v0 = vsub.s32 3, %v5246_v15 }
 0x8bd   :  { %v8027_v44 = vpop.eup %8026 }
 0x8be   :  { %v5172_v16 = vmul.f32 %v8027_v44, %v9900_v30  ;;  %v8029_v24 = vpop.eup %8028  ;;  %v5199_v48 = vadd.f32 %v6791_v13, %v5185_v40 }
 0x8bf   :  { %v5173_v17 = vmul.f32 %v8029_v24, %v9903_v21 }
 0x8c0   :  { %v5186_v32 = vmul.f32 %v6790_v51, %v5172_v16 }
 0x8c1   :  { %v8031_v57 = vpop.eup %8030  ;;  %v5187_v4 = vmul.f32 %v6790_v51, %v5173_v17 }
 0x8c2   :  { %v5200_v55 = vadd.f32 %v6791_v13, %v5186_v32  ;;  %v5174_v41 = vmul.f32 %v8031_v57, %v9910_v34 }
 0x8c3   :  { %v5201_v9 = vadd.f32 %v6791_v13, %v5187_v4 }
 0x8c4   :  { %v5207_v54 = vpack.c.bf16 %v5200_v55, %v5199_v48  ;;  %v5188_v31 = vmul.f32 %v6790_v51, %v5174_v41 }
 0x8c6   :  { %5458 = vmatmul.mubr.bf16.vlgmr.msra.gmra.mxu1 %v5207_v54  ;;  %5531 = vmatmul.mubr.bf16.vlgmr.msra.gmra.mxu0 %v5207_v54  ;;  %v5202_v30 = vadd.f32 %v6791_v13, %v5188_v31 }
 0x8c7   :  { %5467 = vmatprep.mubr.bf16.mxu1 %v10845_v36  ;;  %5540 = vmatprep.mubr.bf16.mxu0 %v10845_v36 }
 0x8c8   :  { %v5208_v52 = vpack.c.bf16 %v5202_v30, %v5201_v9 }
 0x8ce   :  { %5468 = vmatmul.mubr.bf16.gmra.mxu1 %v5208_v52  ;;  %5541 = vmatmul.mubr.bf16.gmra.mxu0 %v5208_v52 }
 0x8cf   :  { %5477 = vmatprep.mubr.bf16.mxu1 %v10845_v36  ;;  %5550 = vmatprep.mubr.bf16.mxu0 %v10845_v36 }
 0x8dc   :  { %v5140_v21 = vpop.xlane.xlu0 %5139 }
 0x8dd   :  { %v5151_v34 = vmul.f32 0.0078125, %v5140_v21 }
 0x8df   :  { %v5159_v43 = vadd.f32 1e-05, %v5151_v34 }
 0x8e0   :  { %v5142_v7 = vpop.xlane.xlu1 %5141  ;;  %v5144_v50 = vpop.xlane.xlu0 %5143 }
 0x8e1   :  { %8032 = vrsqrt.f32 %v5159_v43  ;;  %v5152_v42 = vmul.f32 0.0078125, %v5142_v7  ;;  %v5153_v3 = vmul.f32 0.0078125, %v5144_v50 }
 0x8e3   :  { %v5160_v60 = vadd.f32 1e-05, %v5152_v42  ;;  %v5161_v19 = vadd.f32 1e-05, %v5153_v3 }
 0x8e4   :  { %v5146_v47 = vpop.xlane.xlu1 %5145 }
 0x8e5   :  { %8034 = vrsqrt.f32 %v5160_v60  ;;  %v5154_v58 = vmul.f32 0.0078125, %v5146_v47 }
 0x8e6   :  { %8036 = vrsqrt.f32 %v5161_v19 }
 0x8e7   :  { %v5162_v2 = vadd.f32 1e-05, %v5154_v58 }
 0x8e9   :  { %8038 = vrsqrt.f32 %v5162_v2 }
 0x8ee   :  { %v8033_v22 = vpop.eup %8032 }
 0x8ef   :  { %v5175_v14 = vmul.f32 %v8033_v22, %v9915_v56 }
 0x8f1   :  { %v5189_v33 = vmul.f32 %v6790_v51, %v5175_v14 }
 0x8f2   :  { %v8035_v62 = vpop.eup %8034 }
 0x8f3   :  { %v5176_v39 = vmul.f32 %v8035_v62, %v9920_v53  ;;  %v8037_v35 = vpop.eup %8036  ;;  %v5203_v5 = vadd.f32 %v6791_v13, %v5189_v33 }
 0x8f4   :  { %v5177_v29 = vmul.f32 %v8037_v35, %v9923_v18  ;;  %v9950_v18 = vsub.s32 2, %v5246_v15 }
 0x8f5   :  { %v5190_v26 = vmul.f32 %v6790_v51, %v5176_v39 }
 0x8f6   :  { %v8039_v38 = vpop.eup %8038  ;;  %v5191_v12 = vmul.f32 %v6790_v51, %v5177_v29 }
 0x8f7   :  { %v5204_v23 = vadd.f32 %v6791_v13, %v5190_v26  ;;  %v5178_v49 = vmul.f32 %v8039_v38, %v9930_v59  ;;  %v5243_v59 = vld [vmem:[%s10709_s9] sm:$0xf] }
 0x8f8   :  { %v5205_v53 = vadd.f32 %v6791_v13, %v5191_v12  ;;  %v9966_v44 = vrot.slane %v5243_v59, %v9955_v11  ;;  %v9969_v16 = vrot.slane %v5243_v59, %v9957_v0 }
 0x8f9   :  { %v5209_v46 = vpack.c.bf16 %v5204_v23, %v5203_v5  ;;  %v5192_v1 = vmul.f32 %v6790_v51, %v5178_v49  ;;  %v9963_v51 = vrot.slane %v5243_v59, %v9950_v18 }
 0x8fb   :  { %5478 = vmatmul.mubr.bf16.gmra.mxu1 %v5209_v46  ;;  %5551 = vmatmul.mubr.bf16.gmra.mxu0 %v5209_v46  ;;  %v5206_v56 = vadd.f32 %v6791_v13, %v5192_v1 }
 0x8fc   :  { %5487 = vmatprep.mubr.bf16.mxu1 %v10845_v36  ;;  %5560 = vmatprep.mubr.bf16.mxu0 %v10845_v36  ;;  %v9960_v36 = vrot.slane %v5243_v59, %v9948_v61 }
 0x8fd   :  { %v5210_v28 = vpack.c.bf16 %v5206_v56, %v5205_v53 }
 0x903   :  { %5488 = vmatmul.mubr.bf16.gmra.mxu1 %v5210_v28  ;;  %5561 = vmatmul.mubr.bf16.gmra.mxu0 %v5210_v28 }
 0x986   :  { %v5459_v40 = vpop.f32.mrf.mxu1  ;;  %v5532_v24 = vpop.f32.mrf.mxu0 }
 0x987   :  { %v9972_v13 = vadd.f32 %v5459_v40, %v9960_v36  ;;  %v9975_v32 = vadd.f32 %v5532_v24, %v9963_v51 }
 0x988   :  { %v5461_v57 = vpop.f32.mrf.mxu1  ;;  %v5534_v48 = vpop.f32.mrf.mxu0 }
 0x989   :  { %v5603_v55 = vmul.f32 0.044715, %v9972_v13  ;;  %v5605_v17 = vmul.f32 0.044715, %v9975_v32  ;;  %v9980_v41 = vadd.f32 %v5461_v57, %v9966_v44  ;;  %v9983_v54 = vadd.f32 %v5534_v48, %v9969_v16 }
 0x98a   :  { %v5463_v31 = vpop.f32.mrf.mxu1  ;;  %v5536_v4 = vpop.f32.mrf.mxu0 }
 0x98b   :  { %v5635_v30 = vmul.f32 %v5603_v55, %v9972_v13  ;;  %v5637_v9 = vmul.f32 %v5605_v17, %v9975_v32  ;;  %v5604_v52 = vmul.f32 0.044715, %v9980_v41  ;;  %v5606_v21 = vmul.f32 0.044715, %v9983_v54 }
 0x98c   :  { %v9990_v34 = vadd.f32 %v5463_v31, %v9960_v36  ;;  %v9993_v43 = vadd.f32 %v5536_v4, %v9963_v51  ;;  %v5465_v7 = vpop.f32.mrf.mxu1  ;;  %v5538_v50 = vpop.f32.mrf.mxu0 }
 0x98d   :  { %v5667_v42 = vmul.f32 %v5635_v30, %v9972_v13  ;;  %v5669_v3 = vmul.f32 %v5637_v9, %v9975_v32  ;;  %v5636_v60 = vmul.f32 %v5604_v52, %v9980_v41  ;;  %v10001_v58 = vadd.f32 %v5465_v7, %v9966_v44 }
 0x98e   :  { %v5607_v19 = vmul.f32 0.044715, %v9990_v34  ;;  %v5609_v47 = vmul.f32 0.044715, %v9993_v43  ;;  %v5469_v2 = vpop.f32.mrf.mxu1  ;;  %v5542_v22 = vpop.f32.mrf.mxu0  ;;  %v5638_v39 = vmul.f32 %v5606_v21, %v9983_v54  ;;  %v10010_v38 = vadd.f32 %v5538_v50, %v9969_v16 }
 0x98f   :  { %v5699_v14 = vadd.f32 %v5667_v42, %v9972_v13  ;;  %v5668_v62 = vmul.f32 %v5636_v60, %v9980_v41  ;;  %v5701_v33 = vadd.f32 %v5669_v3, %v9975_v32  ;;  %v5608_v26 = vmul.f32 0.044715, %v10001_v58 }
 0x990   :  { %v5639_v35 = vmul.f32 %v5607_v19, %v9990_v34  ;;  %v5471_v5 = vpop.f32.mrf.mxu1  ;;  %v10014_v29 = vadd.f32 %v5469_v2, %v9960_v36  ;;  %v5544_v49 = vpop.f32.mrf.mxu0  ;;  %v5641_v12 = vmul.f32 %v5609_v47, %v9993_v43  ;;  %v5670_v28 = vmul.f32 %v5638_v39, %v9983_v54 }
 0x991   :  { %v5700_v23 = vadd.f32 %v5668_v62, %v9980_v41  ;;  %v5731_v46 = vmul.f32 0.7978846, %v5699_v14  ;;  %v5640_v56 = vmul.f32 %v5608_v26, %v10001_v58  ;;  %v10022_v15 = vadd.f32 %v5542_v22, %v9963_v51 }
 0x992   :  { %v5671_v1 = vmul.f32 %v5639_v35, %v9990_v34  ;;  %v5611_v20 = vmul.f32 0.044715, %v10014_v29  ;;  %v5473_v59 = vpop.f32.mrf.mxu1  ;;  %v5733_v40 = vmul.f32 0.7978846, %v5701_v33  ;;  %v5610_v48 = vmul.f32 0.044715, %v10010_v38  ;;  %v5546_v4 = vpop.f32.mrf.mxu0 }
 0x993   :  { %v5732_v53 = vmul.f32 0.7978846, %v5700_v23  ;;  %v5672_v57 = vmul.f32 %v5640_v56, %v10001_v58  ;;  %v5613_v17 = vmul.f32 0.044715, %v10022_v15  ;;  %v10030_v31 = vadd.f32 %v5471_v5, %v9966_v44 }
 0x994   :  { %v5703_v24 = vadd.f32 %v5671_v1, %v9990_v34  ;;  %v5643_v55 = vmul.f32 %v5611_v20, %v10014_v29  ;;  %v5673_v30 = vmul.f32 %v5641_v12, %v9993_v43  ;;  %v10035_v52 = vadd.f32 %v5544_v49, %v9969_v16  ;;  %v5475_v3 = vpop.f32.mrf.mxu1  ;;  %v5548_v33 = vpop.f32.mrf.mxu0 }
 0x995   :  { %8040 = vtanh.f32 %v5732_v53  ;;  %v5704_v9 = vadd.f32 %v5672_v57, %v10001_v58  ;;  %v5645_v7 = vmul.f32 %v5613_v17, %v10022_v15  ;;  %v5612_v50 = vmul.f32 0.044715, %v10030_v31 }
 0x996   :  { %8042 = vtanh.f32 %v5731_v46  ;;  %v5675_v21 = vmul.f32 %v5643_v55, %v10014_v29  ;;  %v10041_v42 = vadd.f32 %v5473_v59, %v9960_v36  ;;  %v5735_v60 = vmul.f32 0.7978846, %v5703_v24 }
 0x997   :  { %v5736_v19 = vmul.f32 0.7978846, %v5704_v9  ;;  %v5642_v47 = vmul.f32 %v5610_v48, %v10010_v38  ;;  %v10045_v2 = vadd.f32 %v5546_v4, %v9963_v51  ;;  %v5644_v14 = vmul.f32 %v5612_v50, %v10030_v31 }
 0x998   :  { %v5707_v22 = vadd.f32 %v5675_v21, %v10014_v29  ;;  %v5614_v62 = vmul.f32 0.044715, %v10035_v52  ;;  %v5615_v39 = vmul.f32 0.044715, %v10041_v42  ;;  %v5705_v35 = vadd.f32 %v5673_v30, %v9993_v43 }
 0x999   :  { %8044 = vtanh.f32 %v5736_v19  ;;  %v5617_v26 = vmul.f32 0.044715, %v10045_v2  ;;  %v10054_v5 = vadd.f32 %v5475_v3, %v9966_v44  ;;  %v5677_v49 = vmul.f32 %v5645_v7, %v10022_v15 }
 0x99a   :  { %v5739_v23 = vmul.f32 0.7978846, %v5707_v22  ;;  %v5676_v46 = vmul.f32 %v5644_v14, %v10030_v31  ;;  %v5647_v1 = vmul.f32 %v5615_v39, %v10041_v42  ;;  %8046 = vtanh.f32 %v5735_v60 }
 0x99b   :  { %v5649_v12 = vmul.f32 %v5617_v26, %v10045_v2  ;;  %v5616_v56 = vmul.f32 0.044715, %v10054_v5  ;;  %v10062_v53 = vadd.f32 %v5548_v33, %v9969_v16  ;;  %v5646_v59 = vmul.f32 %v5614_v62, %v10035_v52 }
 0x99c   :  { %8048 = vtanh.f32 %v5739_v23  ;;  %v5708_v20 = vadd.f32 %v5676_v46, %v10030_v31  ;;  %v5679_v24 = vmul.f32 %v5647_v1, %v10041_v42  ;;  %v5702_v17 = vadd.f32 %v5670_v28, %v9983_v54 }
 0x99d   :  { %v5681_v57 = vmul.f32 %v5649_v12, %v10045_v2  ;;  %v5648_v48 = vmul.f32 %v5616_v56, %v10054_v5  ;;  %v5618_v55 = vmul.f32 0.044715, %v10062_v53  ;;  %v5709_v4 = vadd.f32 %v5677_v49, %v10022_v15 }
 0x99e   :  { %v5740_v30 = vmul.f32 0.7978846, %v5708_v20  ;;  %v5711_v9 = vadd.f32 %v5679_v24, %v10041_v42  ;;  %8050 = vtanh.f32 %v5733_v40  ;;  %v5737_v21 = vmul.f32 0.7978846, %v5705_v35 }
 0x99f   :  { %v5674_v7 = vmul.f32 %v5642_v47, %v10010_v38  ;;  %v5680_v50 = vmul.f32 %v5648_v48, %v10054_v5  ;;  %v5734_v3 = vmul.f32 0.7978846, %v5702_v17  ;;  %v5650_v19 = vmul.f32 %v5618_v55, %v10062_v53 }
 0x9a0   :  { %8052 = vtanh.f32 %v5740_v30  ;;  %v5743_v60 = vmul.f32 0.7978846, %v5711_v9  ;;  %v5713_v14 = vadd.f32 %v5681_v57, %v10045_v2  ;;  %v5741_v39 = vmul.f32 0.7978846, %v5709_v4 }
 0x9a1   :  { %v5712_v28 = vadd.f32 %v5680_v50, %v10054_v5  ;;  %8054 = vtanh.f32 %v5734_v3  ;;  %v5678_v40 = vmul.f32 %v5646_v59, %v10035_v52  ;;  %v5706_v47 = vadd.f32 %v5674_v7, %v10010_v38 }
 0x9a2   :  { %v8041_v22 = vpop.eup %8040  ;;  %8056 = vtanh.f32 %v5743_v60  ;;  %v5682_v35 = vmul.f32 %v5650_v19, %v10062_v53  ;;  %v5745_v23 = vmul.f32 0.7978846, %v5713_v14  ;;  %v5572_v1 = vmul.f32 0.5, %v9980_v41 }
 0x9a3   :  { %v8043_v62 = vpop.eup %8042  ;;  %v5744_v33 = vmul.f32 0.7978846, %v5712_v28  ;;  %8058 = vtanh.f32 %v5737_v21  ;;  %v5796_v26 = vadd.f32 1.0, %v8041_v22  ;;  %v5738_v49 = vmul.f32 0.7978846, %v5706_v47 }
 0x9a4   :  { %v5795_v12 = vadd.f32 1.0, %v8043_v62  ;;  %v5710_v56 = vadd.f32 %v5678_v40, %v10035_v52  ;;  %v5571_v59 = vmul.f32 0.5, %v9972_v13  ;;  %v5714_v48 = vadd.f32 %v5682_v35, %v10062_v53 }
 0x9a5   :  { %8060 = vtanh.f32 %v5744_v33  ;;  %v10084_v24 = vmul.f32 %v5796_v26, %v5572_v1  ;;  %v5576_v9 = vmul.f32 0.5, %v10001_v58  ;;  %v5573_v7 = vmul.f32 0.5, %v9975_v32 }
 0x9a6   :  { %v8045_v46 = vpop.eup %8044  ;;  %8062 = vtanh.f32 %v5741_v39  ;;  %v5742_v57 = vmul.f32 0.7978846, %v5710_v56  ;;  %v10087_v4 = vmul.f32 %v5795_v12, %v5571_v59  ;;  %v5746_v41 = vmul.f32 0.7978846, %v5714_v48 }
 0x9a7   :  { %8064 = vtanh.f32 %v5738_v49  ;;  %v8047_v20 = vpop.eup %8046  ;;  %v5800_v17 = vadd.f32 1.0, %v8045_v46  ;;  %v5575_v60 = vmul.f32 0.5, %v9990_v34  ;;  %v5580_v28 = vmul.f32 0.5, %v10030_v31 }
 0x9a8   :  { %8066 = vtanh.f32 %v5745_v23  ;;  %v5799_v21 = vadd.f32 1.0, %v8047_v20  ;;  %v5861_v13 = vadd.f32 %v10084_v24, %v10087_v4  ;;  %v5574_v32 = vmul.f32 0.5, %v9983_v54 }
 0x9a9   :  { %v8049_v55 = vpop.eup %8048  ;;  %8068 = vtanh.f32 %v5742_v57  ;;  %v10094_v19 = vmul.f32 %v5800_v17, %v5576_v9  ;;  %v5577_v34 = vmul.f32 0.5, %v9993_v43  ;;  %v5579_v26 = vmul.f32 0.5, %v10014_v29 }
 0x9aa   :  { %8070 = vtanh.f32 %v5746_v41  ;;  %v5803_v62 = vadd.f32 1.0, %v8049_v55  ;;  %v10100_v33 = vmul.f32 %v5799_v21, %v5575_v60  ;;  %v5583_v56 = vmul.f32 0.5, %v10041_v42 }
 0x9ab   :  { %v8051_v30 = vpop.eup %8050  ;;  %v5584_v29 = vmul.f32 0.5, %v10054_v5  ;;  %v5578_v55 = vmul.f32 0.5, %v10010_v38  ;;  %v5581_v17 = vmul.f32 0.5, %v10022_v15  ;;  %v5585_v38 = vmul.f32 0.5, %v10045_v2 }
 0x9ac   :  { %v5797_v50 = vadd.f32 1.0, %v8051_v30  ;;  %v5866_v46 = vadd.f32 %v10094_v19, %v10100_v33  ;;  %v10111_v12 = vmul.f32 %v5803_v62, %v5579_v26 }
 0x9ad   :  { %v8053_v3 = vpop.eup %8052 }
 0x9ae   :  { %v8055_v22 = vpop.eup %8054  ;;  %v10096_v14 = vmul.f32 %v5797_v50, %v5573_v7  ;;  %v5804_v58 = vadd.f32 1.0, %v8053_v3 }
 0x9af   :  { %v8057_v39 = vpop.eup %8056  ;;  %v5798_v40 = vadd.f32 1.0, %v8055_v22  ;;  %v5582_v22 = vmul.f32 0.5, %v10035_v52 }
 0x9b0   :  { %v8059_v47 = vpop.eup %8058  ;;  %v5862_v35 = vadd.f32 %v5861_v13, %v10096_v14  ;;  %v10105_v23 = vmul.f32 %v5804_v58, %v5580_v28  ;;  %v5807_v1 = vadd.f32 1.0, %v8057_v39 }
 0x9b1   :  { %v10107_v49 = vmul.f32 %v5798_v40, %v5574_v32  ;;  %v5801_v31 = vadd.f32 1.0, %v8059_v47  ;;  %v5586_v47 = vmul.f32 0.5, %v10062_v53 }
 0x9b2   :  { %v8061_v54 = vpop.eup %8060  ;;  %v5871_v30 = vadd.f32 %v10105_v23, %v10111_v12  ;;  %v10123_v21 = vmul.f32 %v5807_v1, %v5583_v56 }
 0x9b3   :  { %v8063_v20 = vpop.eup %8062  ;;  %v5863_v59 = vadd.f32 %v5862_v35, %v10107_v49  ;;  %v10115_v43 = vmul.f32 %v5801_v31, %v5577_v34  ;;  %v5808_v57 = vadd.f32 1.0, %v8061_v54 }
 0x9b4   :  { %v8065_v48 = vpop.eup %8064  ;;  %v5805_v41 = vadd.f32 1.0, %v8063_v20 }
 0x9b5   :  { %5864 = vadd.xlane.f32.xlu0 %v5863_v59  ;;  %v5802_v9 = vadd.f32 1.0, %v8065_v48  ;;  %v5867_v42 = vadd.f32 %v5866_v46, %v10115_v43  ;;  %v10125_v7 = vmul.f32 %v5808_v57, %v5584_v29  ;;  %v8067_v50 = vpop.eup %8066 }
 0x9b6   :  { %v10127_v5 = vmul.f32 %v5805_v41, %v5581_v17  ;;  %v8069_v13 = vpop.eup %8068  ;;  %v5809_v15 = vadd.f32 1.0, %v8067_v50 }
 0x9b7   :  { %v10129_v3 = vmul.f32 %v5802_v9, %v5578_v55  ;;  %v5876_v60 = vadd.f32 %v10125_v7, %v10123_v21  ;;  %v5806_v28 = vadd.f32 1.0, %v8069_v13  ;;  %v8071_v58 = vpop.eup %8070 }
 0x9b8   :  { %v5872_v62 = vadd.f32 %v5871_v30, %v10127_v5  ;;  %v10137_v32 = vmul.f32 %v5809_v15, %v5585_v38  ;;  %v5810_v35 = vadd.f32 1.0, %v8071_v58 }
 0x9b9   :  { %v5868_v39 = vadd.f32 %v5867_v42, %v10129_v3  ;;  %v10139_v40 = vmul.f32 %v5806_v28, %v5582_v22 }
 0x9ba   :  { %v5877_v26 = vadd.f32 %v5876_v60, %v10137_v32  ;;  %v10150_v1 = vmul.f32 %v5810_v35, %v5586_v47 }
 0x9bb   :  { %v5479_v2 = vpop.f32.mrf.mxu1  ;;  %v5552_v34 = vpop.f32.mrf.mxu0  ;;  %5869 = vadd.xlane.f32.xlu1 %v5868_v39  ;;  %v5873_v46 = vadd.f32 %v5872_v62, %v10139_v40 }
 0x9bc   :  { %v10144_v52 = vadd.f32 %v5479_v2, %v9960_v36  ;;  %v10147_v31 = vadd.f32 %v5552_v34, %v9963_v51  ;;  %v5878_v57 = vadd.f32 %v5877_v26, %v10150_v1 }
 0x9bd   :  { %v5481_v54 = vpop.f32.mrf.mxu1  ;;  %v5554_v56 = vpop.f32.mrf.mxu0  ;;  %5874 = vadd.xlane.f32.xlu0 %v5873_v46 }
 0x9be   :  { %v5619_v53 = vmul.f32 0.044715, %v10144_v52  ;;  %v5621_v20 = vmul.f32 0.044715, %v10147_v31  ;;  %v10155_v59 = vadd.f32 %v5481_v54, %v9966_v44  ;;  %v10158_v29 = vadd.f32 %v5554_v56, %v9969_v16 }
 0x9bf   :  { %v5483_v48 = vpop.f32.mrf.mxu1  ;;  %v5556_v55 = vpop.f32.mrf.mxu0  ;;  %5879 = vadd.xlane.f32.xlu1 %v5878_v57 }
 0x9c0   :  { %v5651_v17 = vmul.f32 %v5619_v53, %v10144_v52  ;;  %v5653_v41 = vmul.f32 %v5621_v20, %v10147_v31  ;;  %v5620_v30 = vmul.f32 0.044715, %v10155_v59  ;;  %v5622_v9 = vmul.f32 0.044715, %v10158_v29 }
 0x9c1   :  { %v10166_v42 = vadd.f32 %v5483_v48, %v9960_v36  ;;  %v10169_v50 = vadd.f32 %v5556_v55, %v9963_v51  ;;  %v5485_v13 = vpop.f32.mrf.mxu1  ;;  %v5558_v38 = vpop.f32.mrf.mxu0 }
 0x9c2   :  { %v5683_v15 = vmul.f32 %v5651_v17, %v10144_v52  ;;  %v5685_v60 = vmul.f32 %v5653_v41, %v10147_v31  ;;  %v5652_v22 = vmul.f32 %v5620_v30, %v10155_v59  ;;  %v10177_v58 = vadd.f32 %v5485_v13, %v9966_v44 }
 0x9c3   :  { %v5623_v28 = vmul.f32 0.044715, %v10166_v42  ;;  %v5625_v62 = vmul.f32 0.044715, %v10169_v50  ;;  %v5489_v39 = vpop.f32.mrf.mxu1  ;;  %v5562_v47 = vpop.f32.mrf.mxu0  ;;  %v5654_v34 = vmul.f32 %v5622_v9, %v10158_v29  ;;  %v10186_v56 = vadd.f32 %v5558_v38, %v9969_v16 }
 0x9c4   :  { %v5715_v35 = vadd.f32 %v5683_v15, %v10144_v52  ;;  %v5684_v2 = vmul.f32 %v5652_v22, %v10155_v59  ;;  %v5717_v26 = vadd.f32 %v5685_v60, %v10147_v31  ;;  %v5624_v54 = vmul.f32 0.044715, %v10177_v58 }
 0x9c5   :  { %v5655_v46 = vmul.f32 %v5623_v28, %v10166_v42  ;;  %v5491_v53 = vpop.f32.mrf.mxu1  ;;  %v10190_v57 = vadd.f32 %v5489_v39, %v9960_v36  ;;  %v5564_v48 = vpop.f32.mrf.mxu0  ;;  %v5657_v41 = vmul.f32 %v5625_v62, %v10169_v50  ;;  %v5686_v13 = vmul.f32 %v5654_v34, %v10158_v29 }
 0x9c6   :  { %v5716_v20 = vadd.f32 %v5684_v2, %v10155_v59  ;;  %v5747_v55 = vmul.f32 0.7978846, %v5715_v35  ;;  %v5656_v30 = vmul.f32 %v5624_v54, %v10177_v58  ;;  %v10198_v15 = vadd.f32 %v5562_v47, %v9963_v51 }
 0x9c7   :  { %v5687_v17 = vmul.f32 %v5655_v46, %v10166_v42  ;;  %v5627_v38 = vmul.f32 0.044715, %v10190_v57  ;;  %v5493_v60 = vpop.f32.mrf.mxu1  ;;  %v5749_v22 = vmul.f32 0.7978846, %v5717_v26  ;;  %v5626_v35 = vmul.f32 0.044715, %v10186_v56  ;;  %v5566_v46 = vpop.f32.mrf.mxu0 }
 0x9c8   :  { %v5748_v9 = vmul.f32 0.7978846, %v5716_v20  ;;  %v5688_v39 = vmul.f32 %v5656_v30, %v10177_v58  ;;  %v5629_v2 = vmul.f32 0.044715, %v10198_v15  ;;  %v10206_v34 = vadd.f32 %v5491_v53, %v9966_v44 }
 0x9c9   :  { %v5719_v28 = vadd.f32 %v5687_v17, %v10166_v42  ;;  %v5659_v62 = vmul.f32 %v5627_v38, %v10190_v57  ;;  %v5689_v47 = vmul.f32 %v5657_v41, %v10169_v50  ;;  %v10211_v54 = vadd.f32 %v5564_v48, %v9969_v16  ;;  %v5495_v53 = vpop.f32.mrf.mxu1  ;;  %v5568_v45 = vpop.f32.mrf.mxu0 }
 0x9ca   :  { %8072 = vtanh.f32 %v5748_v9  ;;  %v5720_v26 = vadd.f32 %v5688_v39, %v10177_v58  ;;  %v5661_v17 = vmul.f32 %v5629_v2, %v10198_v15  ;;  %v5628_v30 = vmul.f32 0.044715, %v10206_v34 }
 0x9cb   :  { %8074 = vtanh.f32 %v5747_v55  ;;  %v5691_v20 = vmul.f32 %v5659_v62, %v10190_v57  ;;  %v10217_v9 = vadd.f32 %v5493_v60, %v9960_v36  ;;  %v5751_v38 = vmul.f32 0.7978846, %v5719_v28 }
 0x9cc   :  { %v5752_v10 = vmul.f32 0.7978846, %v5720_v26  ;;  %v5658_v55 = vmul.f32 %v5626_v35, %v10186_v56  ;;  %v10221_v41 = vadd.f32 %v5566_v46, %v9963_v51  ;;  %v5660_v39 = vmul.f32 %v5628_v30, %v10206_v34 }
 0x9cd   :  { %v5723_v48 = vadd.f32 %v5691_v20, %v10190_v57  ;;  %v5630_v62 = vmul.f32 0.044715, %v10211_v54  ;;  %v5631_v2 = vmul.f32 0.044715, %v10217_v9  ;;  %v5721_v36 = vadd.f32 %v5689_v47, %v10169_v50 }
 0x9ce   :  { %8076 = vtanh.f32 %v5752_v10  ;;  %v5633_v60 = vmul.f32 0.044715, %v10221_v41  ;;  %v10230_v28 = vadd.f32 %v5495_v53, %v9966_v44  ;;  %v5693_v51 = vmul.f32 %v5661_v17, %v10198_v15 }
 0x9cf   :  { %v5755_v35 = vmul.f32 0.7978846, %v5723_v48  ;;  %v5692_v46 = vmul.f32 %v5660_v39, %v10206_v34  ;;  %v5663_v26 = vmul.f32 %v5631_v2, %v10217_v9  ;;  %8078 = vtanh.f32 %v5751_v38 }
 0x9d0   :  { %v5665_v20 = vmul.f32 %v5633_v60, %v10221_v41  ;;  %v5632_v30 = vmul.f32 0.044715, %v10230_v28  ;;  %v10238_v47 = vadd.f32 %v5568_v45, %v9969_v16  ;;  %v5662_v44 = vmul.f32 %v5630_v62, %v10211_v54 }
 0x9d1   :  { %8080 = vtanh.f32 %v5755_v35  ;;  %v5724_v10 = vadd.f32 %v5692_v46, %v10206_v34  ;;  %v5695_v53 = vmul.f32 %v5663_v26, %v10217_v9  ;;  %v5718_v39 = vadd.f32 %v5686_v13, %v10158_v29 }
 0x9d2   :  { %v5697_v17 = vmul.f32 %v5665_v20, %v10221_v41  ;;  %v5664_v48 = vmul.f32 %v5632_v30, %v10230_v28  ;;  %v5634_v38 = vmul.f32 0.044715, %v10238_v47  ;;  %v5725_v2 = vadd.f32 %v5693_v51, %v10198_v15 }
 0x9d3   :  { %v5756_v60 = vmul.f32 0.7978846, %v5724_v10  ;;  %v5727_v45 = vadd.f32 %v5695_v53, %v10217_v9  ;;  %8082 = vtanh.f32 %v5749_v22  ;;  %v5753_v16 = vmul.f32 0.7978846, %v5721_v36 }
 0x9d4   :  { %v5690_v35 = vmul.f32 %v5658_v55, %v10186_v56  ;;  %v5696_v62 = vmul.f32 %v5664_v48, %v10230_v28  ;;  %v5750_v46 = vmul.f32 0.7978846, %v5718_v39  ;;  %v5666_v20 = vmul.f32 %v5634_v38, %v10238_v47 }
 0x9d5   :  { %8084 = vtanh.f32 %v5756_v60  ;;  %v5759_v26 = vmul.f32 0.7978846, %v5727_v45  ;;  %v5729_v63 = vadd.f32 %v5697_v17, %v10221_v41  ;;  %v5757_v10 = vmul.f32 0.7978846, %v5725_v2 }
 0x9d6   :  { %v5728_v13 = vadd.f32 %v5696_v62, %v10230_v28  ;;  %8086 = vtanh.f32 %v5750_v46  ;;  %v5694_v22 = vmul.f32 %v5662_v44, %v10211_v54  ;;  %v5722_v55 = vadd.f32 %v5690_v35, %v10186_v56 }
 0x9d7   :  { %v8073_v30 = vpop.eup %8072  ;;  %8088 = vtanh.f32 %v5759_v26  ;;  %v5698_v53 = vmul.f32 %v5666_v20, %v10238_v47  ;;  %v5761_v39 = vmul.f32 0.7978846, %v5729_v63  ;;  %v5588_v17 = vmul.f32 0.5, %v10155_v59 }
 0x9d8   :  { %v8075_v51 = vpop.eup %8074  ;;  %v5760_v36 = vmul.f32 0.7978846, %v5728_v13  ;;  %8090 = vtanh.f32 %v5753_v16  ;;  %v5812_v48 = vadd.f32 1.0, %v8073_v30  ;;  %v5754_v38 = vmul.f32 0.7978846, %v5722_v55 }
 0x9d9   :  { %v5811_v45 = vadd.f32 1.0, %v8075_v51  ;;  %v5726_v62 = vadd.f32 %v5694_v22, %v10211_v54  ;;  %v5587_v2 = vmul.f32 0.5, %v10144_v52  ;;  %v5730_v35 = vadd.f32 %v5698_v53, %v10238_v47 }
 0x9da   :  { %8092 = vtanh.f32 %v5760_v36  ;;  %v10260_v46 = vmul.f32 %v5812_v48, %v5588_v17  ;;  %v5592_v13 = vmul.f32 0.5, %v10177_v58  ;;  %v5591_v55 = vmul.f32 0.5, %v10166_v42 }
 0x9db   :  { %v8077_v60 = vpop.eup %8076  ;;  %8094 = vtanh.f32 %v5757_v10  ;;  %v5758_v16 = vmul.f32 0.7978846, %v5726_v62  ;;  %v10263_v20 = vmul.f32 %v5811_v45, %v5587_v2  ;;  %v5762_v59 = vmul.f32 0.7978846, %v5730_v35 }
 0x9dc   :  { %8096 = vtanh.f32 %v5754_v38  ;;  %v8079_v44 = vpop.eup %8078  ;;  %v5816_v63 = vadd.f32 1.0, %v8077_v60  ;;  %v5589_v10 = vmul.f32 0.5, %v10147_v31  ;;  %v5596_v38 = vmul.f32 0.5, %v10206_v34 }
 0x9dd   :  { %8098 = vtanh.f32 %v5761_v39  ;;  %v5815_v51 = vadd.f32 1.0, %v8079_v44  ;;  %v5881_v52 = vadd.f32 %v10260_v46, %v10263_v20  ;;  %v5590_v31 = vmul.f32 0.5, %v10158_v29 }
 0x9de   :  { %v8081_v26 = vpop.eup %8080  ;;  %8100 = vtanh.f32 %v5758_v16  ;;  %v10270_v53 = vmul.f32 %v5816_v63, %v5592_v13  ;;  %v5593_v42 = vmul.f32 0.5, %v10169_v50  ;;  %v5595_v16 = vmul.f32 0.5, %v10190_v57 }
 0x9df   :  { %8102 = vtanh.f32 %v5762_v59  ;;  %v5819_v60 = vadd.f32 1.0, %v8081_v26  ;;  %v10276_v62 = vmul.f32 %v5815_v51, %v5591_v55  ;;  %v5599_v13 = vmul.f32 0.5, %v10217_v9 }
 0x9e0   :  { %v8083_v30 = vpop.eup %8082  ;;  %v5600_v57 = vmul.f32 0.5, %v10230_v28  ;;  %v5597_v55 = vmul.f32 0.5, %v10198_v15 }
 0x9e1   :  { %v5813_v22 = vadd.f32 1.0, %v8083_v30  ;;  %v5886_v26 = vadd.f32 %v10270_v53, %v10276_v62  ;;  %v10287_v30 = vmul.f32 %v5819_v60, %v5595_v16 }
 0x9e2   :  { %v8085_v36 = vpop.eup %8084 }
 0x9e3   :  { %v8087_v48 = vpop.eup %8086  ;;  %v10272_v39 = vmul.f32 %v5813_v22, %v5589_v10  ;;  %v5820_v58 = vadd.f32 1.0, %v8085_v36  ;;  %v5594_v36 = vmul.f32 0.5, %v10186_v56  ;;  %v5601_v56 = vmul.f32 0.5, %v10221_v41 }
 0x9e4   :  { %v8089_v17 = vpop.eup %8088  ;;  %v5814_v45 = vadd.f32 1.0, %v8087_v48 }
 0x9e5   :  { %v8091_v44 = vpop.eup %8090  ;;  %v5882_v2 = vadd.f32 %v5881_v52, %v10272_v39  ;;  %v10281_v35 = vmul.f32 %v5820_v58, %v5596_v38  ;;  %v5823_v59 = vadd.f32 1.0, %v8089_v17 }
 0x9e6   :  { %v10283_v63 = vmul.f32 %v5814_v45, %v5590_v31  ;;  %v5817_v34 = vadd.f32 1.0, %v8091_v44 }
 0x9e7   :  { %v8093_v29 = vpop.eup %8092  ;;  %v5891_v38 = vadd.f32 %v10281_v35, %v10287_v30  ;;  %v10299_v58 = vmul.f32 %v5823_v59, %v5599_v13 }
 0x9e8   :  { %v8095_v51 = vpop.eup %8094  ;;  %v5883_v10 = vadd.f32 %v5882_v2, %v10283_v63  ;;  %v10291_v50 = vmul.f32 %v5817_v34, %v5593_v42  ;;  %v5824_v22 = vadd.f32 1.0, %v8093_v29  ;;  %v5598_v42 = vmul.f32 0.5, %v10211_v54 }
 0x9e9   :  { %v8097_v52 = vpop.eup %8096  ;;  %v5821_v48 = vadd.f32 1.0, %v8095_v51  ;;  %v5602_v51 = vmul.f32 0.5, %v10238_v47 }
 0x9ea   :  { %5884 = vadd.xlane.f32.xlu0 %v5883_v10  ;;  %v5818_v60 = vadd.f32 1.0, %v8097_v52  ;;  %v5887_v9 = vadd.f32 %v5886_v26, %v10291_v50  ;;  %v10301_v17 = vmul.f32 %v5824_v22, %v5600_v57  ;;  %v8099_v31 = vpop.eup %8098  ;;  %v7720_v52 = vld [vmem:[#allocation18 + $0x78] sm:$0xff]  }
 0x9eb   :  { %v10303_v28 = vmul.f32 %v5821_v48, %v5597_v55  ;;  %v8101_v45 = vpop.eup %8100  ;;  %v5825_v15 = vadd.f32 1.0, %v8099_v31  ;;  %7073 = vmatprep.subr.bf16.mxu1 %v7720_v52 }
 0x9ec   :  { %v10305_v44 = vmul.f32 %v5818_v60, %v5594_v36  ;;  %v5896_v2 = vadd.f32 %v10301_v17, %v10299_v58  ;;  %v5822_v16 = vadd.f32 1.0, %v8101_v45  ;;  %v8103_v26 = vpop.eup %8102  ;;  %v10323_v36 = vld [vmem:[#allocation18 + $0xf8] sm:$0xff]  }
 0x9ed   :  { %v5892_v34 = vadd.f32 %v5891_v38, %v10303_v28  ;;  %v10313_v29 = vmul.f32 %v5825_v15, %v5601_v56  ;;  %v5826_v10 = vadd.f32 1.0, %v8103_v26  ;;  %7113 = vmatprep.subr.bf16.mxu0 %v10323_v36 }
 0x9ee   :  { %v5888_v59 = vadd.f32 %v5887_v9, %v10305_v44  ;;  %v10315_v13 = vmul.f32 %v5822_v16, %v5598_v42 }
 0x9ef   :  { %v5897_v41 = vadd.f32 %v5896_v2, %v10313_v29  ;;  %v10320_v22 = vmul.f32 %v5826_v10, %v5602_v51 }
 0x9f0   :  { %5889 = vadd.xlane.f32.xlu1 %v5888_v59  ;;  %v5893_v57 = vadd.f32 %v5892_v34, %v10315_v13 }
 0x9f1   :  { %v5898_v54 = vadd.f32 %v5897_v41, %v10320_v22 }
 0x9f2   :  { %5894 = vadd.xlane.f32.xlu0 %v5893_v57 }
 0x9f4   :  { %5899 = vadd.xlane.f32.xlu1 %v5898_v54 }
 0xa3e   :  { %v5865_v55 = vpop.xlane.xlu0 %5864 }
 0xa3f   :  { %v5902_v47 = vmul.f32 0.001953125, %v5865_v55 }
 0xa41   :  { %v10327_v48 = vsub.f32 %v10087_v4, %v5902_v47  ;;  %v10330_v38 = vsub.f32 %v10084_v24, %v5902_v47  ;;  %v10333_v60 = vsub.f32 %v10096_v14, %v5902_v47  ;;  %v10336_v9 = vsub.f32 %v10107_v49, %v5902_v47 }
 0xa43   :  { %v5942_v31 = vmul.f32 %v10327_v48, %v10327_v48  ;;  %v5943_v45 = vmul.f32 %v10330_v38, %v10330_v38  ;;  %v5944_v4 = vmul.f32 %v10333_v60, %v10333_v60  ;;  %v5945_v24 = vmul.f32 %v10336_v9, %v10336_v9 }
 0xa44   :  { %v5870_v56 = vpop.xlane.xlu1 %5869 }
 0xa45   :  { %v5903_v15 = vmul.f32 0.001953125, %v5870_v56  ;;  %v5974_v2 = vadd.f32 %v5943_v45, %v5942_v31 }
 0xa46   :  { %v5875_v16 = vpop.xlane.xlu0 %5874 }
 0xa47   :  { %v10347_v14 = vsub.f32 %v10100_v33, %v5903_v15  ;;  %v10350_v49 = vsub.f32 %v10094_v19, %v5903_v15  ;;  %v10353_v42 = vsub.f32 %v10115_v43, %v5903_v15  ;;  %v5975_v34 = vadd.f32 %v5974_v2, %v5944_v4 }
 0xa48   :  { %v5904_v26 = vmul.f32 0.001953125, %v5875_v16  ;;  %v5880_v59 = vpop.xlane.xlu1 %5879  ;;  %v10356_v10 = vsub.f32 %v10129_v3, %v5903_v15 }
 0xa49   :  { %v5976_v51 = vadd.f32 %v5975_v34, %v5945_v24  ;;  %v5946_v41 = vmul.f32 %v10347_v14, %v10347_v14  ;;  %v5947_v33 = vmul.f32 %v10350_v49, %v10350_v49  ;;  %v5905_v57 = vmul.f32 0.001953125, %v5880_v59 }
 0xa4a   :  { %v10363_v19 = vsub.f32 %v10111_v12, %v5904_v26  ;;  %v10366_v43 = vsub.f32 %v10105_v23, %v5904_v26  ;;  %v10369_v54 = vsub.f32 %v10127_v5, %v5904_v26  ;;  %v5948_v3 = vmul.f32 %v10353_v42, %v10353_v42 }
 0xa4b   :  { %5977 = vadd.xlane.f32.xlu0 %v5976_v51  ;;  %v5979_v52 = vadd.f32 %v5947_v33, %v5946_v41  ;;  %v10374_v55 = vsub.f32 %v10123_v21, %v5905_v57  ;;  %v10377_v47 = vsub.f32 %v10125_v7, %v5905_v57  ;;  %v10380_v12 = vsub.f32 %v10137_v32, %v5905_v57  ;;  %v7722_v41 = vld [vmem:[#allocation18 + $0x38] sm:$0xff]  }
 0xa4c   :  { %v5950_v23 = vmul.f32 %v10363_v19, %v10363_v19  ;;  %v5949_v5 = vmul.f32 %v10356_v10, %v10356_v10  ;;  %v10387_v45 = vsub.f32 %v10139_v40, %v5904_v26  ;;  %v5951_v21 = vmul.f32 %v10366_v43, %v10366_v43  ;;  %v10406_v33 = vld [vmem:[#allocation18 + $0xb8] sm:$0xff]   ;;  %7074 = vmatpush3.bf16.msra.mxu1 %v7722_v41  ;;  %v7744_v41 = vld [vmem:[#allocation18 + $0x48] sm:$0xff]  }
 0xa4d   :  { %v5980_v31 = vadd.f32 %v5979_v52, %v5948_v3  ;;  %v10392_v56 = vsub.f32 %v10150_v1, %v5905_v57  ;;  %v5954_v7 = vmul.f32 %v10374_v55, %v10374_v55  ;;  %v5955_v32 = vmul.f32 %v10377_v47, %v10377_v47  ;;  %v7724_v57 = vld [vmem:[#allocation18 + $0x70] sm:$0xff]   ;;  %7114 = vmatpush3.bf16.msra.mxu0 %v10406_v33 }
 0xa4e   :  { %v5952_v4 = vmul.f32 %v10369_v54, %v10369_v54  ;;  %v5984_v2 = vadd.f32 %v5951_v21, %v5950_v23  ;;  %v5956_v40 = vmul.f32 %v10380_v12, %v10380_v12  ;;  %v5953_v1 = vmul.f32 %v10387_v45, %v10387_v45  ;;  %v10408_v3 = vld [vmem:[#allocation18 + $0xf0] sm:$0xff]   ;;  %7075 = vmatprep.subr.bf16.mxu1 %v7724_v57  ;;  %v7730_v21 = vld [vmem:[#allocation18 + $0x28] sm:$0xff]  }
 0xa4f   :  { %v5981_v15 = vadd.f32 %v5980_v31, %v5949_v5  ;;  %v5989_v24 = vadd.f32 %v5955_v32, %v5954_v7  ;;  %v5957_v34 = vmul.f32 %v10392_v56, %v10392_v56  ;;  %7115 = vmatprep.subr.bf16.mxu0 %v10408_v3  ;;  %v7726_v52 = vld [vmem:[#allocation18 + $0x30] sm:$0xff]   ;;  %v7728_v5 = vld [vmem:[#allocation18 + $0x68] sm:$0xff]   ;;  %v7732_v32 = vld [vmem:[#allocation18 + $0x60] sm:$0xff]  }
 0xa50   :  { %v5985_v16 = vadd.f32 %v5984_v2, %v5952_v4  ;;  %v10412_v23 = vld [vmem:[#allocation18 + $0xb0] sm:$0xff]   ;;  %v10414_v31 = vld [vmem:[#allocation18 + $0xe8] sm:$0xff]   ;;  %7076 = vmatpush3.bf16.msra.mxu1 %v7726_v52  ;;  %v7734_v4 = vld [vmem:[#allocation18 + $0x20] sm:$0xff]  }
 0xa51   :  { %5982 = vadd.xlane.f32.xlu1 %v5981_v15  ;;  %v5990_v26 = vadd.f32 %v5989_v24, %v5956_v40  ;;  %7116 = vmatpush3.bf16.msra.mxu0 %v10412_v23  ;;  %v10418_v7 = vld [vmem:[#allocation18 + $0xa8] sm:$0xff]   ;;  %v10420_v15 = vld [vmem:[#allocation18 + $0xe0] sm:$0xff]   ;;  %v7736_v40 = vld [vmem:[#allocation18 + $0x58] sm:$0xff]  }
 0xa52   :  { %v5986_v59 = vadd.f32 %v5985_v16, %v5953_v1  ;;  %7077 = vmatprep.subr.bf16.mxu1 %v7728_v5  ;;  %7117 = vmatprep.subr.bf16.mxu0 %v10414_v31  ;;  %v10423_v2 = vld [vmem:[#allocation18 + $0xa0] sm:$0xff]   ;;  %v10426_v24 = vld [vmem:[#allocation18 + $0xd8] sm:$0xff]   ;;  %v10438_v57 = vld [vmem:[#allocation18 + $0xc8] sm:$0xff]  }
 0xa53   :  { %v5991_v51 = vadd.f32 %v5990_v26, %v5957_v34  ;;  %v7738_v1 = vld [vmem:[#allocation18 + $0x18] sm:$0xff]   ;;  %v7740_v34 = vld [vmem:[#allocation18 + $0x50] sm:$0xff]   ;;  %v7746_v52 = vld [vmem:[#allocation18 + $0x8] sm:$0xff]  }
 0xa54   :  { %5987 = vadd.xlane.f32.xlu0 %v5986_v59  ;;  %7078 = vmatpush3.bf16.msra.mxu1 %v7730_v21  ;;  %v10429_v16 = vld [vmem:[#allocation18 + $0x98] sm:$0xff]   ;;  %v10432_v26 = vld [vmem:[#allocation18 + $0xd0] sm:$0xff]   ;;  %v10441_v5 = vld [vmem:[#allocation18 + $0x88] sm:$0xff]  }
 0xa55   :  { %5992 = vadd.xlane.f32.xlu1 %v5991_v51  ;;  %7118 = vmatpush3.bf16.msra.mxu0 %v10418_v7  ;;  %v7742_v59 = vld [vmem:[#allocation18 + $0x10] sm:$0xff]   ;;  %v7748_v21 = vld [vmem:[#allocation18 + $0x40] sm:$0xff]  }
 0xa56   :  { %7079 = vmatprep.subr.bf16.mxu1 %v7732_v32  ;;  %7119 = vmatprep.subr.bf16.mxu0 %v10420_v15  ;;  %v10435_v51 = vld [vmem:[#allocation18 + $0x90] sm:$0xff]  }
 0xa58   :  { %7080 = vmatpush3.bf16.msra.mxu1 %v7734_v4  ;;  %v10444_v4 = vld [vmem:[#allocation18 + $0xc0] sm:$0xff]  }
 0xa59   :  { %7120 = vmatpush3.bf16.msra.mxu0 %v10423_v2  ;;  %7081 = vmatprep.subr.bf16.mxu1 %v7736_v40 }
 0xa5a   :  { %7121 = vmatprep.subr.bf16.mxu0 %v10426_v24 }
 0xa5c   :  { %7082 = vmatpush3.bf16.msra.mxu1 %v7738_v1  ;;  %v7750_v1 = vld [vmem:[#allocation18] sm:$0xff]  }
 0xa5d   :  { %7122 = vmatpush3.bf16.msra.mxu0 %v10429_v16  ;;  %7083 = vmatprep.subr.bf16.mxu1 %v7740_v34  ;;  %v10447_v34 = vld [vmem:[#allocation18 + $0x80] sm:$0xff]  }
 0xa5e   :  { %7123 = vmatprep.subr.bf16.mxu0 %v10432_v26 }
 0xa60   :  { %7084 = vmatpush3.bf16.msra.mxu1 %v7742_v59 }
 0xa61   :  { %7124 = vmatpush3.bf16.msra.mxu0 %v10435_v51  ;;  %7085 = vmatprep.subr.bf16.mxu1 %v7744_v41 }
 0xa62   :  { %7125 = vmatprep.subr.bf16.mxu0 %v10438_v57 }
 0xa64   :  { %7086 = vmatpush3.bf16.msra.mxu1 %v7746_v52 }
 0xa65   :  { %7126 = vmatpush3.bf16.msra.mxu0 %v10441_v5  ;;  %7087 = vmatprep.subr.bf16.mxu1 %v7748_v21 }
 0xa66   :  { %7127 = vmatprep.subr.bf16.mxu0 %v10444_v4 }
 0xa68   :  { %7088 = vmatpush3.bf16.msra.mxu1 %v7750_v1 }
 0xa69   :  { %7128 = vmatpush3.bf16.msra.mxu0 %v10447_v34  ;;  %7585 = vmatprep.subr.bf16.mxu1 %v10323_v36 }
 0xa73   :  { %v5885_v32 = vpop.xlane.xlu0 %5884 }
 0xa74   :  { %v5906_v40 = vmul.f32 0.001953125, %v5885_v32 }
 0xa76   :  { %v10450_v59 = vsub.f32 %v10263_v20, %v5906_v40  ;;  %v10453_v37 = vsub.f32 %v10260_v46, %v5906_v40  ;;  %v10456_v41 = vsub.f32 %v10272_v39, %v5906_v40  ;;  %v10459_v8 = vsub.f32 %v10283_v63, %v5906_v40 }
 0xa78   :  { %10855 = vst [vmem:[#allocation28_spill] sm:$0xff] %v10450_v59  ;;  %10856 = vst [vmem:[#allocation34_spill] sm:$0xff] %v10456_v41  ;;  %v5958_v52 = vmul.f32 %v10450_v59, %v10450_v59  ;;  %v5959_v32 = vmul.f32 %v10453_v37, %v10453_v37  ;;  %v5960_v39 = vmul.f32 %v10456_v41, %v10456_v41 }
 0xa79   :  { %10857 = vst [vmem:[#allocation65_spill] sm:$0xff] %v10459_v8  ;;  %v5890_v20 = vpop.xlane.xlu1 %5889  ;;  %v5961_v63 = vmul.f32 %v10459_v8, %v10459_v8 }
 0xa7a   :  { %v5907_v46 = vmul.f32 0.001953125, %v5890_v20  ;;  %v5994_v21 = vadd.f32 %v5959_v32, %v5958_v52 }
 0xa7b   :  { %v5895_v6 = vpop.xlane.xlu0 %5894 }
 0xa7c   :  { %v10473_v40 = vsub.f32 %v10276_v62, %v5907_v46  ;;  %v10476_v25 = vsub.f32 %v10270_v53, %v5907_v46  ;;  %v10479_v1 = vsub.f32 %v10291_v50, %v5907_v46  ;;  %v5995_v20 = vadd.f32 %v5994_v21, %v5960_v39 }
 0xa7d   :  { %v5908_v27 = vmul.f32 0.001953125, %v5895_v6  ;;  %v5900_v59 = vpop.xlane.xlu1 %5899  ;;  %v10482_v52 = vsub.f32 %v10305_v44, %v5907_v46 }
 0xa7e   :  { %10858 = vst [vmem:[#allocation30_spill] sm:$0xff] %v10479_v1  ;;  %v5996_v41 = vadd.f32 %v5995_v20, %v5961_v63  ;;  %v5962_v36 = vmul.f32 %v10473_v40, %v10473_v40  ;;  %v5963_v62 = vmul.f32 %v10476_v25, %v10476_v25  ;;  %v5909_v32 = vmul.f32 0.001953125, %v5900_v59 }
 0xa7f   :  { %v10489_v53 = vsub.f32 %v10287_v30, %v5908_v27  ;;  %v10492_v50 = vsub.f32 %v10281_v35, %v5908_v27  ;;  %v10495_v6 = vsub.f32 %v10303_v28, %v5908_v27  ;;  %v5964_v44 = vmul.f32 %v10479_v1, %v10479_v1 }
 0xa80   :  { %5997 = vadd.xlane.f32.xlu0 %v5996_v41  ;;  %v5999_v46 = vadd.f32 %v5963_v62, %v5962_v36  ;;  %v10500_v39 = vsub.f32 %v10299_v58, %v5909_v32  ;;  %v10503_v21 = vsub.f32 %v10301_v17, %v5909_v32  ;;  %v10506_v30 = vsub.f32 %v10313_v29, %v5909_v32 }
 0xa81   :  { %10859 = vst [vmem:[#allocation35_spill] sm:$0xff] %v10495_v6  ;;  %v5966_v35 = vmul.f32 %v10489_v53, %v10489_v53  ;;  %v5965_v28 = vmul.f32 %v10482_v52, %v10482_v52  ;;  %v10513_v41 = vsub.f32 %v10315_v13, %v5908_v27  ;;  %v5967_v58 = vmul.f32 %v10492_v50, %v10492_v50 }
 0xa82   :  { %10860 = vst [vmem:[#allocation31_spill] sm:$0xff] %v10506_v30  ;;  %v6000_v59 = vadd.f32 %v5999_v46, %v5964_v44  ;;  %v10518_v63 = vsub.f32 %v10320_v22, %v5909_v32  ;;  %v5970_v17 = vmul.f32 %v10500_v39, %v10500_v39  ;;  %v5971_v29 = vmul.f32 %v10503_v21, %v10503_v21 }
 0xa83   :  { %10861 = vst [vmem:[#allocation37_spill] sm:$0xff] %v10513_v41  ;;  %v5968_v36 = vmul.f32 %v10495_v6, %v10495_v6  ;;  %v6004_v62 = vadd.f32 %v5967_v58, %v5966_v35  ;;  %v5972_v27 = vmul.f32 %v10506_v30, %v10506_v30  ;;  %v5969_v22 = vmul.f32 %v10513_v41, %v10513_v41 }
 0xa84   :  { %v6001_v20 = vadd.f32 %v6000_v59, %v5965_v28  ;;  %v6009_v13 = vadd.f32 %v5971_v29, %v5970_v17  ;;  %v5973_v44 = vmul.f32 %v10518_v63, %v10518_v63 }
 0xa85   :  { %v6005_v32 = vadd.f32 %v6004_v62, %v5968_v36 }
 0xa86   :  { %6002 = vadd.xlane.f32.xlu1 %v6001_v20  ;;  %v6010_v46 = vadd.f32 %v6009_v13, %v5972_v27 }
 0xa87   :  { %v6006_v1 = vadd.f32 %v6005_v32, %v5969_v22  ;;  %v5860_v22 = vld [vmem:[%s10711_s11] sm:$0xf] }
 0xa88   :  { %v6011_v8 = vadd.f32 %v6010_v46, %v5973_v44 }
 0xa89   :  { %6007 = vadd.xlane.f32.xlu0 %v6006_v1  ;;  %v5859_v1 = vld [vmem:[%s10710_s10] sm:$0xf] }
 0xa8a   :  { %6012 = vadd.xlane.f32.xlu1 %v6011_v8  ;;  %v10536_v27 = vrot.slane %v5859_v1, %v9948_v61  ;;  %v10539_v13 = vrot.slane %v5859_v1, %v9950_v18 }
 0xad4   :  { %v5978_v28 = vpop.xlane.xlu0 %5977 }
 0xad5   :  { %v6014_v59 = vmul.f32 0.001953125, %v5978_v28  ;;  %v10555_v28 = vrot.slane %v5860_v22, %v9948_v61 }
 0xad7   :  { %v6022_v35 = vadd.f32 1e-05, %v6014_v59  ;;  %v10558_v59 = vrot.slane %v5860_v22, %v9950_v18 }
 0xad9   :  { %8104 = vrsqrt.f32 %v6022_v35  ;;  %v10561_v35 = vrot.slane %v5860_v22, %v9955_v11 }
 0xada   :  { %v5983_v58 = vpop.xlane.xlu1 %5982 }
 0xadb   :  { %v6015_v6 = vmul.f32 0.001953125, %v5983_v58  ;;  %v10564_v58 = vrot.slane %v5860_v22, %v9957_v0 }
 0xadd   :  { %v6023_v17 = vadd.f32 1e-05, %v6015_v6  ;;  %v5988_v29 = vpop.xlane.xlu0 %5987  ;;  %v10542_v6 = vrot.slane %v5859_v1, %v9955_v11 }
 0xade   :  { %v6016_v20 = vmul.f32 0.001953125, %v5988_v29  ;;  %v5993_v30 = vpop.xlane.xlu1 %5992 }
 0xadf   :  { %8106 = vrsqrt.f32 %v6023_v17  ;;  %v6017_v36 = vmul.f32 0.001953125, %v5993_v30  ;;  %v10545_v30 = vrot.slane %v5859_v1, %v9957_v0 }
 0xae0   :  { %v6024_v62 = vadd.f32 1e-05, %v6016_v20 }
 0xae1   :  { %v6025_v41 = vadd.f32 1e-05, %v6017_v36 }
 0xae2   :  { %8108 = vrsqrt.f32 %v6024_v62 }
 0xae3   :  { %8110 = vrsqrt.f32 %v6025_v41 }
 0xae6   :  { %v8105_v8 = vpop.eup %8104 }
 0xae7   :  { %v6039_v32 = vmul.f32 %v8105_v8, %v10330_v38  ;;  %v6041_v41 = vmul.f32 %v8105_v8, %v10336_v9  ;;  %v6038_v44 = vmul.f32 %v8105_v8, %v10327_v48  ;;  %v6040_v46 = vmul.f32 %v8105_v8, %v10333_v60 }
 0xae9   :  { %v6092_v38 = vmul.f32 %v10542_v6, %v6039_v32  ;;  %v6094_v9 = vmul.f32 %v10545_v30, %v6041_v41  ;;  %v6091_v48 = vmul.f32 %v10536_v27, %v6038_v44  ;;  %v6093_v60 = vmul.f32 %v10539_v13, %v6040_v46 }
 0xaeb   :  { %v6145_v8 = vadd.f32 %v10561_v35, %v6092_v38  ;;  %v6147_v22 = vadd.f32 %v10564_v58, %v6094_v9 }
 0xaec   :  { %v8107_v17 = vpop.eup %8106 }
 0xaed   :  { %v6043_v61 = vmul.f32 %v8107_v17, %v10350_v49  ;;  %v6045_v18 = vmul.f32 %v8107_v17, %v10356_v10  ;;  %v6042_v29 = vmul.f32 %v8107_v17, %v10347_v14  ;;  %v6044_v11 = vmul.f32 %v8107_v17, %v10353_v42 }
 0xaee   :  { %v6144_v49 = vadd.f32 %v10555_v28, %v6091_v48  ;;  %v6146_v10 = vadd.f32 %v10558_v59, %v6093_v60 }
 0xaef   :  { %v6096_v0 = vmul.f32 %v10542_v6, %v6043_v61  ;;  %v6098_v20 = vmul.f32 %v10545_v30, %v6045_v18  ;;  %v6095_v36 = vmul.f32 %v10536_v27, %v6042_v29  ;;  %v6097_v62 = vmul.f32 %v10539_v13, %v6044_v11  ;;  %v8109_v1 = vpop.eup %8108 }
 0xaf0   :  { %v8111_v14 = vpop.eup %8110  ;;  %v6047_v46 = vmul.f32 %v8109_v1, %v10366_v43  ;;  %v6049_v38 = vmul.f32 %v8109_v1, %v10387_v45  ;;  %v6046_v43 = vmul.f32 %v8109_v1, %v10363_v19  ;;  %v6048_v45 = vmul.f32 %v8109_v1, %v10369_v54 }
 0xaf1   :  { %v6149_v42 = vadd.f32 %v10561_v35, %v6096_v0  ;;  %v6151_v32 = vadd.f32 %v10564_v58, %v6098_v20  ;;  %v6148_v41 = vadd.f32 %v10555_v28, %v6095_v36  ;;  %v6150_v44 = vadd.f32 %v10558_v59, %v6097_v62 }
 0xaf2   :  { %v6051_v17 = vmul.f32 %v8111_v14, %v10377_v47  ;;  %v6053_v9 = vmul.f32 %v8111_v14, %v10392_v56  ;;  %v6100_v29 = vmul.f32 %v10542_v6, %v6047_v46  ;;  %v6102_v0 = vmul.f32 %v10545_v30, %v6049_v38  ;;  %v10862_v38 = vld [vmem:[#allocation28_spill] sm:$0xff] }
 0xaf3   :  { %v6177_v48 = vpack.c.bf16 %v6149_v42, %v6145_v8  ;;  %v6179_v61 = vpack.c.bf16 %v6151_v32, %v6147_v22  ;;  %v6176_v60 = vpack.c.bf16 %v6148_v41, %v6144_v49  ;;  %v6178_v18 = vpack.c.bf16 %v6150_v44, %v6146_v10 }
 0xaf4   :  { %v6104_v11 = vmul.f32 %v10542_v6, %v6051_v17  ;;  %v6106_v20 = vmul.f32 %v10545_v30, %v6053_v9  ;;  %v6050_v47 = vmul.f32 %v8111_v14, %v10374_v55  ;;  %v6153_v56 = vadd.f32 %v10561_v35, %v6100_v29 }
 0xaf5   :  { %6487 = vmatprep.mubr.bf16.mxu1 %v6177_v48  ;;  %6552 = vmatprep.mubr.bf16.mxu0 %v6179_v61  ;;  %v6155_v62 = vadd.f32 %v10564_v58, %v6102_v0  ;;  %v6099_v22 = vmul.f32 %v10536_v27, %v6046_v43  ;;  %v6052_v19 = vmul.f32 %v8111_v14, %v10380_v12 }
 0xaf6   :  { %6488 = vmatmul.mubr.bf16.vlgmr.msra.gmra.mxu1 %v6176_v60  ;;  %6553 = vmatmul.mubr.bf16.vlgmr.msra.gmra.mxu0 %v6178_v18  ;;  %v6157_v36 = vadd.f32 %v10561_v35, %v6104_v11  ;;  %v6159_v8 = vadd.f32 %v10564_v58, %v6106_v20  ;;  %v6103_v49 = vmul.f32 %v10536_v27, %v6050_v47 }
 0xaf7   :  { %7593 = vmatpush3.bf16.msra.mxu1 %v10406_v33  ;;  %v6101_v54 = vmul.f32 %v10539_v13, %v6048_v45  ;;  %v6152_v10 = vadd.f32 %v10555_v28, %v6099_v22  ;;  %v6105_v32 = vmul.f32 %v10539_v13, %v6052_v19  ;;  %v10863_v22 = vld [vmem:[#allocation65_spill] sm:$0xff] }
 0xaf8   :  { %v6181_v55 = vpack.c.bf16 %v6157_v36, %v6153_v56  ;;  %7586 = vmatprep.subr.bf16.mxu1 %v10408_v3  ;;  %v6183_v1 = vpack.c.bf16 %v6159_v8, %v6155_v62  ;;  %v6156_v42 = vadd.f32 %v10555_v28, %v6103_v49 }
 0xaf9   :  { %v6154_v44 = vadd.f32 %v10558_v59, %v6101_v54  ;;  %v6158_v12 = vadd.f32 %v10558_v59, %v6105_v32 }
 0xafa   :  { %6495 = vmatprep.mubr.bf16.mxu1 %v6181_v55  ;;  %6560 = vmatprep.mubr.bf16.mxu0 %v6183_v1  ;;  %v6180_v41 = vpack.c.bf16 %v6156_v42, %v6152_v10 }
 0xafb   :  { %7594 = vmatpush3.bf16.msra.mxu1 %v10412_v23  ;;  %v6182_v33 = vpack.c.bf16 %v6158_v12, %v6154_v44  ;;  %v10865_v44 = vld [vmem:[#allocation34_spill] sm:$0xff] }
 0xafc   :  { %7587 = vmatprep.subr.bf16.mxu1 %v10414_v31 }
 0xafe   :  { %6496 = vmatmul.mubr.bf16.gmra.mxu1 %v6180_v41  ;;  %6561 = vmatmul.mubr.bf16.gmra.mxu0 %v6182_v33 }
 0xaff   :  { %7595 = vmatpush3.bf16.msra.mxu1 %v10418_v7 }
 0xb00   :  { %7588 = vmatprep.subr.bf16.mxu1 %v10420_v15 }
 0xb03   :  { %7596 = vmatpush3.bf16.msra.mxu1 %v10423_v2 }
 0xb04   :  { %7589 = vmatprep.subr.bf16.mxu1 %v10426_v24 }
 0xb07   :  { %7597 = vmatpush3.bf16.msra.mxu1 %v10429_v16 }
 0xb08   :  { %7590 = vmatprep.subr.bf16.mxu1 %v10432_v26 }
 0xb09   :  { %v5998_v3 = vpop.xlane.xlu0 %5997 }
 0xb0a   :  { %v6018_v14 = vmul.f32 0.001953125, %v5998_v3 }
 0xb0b   :  { %7598 = vmatpush3.bf16.msra.mxu1 %v10435_v51 }
 0xb0c   :  { %v6026_v23 = vadd.f32 1e-05, %v6018_v14  ;;  %7591 = vmatprep.subr.bf16.mxu1 %v10438_v57 }
 0xb0e   :  { %8112 = vrsqrt.f32 %v6026_v23 }
 0xb0f   :  { %v6003_v31 = vpop.xlane.xlu1 %6002  ;;  %7599 = vmatpush3.bf16.msra.mxu1 %v10441_v5 }
 0xb10   :  { %v6019_v7 = vmul.f32 0.001953125, %v6003_v31  ;;  %7592 = vmatprep.subr.bf16.mxu1 %v10444_v4 }
 0xb12   :  { %v6027_v15 = vadd.f32 1e-05, %v6019_v7  ;;  %v6008_v2 = vpop.xlane.xlu0 %6007 }
 0xb13   :  { %7600 = vmatpush3.bf16.msra.mxu1 %v10447_v34  ;;  %v6020_v24 = vmul.f32 0.001953125, %v6008_v2  ;;  %v6013_v16 = vpop.xlane.xlu1 %6012 }
 0xb14   :  { %8114 = vrsqrt.f32 %v6027_v15  ;;  %v6021_v26 = vmul.f32 0.001953125, %v6013_v16  ;;  %v10867_v15 = vld [vmem:[#allocation31_spill] sm:$0xff] }
 0xb15   :  { %v6028_v46 = vadd.f32 1e-05, %v6020_v24 }
 0xb16   :  { %v6029_v51 = vadd.f32 1e-05, %v6021_v26  ;;  %v10868_v26 = vld [vmem:[#allocation35_spill] sm:$0xff] }
 0xb17   :  { %8116 = vrsqrt.f32 %v6028_v46 }
 0xb18   :  { %8118 = vrsqrt.f32 %v6029_v51 }
 0xb1b   :  { %v8113_v57 = vpop.eup %8112 }
 0xb1c   :  { %v6055_v17 = vmul.f32 %v8113_v57, %v10453_v37  ;;  %v6054_v5 = vmul.f32 %v8113_v57, %v10862_v38  ;;  %v6057_v49 = vmul.f32 %v8113_v57, %v10863_v22  ;;  %v6056_v12 = vmul.f32 %v8113_v57, %v10865_v44  ;;  %v10872_v44 = vld [vmem:[#allocation61_spill] sm:$0xff] }
 0xb1e   :  { %v6108_v4 = vmul.f32 %v10542_v6, %v6055_v17  ;;  %v6107_v48 = vmul.f32 %v10536_v27, %v6054_v5  ;;  %v6110_v54 = vmul.f32 %v10545_v30, %v6057_v49 }
 0xb20   :  { %v6161_v11 = vadd.f32 %v10561_v35, %v6108_v4  ;;  %v6160_v37 = vadd.f32 %v10555_v28, %v6107_v48  ;;  %v6163_v33 = vadd.f32 %v10564_v58, %v6110_v54 }
 0xb21   :  { %v8115_v9 = vpop.eup %8114 }
 0xb22   :  { %v6059_v34 = vmul.f32 %v8115_v9, %v10476_v25  ;;  %v6058_v61 = vmul.f32 %v8115_v9, %v10473_v40  ;;  %v6061_v0 = vmul.f32 %v8115_v9, %v10482_v52 }
 0xb24   :  { %v6112_v60 = vmul.f32 %v10542_v6, %v6059_v34  ;;  %v6111_v18 = vmul.f32 %v10536_v27, %v6058_v61  ;;  %v8117_v29 = vpop.eup %8116 }
 0xb25   :  { %v8119_v20 = vpop.eup %8118  ;;  %v6063_v25 = vmul.f32 %v8117_v29, %v10492_v50  ;;  %v6062_v40 = vmul.f32 %v8117_v29, %v10489_v53  ;;  %v6114_v50 = vmul.f32 %v10545_v30, %v6061_v0  ;;  %v6064_v46 = vmul.f32 %v8117_v29, %v10868_v26 }
 0xb26   :  { %v6165_v43 = vadd.f32 %v10561_v35, %v6112_v60  ;;  %v6164_v47 = vadd.f32 %v10555_v28, %v6111_v18  ;;  %v6067_v45 = vmul.f32 %v8119_v20, %v10503_v21  ;;  %v6066_v56 = vmul.f32 %v8119_v20, %v10500_v39 }
 0xb27   :  { %v6116_v8 = vmul.f32 %v10542_v6, %v6063_v25  ;;  %v6115_v19 = vmul.f32 %v10536_v27, %v6062_v40  ;;  %v6167_v32 = vadd.f32 %v10564_v58, %v6114_v50  ;;  %v6068_v2 = vmul.f32 %v8119_v20, %v10867_v15  ;;  %v10869_v25 = vld [vmem:[#allocation56_spill] sm:$0xff] }
 0xb28   :  { %v6185_v36 = vpack.c.bf16 %v6165_v43, %v6161_v11  ;;  %v6184_v62 = vpack.c.bf16 %v6164_v47, %v6160_v37  ;;  %v6120_v52 = vmul.f32 %v10542_v6, %v6067_v45  ;;  %v6119_v55 = vmul.f32 %v10536_v27, %v6066_v56  ;;  %v10864_v6 = vld [vmem:[#allocation30_spill] sm:$0xff] }
 0xb29   :  { %v6169_v53 = vadd.f32 %v10561_v35, %v6116_v8  ;;  %v6168_v10 = vadd.f32 %v10555_v28, %v6115_v19  ;;  %v6060_v42 = vmul.f32 %v8115_v9, %v10864_v6  ;;  %v6069_v27 = vmul.f32 %v8119_v20, %v10518_v63  ;;  %v10870_v19 = vld [vmem:[#allocation29_spill] sm:$0xff]  ;;  %v10871_v6 = vld [vmem:[#allocation60_spill] sm:$0xff] }
 0xb2a   :  { %6503 = vmatprep.mubr.bf16.mxu1 %v6185_v36  ;;  %v6173_v39 = vadd.f32 %v10561_v35, %v6120_v52  ;;  %v6172_v21 = vadd.f32 %v10555_v28, %v6119_v55  ;;  %v10866_v35 = vld [vmem:[#allocation37_spill] sm:$0xff]  ;;  %v6187_v23 = vpack.c.bf16 %v6167_v32, %v6163_v33  ;;  %v6109_v28 = vmul.f32 %v10539_v13, %v6056_v12 }
 0xb2b   :  { %6504 = vmatmul.mubr.bf16.gmra.mxu1 %v6184_v62  ;;  %v6065_v3 = vmul.f32 %v8117_v29, %v10866_v35  ;;  %v6113_v14 = vmul.f32 %v10539_v13, %v6060_v42  ;;  %v6122_v31 = vmul.f32 %v10545_v30, %v6069_v27  ;;  %v6121_v17 = vmul.f32 %v10539_v13, %v6068_v2 }
 0xb2c   :  { %v6189_v1 = vpack.c.bf16 %v6173_v39, %v6169_v53  ;;  %v6188_v41 = vpack.c.bf16 %v6172_v21, %v6168_v10  ;;  %v6162_v16 = vadd.f32 %v10558_v59, %v6109_v28  ;;  %v6117_v5 = vmul.f32 %v10539_v13, %v6064_v46 }
 0xb2d   :  { %v6118_v7 = vmul.f32 %v10545_v30, %v6065_v3  ;;  %v6166_v63 = vadd.f32 %v10558_v59, %v6113_v14  ;;  %v6175_v24 = vadd.f32 %v10564_v58, %v6122_v31  ;;  %v6174_v30 = vadd.f32 %v10558_v59, %v6121_v17 }
 0xb2e   :  { %6511 = vmatprep.mubr.bf16.mxu1 %v6189_v1  ;;  %v6170_v9 = vadd.f32 %v10558_v59, %v6117_v5  ;;  %v10873_v5 = vld [vmem:[#allocation62_spill] sm:$0xff] }
 0xb2f   :  { %v6171_v51 = vadd.f32 %v10564_v58, %v6118_v7  ;;  %v6186_v57 = vpack.c.bf16 %v6166_v63, %v6162_v16  ;;  %v10676_v58 = vld [vmem:[%s10713_s13] ss:$0 sm:$0xff]  ;;  %s8388_s13 = smov [#allocation20]  }
 0xb30   :  { %v6190_v4 = vpack.c.bf16 %v6174_v30, %v6170_v9  ;;  %s6606_s22 = sshll.u32 %s8388_s13, 4  ;;  %s6607_s22 = int_to_ptr.vmem [resolvable:$true] %s6606_s22 }
 0xb31   :  { %v6191_v38 = vpack.c.bf16 %v6175_v24, %v6171_v51  ;;  %s8328_s24 = scalar_lea.vmem %s6607_s22, 1024  ;;  %p8333_p9 = scmp.lt.s32.totalorder %s6607_s22, %s6607_s22 }
 0xb32   :  { %p8329_p8 = scmp.ne.s32.totalorder %s6607_s22, %s8328_s24  ;;  %p8334_p10 = scmp.lt.s32.totalorder %s8328_s24, %s8328_s24 }
 0xb33   :  { %6512 = vmatmul.mubr.bf16.gmra.mxu1 %v6188_v41 }
 0xb34   :  { %6568 = vmatprep.mubr.bf16.mxu1 %v6187_v23  ;;  %p8335_p11 = por %p8334_p10, %p8333_p9 }
 0xb36   :  { %p8336_p12 = pnand %p8335_p11, %p8329_p8 }
 0xb3b   :  { %6569 = vmatmul.mubr.bf16.vlgmr.msra.gmra.mxu1 %v6186_v57 }
 0xb3c   :  { %6576 = vmatprep.mubr.bf16.mxu1 %v6191_v38 }
 0xb43   :  { %6577 = vmatmul.mubr.bf16.gmra.mxu1 %v6190_v4 }
 0xbb6   :  { %v7089_v48 = vpop.f32.mrf.mxu1  ;;  %v7129_v34 = vpop.f32.mrf.mxu0 }
 0xbb8   :  { %v7090_v61 = vpop.f32.mrf.mxu1  ;;  %v7130_v60 = vpop.f32.mrf.mxu0 }
 0xbb9   :  { %v7091_v18 = vadd.f32 %v7090_v61, %v7089_v48  ;;  %v7131_v37 = vadd.f32 %v7130_v60, %v7129_v34 }
 0xbba   :  { %v7092_v29 = vpop.f32.mrf.mxu1  ;;  %v7132_v11 = vpop.f32.mrf.mxu0 }
 0xbbb   :  { %v6490_v13 = vadd.f32 %v7091_v18, %v10676_v58  ;;  %v10874_v18 = vld [vmem:[#allocation64_spill] sm:$0xff] }
 0xbbc   :  { %v7093_v0 = vpop.f32.mrf.mxu1  ;;  %v7133_v20 = vpop.f32.mrf.mxu0 }
 0xbbd   :  { %v6555_v59 = vadd.f32 %v7131_v37, %v6490_v13  ;;  %v7094_v43 = vadd.f32 %v7093_v0, %v7092_v29  ;;  %v7134_v56 = vadd.f32 %v7133_v20, %v7132_v11 }
 0xbbe   :  { %v7095_v47 = vpop.f32.mrf.mxu1  ;;  %v7135_v36 = vpop.f32.mrf.mxu0 }
 0xbbf   :  { %v6585_v40 = vadd.f32 %v6555_v59, %v10869_v25  ;;  %v6493_v45 = vadd.f32 %v7094_v43, %v10676_v58  ;;  %v10875_v59 = vld [vmem:[#allocation63_spill] sm:$0xff] }
 0xbc0   :  { %v7096_v62 = vpop.f32.mrf.mxu1  ;;  %v7136_v49 = vpop.f32.mrf.mxu0 }
 0xbc1   :  { %6593 = vst [vmem:[#allocation20] sm:$0xff] %v6585_v40  ;;  %v6558_v8 = vadd.f32 %v7134_v56, %v6493_v45  ;;  %v7097_v22 = vadd.f32 %v7096_v62, %v7095_v47  ;;  %v7137_v53 = vadd.f32 %v7136_v49, %v7135_v36  ;;  %v10876_v40 = vld [vmem:[#allocation66_spill] sm:$0xff] }
 0xbc2   :  { %v7098_v52 = vpop.f32.mrf.mxu1  ;;  %v7138_v39 = vpop.f32.mrf.mxu0 }
 0xbc3   :  { %v6586_v55 = vadd.f32 %v6558_v8, %v10870_v19  ;;  %v6498_v50 = vadd.f32 %v7097_v22, %v10676_v58 }
 0xbc4   :  { %v7099_v21 = vpop.f32.mrf.mxu1  ;;  %v7139_v10 = vpop.f32.mrf.mxu0 }
 0xbc5   :  { %6594 = vst [vmem:[#allocation20 + $0x8] sm:$0xff] %v6586_v55  ;;  %v6563_v54 = vadd.f32 %v7137_v53, %v6498_v50  ;;  %v7100_v1 = vadd.f32 %v7099_v21, %v7098_v52  ;;  %v7140_v27 = vadd.f32 %v7139_v10, %v7138_v39 }
 0xbc7   :  { %v6587_v42 = vadd.f32 %v6563_v54, %v10871_v6  ;;  %v6501_v32 = vadd.f32 %v7100_v1, %v10676_v58 }
 0xbc9   :  { %6595 = vst [vmem:[#allocation20 + $0x10] sm:$0xff] %v6587_v42  ;;  %v6566_v41 = vadd.f32 %v7140_v27, %v6501_v32 }
 0xbcb   :  { %v6588_v12 = vadd.f32 %v6566_v41, %v10872_v44 }
 0xbcd   :  { %6596 = vst [vmem:[#allocation20 + $0x18] sm:$0xff] %v6588_v12 }
 0xbeb   :  { %v7101_v33 = vpop.f32.mrf.mxu1 }
 0xbed   :  { %v7102_v35 = vpop.f32.mrf.mxu1 }
 0xbee   :  { %v7103_v63 = vadd.f32 %v7102_v35, %v7101_v33 }
 0xbef   :  { %v7104_v3 = vpop.f32.mrf.mxu1 }
 0xbf0   :  { %v6506_v24 = vadd.f32 %v7103_v63, %v10676_v58 }
 0xbf1   :  { %v7105_v14 = vpop.f32.mrf.mxu1 }
 0xbf2   :  { %v7106_v16 = vadd.f32 %v7105_v14, %v7104_v3 }
 0xbf3   :  { %v7107_v23 = vpop.f32.mrf.mxu1 }
 0xbf4   :  { %v6509_v17 = vadd.f32 %v7106_v16, %v10676_v58 }
 0xbf5   :  { %v7108_v31 = vpop.f32.mrf.mxu1 }
 0xbf6   :  { %v7109_v38 = vadd.f32 %v7108_v31, %v7107_v23 }
 0xbf7   :  { %v7110_v28 = vpop.f32.mrf.mxu1 }
 0xbf8   :  { %v6514_v61 = vadd.f32 %v7109_v38, %v10676_v58 }
 0xbf9   :  { %v7111_v7 = vpop.f32.mrf.mxu1 }
 0xbfa   :  { %v7112_v60 = vadd.f32 %v7111_v7, %v7110_v28 }
 0xbfb   :  { %v7141_v15 = vpop.f32.mrf.mxu1 }
 0xbfc   :  { %v6517_v20 = vadd.f32 %v7112_v60, %v10676_v58 }
 0xbfd   :  { %v7142_v2 = vpop.f32.mrf.mxu1 }
 0xbfe   :  { %v7143_v26 = vadd.f32 %v7142_v2, %v7141_v15 }
 0xbff   :  { %v7144_v46 = vpop.f32.mrf.mxu1 }
 0xc00   :  { %v6571_v51 = vadd.f32 %v7143_v26, %v6506_v24 }
 0xc01   :  { %v7145_v57 = vpop.f32.mrf.mxu1 }
 0xc02   :  { %v6589_v30 = vadd.f32 %v6571_v51, %v10873_v5  ;;  %v7146_v9 = vadd.f32 %v7145_v57, %v7144_v46 }
 0xc03   :  { %v7147_v4 = vpop.f32.mrf.mxu1 }
 0xc04   :  { %6597 = vst [vmem:[#allocation20 + $0x20] sm:$0xff] %v6589_v30  ;;  %v6574_v48 = vadd.f32 %v7146_v9, %v6509_v17 }
 0xc05   :  { %v7148_v34 = vpop.f32.mrf.mxu1 }
 0xc06   :  { %v6590_v29 = vadd.f32 %v6574_v48, %v10874_v18  ;;  %v7149_v11 = vadd.f32 %v7148_v34, %v7147_v4 }
 0xc07   :  { %v7150_v13 = vpop.f32.mrf.mxu1 }
 0xc08   :  { %6598 = vst [vmem:[#allocation20 + $0x28] sm:$0xff] %v6590_v29  ;;  %v6579_v37 = vadd.f32 %v7149_v11, %v6514_v61 }
 0xc09   :  { %v7151_v0 = vpop.f32.mrf.mxu1 }
 0xc0a   :  { %v6591_v43 = vadd.f32 %v6579_v37, %v10875_v59  ;;  %v7152_v47 = vadd.f32 %v7151_v0, %v7150_v13 }
 0xc0c   :  { %6599 = vst [vmem:[#allocation20 + $0x30] sm:$0xff] %v6591_v43  ;;  %v6582_v25 = vadd.f32 %v7152_v47, %v6517_v20 }
 0xc0e   :  { %v6592_v45 = vadd.f32 %v6582_v25, %v10876_v40 }
 0xc10   :  { %6600 = vst [vmem:[#allocation20 + $0x38] sm:$0xff] %v6592_v45 }
 0xc11   :  { %8339 = shalt.err (!%p8336_p12)
}
 0xc12   :  { %6612 = dma.vmem_to_hbm [thread:$0]  %s6607_s22, 1024, %s10714_s14, [#allocation5], %s8369_s5, %s8369_s5, %s8370_s23  }
 0xc13   :  { %8360 = dma.done.wait [#allocation5], 1024  }
 0xc14   :  { %8361 = vsyncadd [#allocation5], 4294966272 }
 0xc15   :  { %6616 = vsyncpa [#allocation4], 1 }
 0xc16   :  { %6617 = vsyncpa [#allocation7], 1 }
 0xc17   :  { %6618 = vsyncpa [#allocation10], 1 }
 0xc18   :  { %6619 = vsyncpa [#allocation13], 1 }
 0xc19   :  { %6620 = vsyncpa [#allocation16], 1 }
 0xc1a   :  { %6621 = vsyncpa [#allocation19], 1 }
 0xc1b   :  { %6622 = vsyncpa [#allocation5], 1 }

</bundles_post_ra>
